<compile_context>
chip_gen: v7x
topology: tpu7x:2x2x1
jax: 0.10.0
libtpu: 0.0.40
codegen_flags: <defaults>
</compile_context>

<pallas_src>
import functools

import jax
import jax.numpy as jnp
from jax.experimental import pallas as pl
from jax.experimental.pallas import tpu as pltpu

# Packed-weight layout: one (ROW_O + cout, 37) f32 array.
#   rows [ROW_A1, ROW_A1+2) : conv_atten[0]  (Co=2, Ci=4 -> 36 weight cols)
#   rows [ROW_A2, ROW_A2+1) : conv_atten[1]  (Co=1, Ci=2 -> 18 weight cols)
#   rows [ROW_O , ROW_O+Co) : conv_out       (Co=8, Ci=4 -> 36 weight cols)
# column BIAS_COL holds the folded-BN bias; weight col index = ci*9 + ky*3 + kx.
ROW_A1 = 0
ROW_A2 = 8
ROW_O = 16
BIAS_COL = 36


# ----------------------------------------------------------------------------- kernel

def uafm_kernel(x_ref, s_ref, wp_ref, out_ref, *, h, w):
    hw = h * w
    cin = x_ref.shape[1]
    cout = out_ref.shape[1]

    x = x_ref[0].astype(jnp.float32)        # (cin, hw) lane-dense channel planes
    s = s_ref[0].astype(jnp.float32)        # (cin, hw)
    wp = wp_ref[...].astype(jnp.float32)    # packed conv weights + biases

    # Edge-validity masks built in-kernel (no DMA): col/row of each flattened
    # H*W lane; a tap (dy, dx) is only valid where the shifted source pixel
    # exists inside the image (the roll wrap-around is killed by these masks).
    idx = jax.lax.broadcasted_iota(jnp.int32, (1, hw), 1)
    col = jnp.bitwise_and(idx, w - 1) if (w & (w - 1)) == 0 else idx % w
    one, zero = jnp.float32(1.0), jnp.float32(0.0)
    mask_l = jnp.where(col >= 1, one, zero)            # dx = -1 valid
    mask_r = jnp.where(col <= w - 2, one, zero)        # dx = +1 valid
    mask_t = jnp.where(idx >= w, one, zero)            # dy = -1 valid
    mask_b = jnp.where(idx < (h - 1) * w, one, zero)   # dy = +1 valid

    def conv3x3(rows, wrow0, n_out, relu):
        """3x3 'same' conv over register-resident (1, hw) channel planes.

        Taps are pltpu.roll lane rotations of the flattened planes. The dx=+-1
        slabs are shifted + W-edge-masked once and reused for all three dy
        offsets (a +-W roll preserves the column, so the hoisted mask stays
        valid); the dy=+-1 validity mask is applied once per dy group after the
        channel mix.  The channel mix is a VPU outer-product FMA with (n_out,1)
        weight columns; the folded-BN bias initializes the accumulator.
        """
        n_in = len(rows)
        wm = wp[wrow0:wrow0 + n_out, :n_in * 9]                     # (n_out, n_in*9)
        bias = wp[wrow0:wrow0 + n_out, BIAS_COL:BIAS_COL + 1]       # (n_out, 1)

        # dx = -1, 0, +1 slabs per input plane, masked once (hoisted).
        hx = [(pltpu.roll(r, shift=1, axis=1) * mask_l,
               r,
               pltpu.roll(r, shift=hw - 1, axis=1) * mask_r)
              for r in rows]

        acc = jnp.broadcast_to(bias, (n_out, hw))
        for kyi, vmask in ((0, mask_t), (1, None), (2, mask_b)):
            dy = kyi - 1
            part = None
            for kxi in range(3):
                for ci in range(n_in):
                    slab = hx[ci][kxi]                              # (1, hw)
                    if dy != 0:
                        slab = pltpu.roll(slab, shift=(-dy * w) % hw, axis=1)
                    c = ci * 9 + kyi * 3 + kxi
                    term = wm[:, c:c + 1] * slab                    # (n_out, hw)
                    part = term if part is None else part + term
            acc = acc + (part if vmask is None else part * vmask)
        if relu:
            acc = jnp.maximum(acc, 0.0)
        return acc

    # Attention input planes [mean(x), max(x), mean(skip), max(skip)]: small
    # sublane reduces over the NCHW channel axis; stay in vregs (no concat,
    # no scratch round-trip).
    inv_cin = jnp.float32(1.0 / cin)
    att_rows = [jnp.sum(x, axis=0, keepdims=True) * inv_cin,
                jnp.max(x, axis=0, keepdims=True),
                jnp.sum(s, axis=0, keepdims=True) * inv_cin,
                jnp.max(s, axis=0, keepdims=True)]

    # conv_atten: ConvBNReLU(4 -> 2) ; ConvBN(2 -> 1)   (BN folded in the wrapper)
    a1 = conv3x3(att_rows, ROW_A1, 2, relu=True)                     # (2, hw)
    a2 = conv3x3([a1[0:1, :], a1[1:2, :]], ROW_A2, 1, relu=False)    # (1, hw)

    # sigmoid on the lane-dense map: exp (EUP) + approximate reciprocal (EUP).
    att = pl.reciprocal(1.0 + jnp.exp(-a2), approx=True)             # (1, hw)

    # attention-weighted fusion, fused form: skip + a * (x - skip)
    fused = s + att * (x - s)                                        # (cin, hw)

    # conv_out: ConvBNReLU(cin -> cout); lane-dense full-block store.
    o = conv3x3([fused[i:i + 1, :] for i in range(cin)], ROW_O, cout, relu=True)
    out_ref[...] = o[None].astype(out_ref.dtype)


# ----------------------------------------------------------------------------- wrapper

@jax.jit
def uafm_forward(x_nchw, skip_nchw, params):
    n, cin, h, w = x_nchw.shape
    hw = h * w
    cout = params["wo"].shape[0]

    # NCHW kept end-to-end: only contiguous reshapes, no transposes.
    x2 = x_nchw.reshape(n, cin, hw)
    s2 = skip_nchw.reshape(n, cin, hw)

    # Pack all conv weights (OIHW flattened to (Co, Ci*9)) and folded-BN biases
    # into ONE small f32 array so the kernel gets a single tiny weight DMA
    # instead of six, with each conv stage starting on an 8-row boundary.
    pack_rows = ROW_O + cout
    packed = jnp.zeros((pack_rows, BIAS_COL + 1), jnp.float32)
    packed = packed.at[ROW_A1:ROW_A1 + 2, 0:36].set(params["wa1"].reshape(2, 36))
    packed = packed.at[ROW_A1:ROW_A1 + 2, BIAS_COL].set(params["ba1"])
    packed = packed.at[ROW_A2:ROW_A2 + 1, 0:18].set(params["wa2"].reshape(1, 18))
    packed = packed.at[ROW_A2:ROW_A2 + 1, BIAS_COL].set(params["ba2"])
    packed = packed.at[ROW_O:ROW_O + cout, 0:36].set(params["wo"].reshape(cout, 36))
    packed = packed.at[ROW_O:ROW_O + cout, BIAS_COL].set(params["bo"])

    kernel = functools.partial(uafm_kernel, h=h, w=w)

    out = pl.pallas_call(
        kernel,
        out_shape=jax.ShapeDtypeStruct((n, cout, hw), x_nchw.dtype),
        grid=(n,),
        in_specs=[
            pl.BlockSpec((1, cin, hw), lambda i: (i, 0, 0)),              # x planes
            pl.BlockSpec((1, cin, hw), lambda i: (i, 0, 0)),              # skip planes
            pl.BlockSpec((pack_rows, BIAS_COL + 1), lambda i: (0, 0)),    # packed weights
        ],
        out_specs=pl.BlockSpec((1, cout, hw), lambda i: (i, 0, 0)),
        compiler_params=pltpu.CompilerParams(
            dimension_semantics=("parallel",)),
    )(x2, s2, packed)

    return out.reshape(n, cout, h, w)


# ----------------------------------------------------------------------------- params

def _fold_bn(w_oihw, gamma, beta, mean, var, eps=1e-5):
    """Fold eval-mode BatchNorm into a bias-free conv (keeps OIHW layout)."""
    scale = gamma / jnp.sqrt(var + eps)
    w_f = w_oihw * scale[:, None, None, None]
    b_f = beta - mean * scale
    return w_f, b_f


def make_params(key, in_channels, out_channels):
    ks = jax.random.split(key, 6)

    def bn(k, c):
        kg, kb, km, kv = jax.random.split(k, 4)
        gamma = 1.0 + 0.1 * jax.random.normal(kg, (c,), jnp.float32)
        beta = 0.05 * jax.random.normal(kb, (c,), jnp.float32)
        mean = 0.1 * jax.random.normal(km, (c,), jnp.float32)
        var = 0.5 + 0.1 * jnp.abs(jax.random.normal(kv, (c,), jnp.float32))
        return gamma, beta, mean, var

    # conv_atten[0]: Conv2d(4, 2, 3) + BN + ReLU
    w1 = 0.2 * jax.random.normal(ks[0], (2, 4, 3, 3), jnp.float32)
    wa1, ba1 = _fold_bn(w1, *bn(ks[1], 2))
    # conv_atten[1]: Conv2d(2, 1, 3) + BN (no activation)
    w2 = 0.2 * jax.random.normal(ks[2], (1, 2, 3, 3), jnp.float32)
    wa2, ba2 = _fold_bn(w2, *bn(ks[3], 1))
    # conv_out: Conv2d(in, out, 3) + BN + ReLU
    w3 = 0.2 * jax.random.normal(ks[4], (out_channels, in_channels, 3, 3), jnp.float32)
    wo, bo = _fold_bn(w3, *bn(ks[5], out_channels))

    return {"wa1": wa1, "ba1": ba1, "wa2": wa2, "ba2": ba2, "wo": wo, "bo": bo}


# ----------------------------------------------------------------------------- pure-JAX reference

def uafm_reference(x, skip, p):
    def conv(inp, w_oihw, b):
        out = jax.lax.conv_general_dilated(
            inp, w_oihw, window_strides=(1, 1), padding="SAME",
            dimension_numbers=("NCHW", "OIHW", "NCHW"))
        return out + b.reshape(1, -1, 1, 1)

    att_in = jnp.concatenate(
        [jnp.mean(x, 1, keepdims=True), jnp.max(x, 1, keepdims=True),
         jnp.mean(skip, 1, keepdims=True), jnp.max(skip, 1, keepdims=True)], axis=1)
    a = jnp.maximum(conv(att_in, p["wa1"], p["ba1"]), 0.0)
    a = jax.nn.sigmoid(conv(a, p["wa2"], p["ba2"]))
    fused = x * a + skip * (1.0 - a)
    return jnp.maximum(conv(fused, p["wo"], p["bo"]), 0.0)


# ----------------------------------------------------------------------------- main

if __name__ == "__main__":
    N, Cin, H, W = 2, 4, 16, 16
    Cout = 8

    key = jax.random.PRNGKey(0)
    kx, kskip, kp = jax.random.split(key, 3)
    x = jax.random.normal(kx, (N, Cin, H, W), jnp.float32)      # NCHW, like PyTorch
    skip = jax.random.normal(kskip, (N, Cin, H, W), jnp.float32)
    params = make_params(kp, Cin, Cout)

    out = jax.block_until_ready(uafm_forward(x, skip, params))
    assert out.shape == (N, Cout, H, W), out.shape

    ref = jax.block_until_ready(uafm_reference(x, skip, params))
    max_err = float(jnp.max(jnp.abs(out - ref)))
    # tolerance covers the approximate EUP reciprocal used for the sigmoid
    assert max_err < 2e-2, max_err

    print("KERNEL_OK")
</pallas_src>

<mosaic_0001>
module attributes {stable_mosaic.version = 11 : i64} {
  func.func @uafm_kernel(%arg0: i32, %arg1: memref<1x4x256xf32, #tpu.memory_space<vmem>>, %arg2: memref<1x4x256xf32, #tpu.memory_space<vmem>>, %arg3: memref<24x37xf32, #tpu.memory_space<vmem>>, %arg4: memref<1x8x256xf32, #tpu.memory_space<vmem>>) attributes {dimension_semantics = [#tpu.dimension_semantics<parallel>], iteration_bounds = array<i64: 2>, scalar_prefetch = 0 : i64, scratch_operands = 0 : i64, tpu.core_type = #tpu.core_type<tc>, window_params = [{transform_indices = @transform_0, window_bounds = array<i64: 1, 4, 256>}, {transform_indices = @transform_1, window_bounds = array<i64: 1, 4, 256>}, {pipeline_mode = #tpu.pipeline_mode<synchronous>, transform_indices = @transform_2, window_bounds = array<i64: 24, 37>}, {transform_indices = @transform_3, window_bounds = array<i64: 1, 8, 256>}]} {
    %c0 = arith.constant 0 : index
    %c0_0 = arith.constant 0 : index
    %c0_1 = arith.constant 0 : index
    %0 = vector.load %arg1[%c0, %c0_0, %c0_1] : memref<1x4x256xf32, #tpu.memory_space<vmem>>, vector<1x4x256xf32>
    %1 = vector.shape_cast %0 : vector<1x4x256xf32> to vector<4x256xf32>
    %c0_2 = arith.constant 0 : index
    %c0_3 = arith.constant 0 : index
    %c0_4 = arith.constant 0 : index
    %2 = vector.load %arg2[%c0_2, %c0_3, %c0_4] : memref<1x4x256xf32, #tpu.memory_space<vmem>>, vector<1x4x256xf32>
    %3 = vector.shape_cast %2 : vector<1x4x256xf32> to vector<4x256xf32>
    %c0_5 = arith.constant 0 : index
    %c0_6 = arith.constant 0 : index
    %4 = vector.load %arg3[%c0_5, %c0_6] : memref<24x37xf32, #tpu.memory_space<vmem>>, vector<24x37xf32>
    %5 = tpu.iota {dimensions = array<i32: 1>} : vector<1x256xi32>
    %c15_i32 = arith.constant 15 : i32
    %6 = vector.broadcast %c15_i32 : i32 to vector<1x256xi32>
    %7 = arith.andi %5, %6 : vector<1x256xi32>
    %c1_i32 = arith.constant 1 : i32
    %8 = vector.broadcast %c1_i32 : i32 to vector<1x256xi32>
    %9 = arith.cmpi sge, %7, %8 : vector<1x256xi32>
    %cst = arith.constant 1.000000e+00 : f32
    %cst_7 = arith.constant 0.000000e+00 : f32
    %10 = vector.broadcast %cst : f32 to vector<1x256xf32>
    %11 = vector.broadcast %cst_7 : f32 to vector<1x256xf32>
    %12 = arith.select %9, %10, %11 : vector<1x256xi1>, vector<1x256xf32>
    %c14_i32 = arith.constant 14 : i32
    %13 = vector.broadcast %c14_i32 : i32 to vector<1x256xi32>
    %14 = arith.cmpi sle, %7, %13 : vector<1x256xi32>
    %cst_8 = arith.constant 1.000000e+00 : f32
    %cst_9 = arith.constant 0.000000e+00 : f32
    %15 = vector.broadcast %cst_8 : f32 to vector<1x256xf32>
    %16 = vector.broadcast %cst_9 : f32 to vector<1x256xf32>
    %17 = arith.select %14, %15, %16 : vector<1x256xi1>, vector<1x256xf32>
    %c16_i32 = arith.constant 16 : i32
    %18 = vector.broadcast %c16_i32 : i32 to vector<1x256xi32>
    %19 = arith.cmpi sge, %5, %18 : vector<1x256xi32>
    %cst_10 = arith.constant 1.000000e+00 : f32
    %cst_11 = arith.constant 0.000000e+00 : f32
    %20 = vector.broadcast %cst_10 : f32 to vector<1x256xf32>
    %21 = vector.broadcast %cst_11 : f32 to vector<1x256xf32>
    %22 = arith.select %19, %20, %21 : vector<1x256xi1>, vector<1x256xf32>
    %c240_i32 = arith.constant 240 : i32
    %23 = vector.broadcast %c240_i32 : i32 to vector<1x256xi32>
    %24 = arith.cmpi slt, %5, %23 : vector<1x256xi32>
    %cst_12 = arith.constant 1.000000e+00 : f32
    %cst_13 = arith.constant 0.000000e+00 : f32
    %25 = vector.broadcast %cst_12 : f32 to vector<1x256xf32>
    %26 = vector.broadcast %cst_13 : f32 to vector<1x256xf32>
    %27 = arith.select %24, %25, %26 : vector<1x256xi1>, vector<1x256xf32>
    %cst_14 = arith.constant dense<0.000000e+00> : vector<256xf32>
    %28 = vector.multi_reduction <add>, %1, %cst_14 [0] : vector<4x256xf32> to vector<256xf32>
    %29 = vector.shape_cast %28 : vector<256xf32> to vector<1x256xf32>
    %cst_15 = arith.constant 2.500000e-01 : f32
    %30 = vector.broadcast %cst_15 : f32 to vector<1x256xf32>
    %31 = arith.mulf %29, %30 : vector<1x256xf32>
    %cst_16 = arith.constant dense<0xFF800000> : vector<256xf32>
    %32 = vector.multi_reduction <maximumf>, %1, %cst_16 [0] : vector<4x256xf32> to vector<256xf32>
    %33 = vector.shape_cast %32 : vector<256xf32> to vector<1x256xf32>
    %cst_17 = arith.constant dense<0.000000e+00> : vector<256xf32>
    %34 = vector.multi_reduction <add>, %3, %cst_17 [0] : vector<4x256xf32> to vector<256xf32>
    %35 = vector.shape_cast %34 : vector<256xf32> to vector<1x256xf32>
    %cst_18 = arith.constant 2.500000e-01 : f32
    %36 = vector.broadcast %cst_18 : f32 to vector<1x256xf32>
    %37 = arith.mulf %35, %36 : vector<1x256xf32>
    %cst_19 = arith.constant dense<0xFF800000> : vector<256xf32>
    %38 = vector.multi_reduction <maximumf>, %3, %cst_19 [0] : vector<4x256xf32> to vector<256xf32>
    %39 = vector.shape_cast %38 : vector<256xf32> to vector<1x256xf32>
    %40 = vector.extract_strided_slice %4 {offsets = [0, 0], sizes = [2, 36], strides = [1, 1]} : vector<24x37xf32> to vector<2x36xf32>
    %41 = vector.extract_strided_slice %4 {offsets = [0, 36], sizes = [2, 1], strides = [1, 1]} : vector<24x37xf32> to vector<2x1xf32>
    %c1_i32_20 = arith.constant 1 : i32
    %42 = tpu.dynamic_rotate %31 by %c1_i32_20 dim 1 : vector<1x256xf32>, i32 -> vector<1x256xf32>
    %43 = arith.mulf %42, %12 : vector<1x256xf32>
    %c255_i32 = arith.constant 255 : i32
    %44 = tpu.dynamic_rotate %31 by %c255_i32 dim 1 : vector<1x256xf32>, i32 -> vector<1x256xf32>
    %45 = arith.mulf %44, %17 : vector<1x256xf32>
    %c1_i32_21 = arith.constant 1 : i32
    %46 = tpu.dynamic_rotate %33 by %c1_i32_21 dim 1 : vector<1x256xf32>, i32 -> vector<1x256xf32>
    %47 = arith.mulf %46, %12 : vector<1x256xf32>
    %c255_i32_22 = arith.constant 255 : i32
    %48 = tpu.dynamic_rotate %33 by %c255_i32_22 dim 1 : vector<1x256xf32>, i32 -> vector<1x256xf32>
    %49 = arith.mulf %48, %17 : vector<1x256xf32>
    %c1_i32_23 = arith.constant 1 : i32
    %50 = tpu.dynamic_rotate %37 by %c1_i32_23 dim 1 : vector<1x256xf32>, i32 -> vector<1x256xf32>
    %51 = arith.mulf %50, %12 : vector<1x256xf32>
    %c255_i32_24 = arith.constant 255 : i32
    %52 = tpu.dynamic_rotate %37 by %c255_i32_24 dim 1 : vector<1x256xf32>, i32 -> vector<1x256xf32>
    %53 = arith.mulf %52, %17 : vector<1x256xf32>
    %c1_i32_25 = arith.constant 1 : i32
    %54 = tpu.dynamic_rotate %39 by %c1_i32_25 dim 1 : vector<1x256xf32>, i32 -> vector<1x256xf32>
    %55 = arith.mulf %54, %12 : vector<1x256xf32>
    %c255_i32_26 = arith.constant 255 : i32
    %56 = tpu.dynamic_rotate %39 by %c255_i32_26 dim 1 : vector<1x256xf32>, i32 -> vector<1x256xf32>
    %57 = arith.mulf %56, %17 : vector<1x256xf32>
    %58 = vector.shape_cast %41 : vector<2x1xf32> to vector<2x1xf32>
    %59 = vector.broadcast %58 : vector<2x1xf32> to vector<2x256xf32>
    %c16_i32_27 = arith.constant 16 : i32
    %60 = tpu.dynamic_rotate %43 by %c16_i32_27 dim 1 : vector<1x256xf32>, i32 -> vector<1x256xf32>
    %61 = vector.extract_strided_slice %40 {offsets = [0, 0], sizes = [2, 1], strides = [1, 1]} : vector<2x36xf32> to vector<2x1xf32>
    %62 = vector.broadcast %61 : vector<2x1xf32> to vector<2x256xf32>
    %63 = vector.broadcast %60 : vector<1x256xf32> to vector<2x256xf32>
    %64 = arith.mulf %62, %63 : vector<2x256xf32>
    %c16_i32_28 = arith.constant 16 : i32
    %65 = tpu.dynamic_rotate %47 by %c16_i32_28 dim 1 : vector<1x256xf32>, i32 -> vector<1x256xf32>
    %66 = vector.extract_strided_slice %40 {offsets = [0, 9], sizes = [2, 1], strides = [1, 1]} : vector<2x36xf32> to vector<2x1xf32>
    %67 = vector.broadcast %66 : vector<2x1xf32> to vector<2x256xf32>
    %68 = vector.broadcast %65 : vector<1x256xf32> to vector<2x256xf32>
    %69 = arith.mulf %67, %68 : vector<2x256xf32>
    %70 = arith.addf %64, %69 : vector<2x256xf32>
    %c16_i32_29 = arith.constant 16 : i32
    %71 = tpu.dynamic_rotate %51 by %c16_i32_29 dim 1 : vector<1x256xf32>, i32 -> vector<1x256xf32>
    %72 = vector.extract_strided_slice %40 {offsets = [0, 18], sizes = [2, 1], strides = [1, 1]} : vector<2x36xf32> to vector<2x1xf32>
    %73 = vector.broadcast %72 : vector<2x1xf32> to vector<2x256xf32>
    %74 = vector.broadcast %71 : vector<1x256xf32> to vector<2x256xf32>
    %75 = arith.mulf %73, %74 : vector<2x256xf32>
    %76 = arith.addf %70, %75 : vector<2x256xf32>
    %c16_i32_30 = arith.constant 16 : i32
    %77 = tpu.dynamic_rotate %55 by %c16_i32_30 dim 1 : vector<1x256xf32>, i32 -> vector<1x256xf32>
    %78 = vector.extract_strided_slice %40 {offsets = [0, 27], sizes = [2, 1], strides = [1, 1]} : vector<2x36xf32> to vector<2x1xf32>
    %79 = vector.broadcast %78 : vector<2x1xf32> to vector<2x256xf32>
    %80 = vector.broadcast %77 : vector<1x256xf32> to vector<2x256xf32>
    %81 = arith.mulf %79, %80 : vector<2x256xf32>
    %82 = arith.addf %76, %81 : vector<2x256xf32>
    %c16_i32_31 = arith.constant 16 : i32
    %83 = tpu.dynamic_rotate %31 by %c16_i32_31 dim 1 : vector<1x256xf32>, i32 -> vector<1x256xf32>
    %84 = vector.extract_strided_slice %40 {offsets = [0, 1], sizes = [2, 1], strides = [1, 1]} : vector<2x36xf32> to vector<2x1xf32>
    %85 = vector.broadcast %84 : vector<2x1xf32> to vector<2x256xf32>
    %86 = vector.broadcast %83 : vector<1x256xf32> to vector<2x256xf32>
    %87 = arith.mulf %85, %86 : vector<2x256xf32>
    %88 = arith.addf %82, %87 : vector<2x256xf32>
    %c16_i32_32 = arith.constant 16 : i32
    %89 = tpu.dynamic_rotate %33 by %c16_i32_32 dim 1 : vector<1x256xf32>, i32 -> vector<1x256xf32>
    %90 = vector.extract_strided_slice %40 {offsets = [0, 10], sizes = [2, 1], strides = [1, 1]} : vector<2x36xf32> to vector<2x1xf32>
    %91 = vector.broadcast %90 : vector<2x1xf32> to vector<2x256xf32>
    %92 = vector.broadcast %89 : vector<1x256xf32> to vector<2x256xf32>
    %93 = arith.mulf %91, %92 : vector<2x256xf32>
    %94 = arith.addf %88, %93 : vector<2x256xf32>
    %c16_i32_33 = arith.constant 16 : i32
    %95 = tpu.dynamic_rotate %37 by %c16_i32_33 dim 1 : vector<1x256xf32>, i32 -> vector<1x256xf32>
    %96 = vector.extract_strided_slice %40 {offsets = [0, 19], sizes = [2, 1], strides = [1, 1]} : vector<2x36xf32> to vector<2x1xf32>
    %97 = vector.broadcast %96 : vector<2x1xf32> to vector<2x256xf32>
    %98 = vector.broadcast %95 : vector<1x256xf32> to vector<2x256xf32>
    %99 = arith.mulf %97, %98 : vector<2x256xf32>
    %100 = arith.addf %94, %99 : vector<2x256xf32>
    %c16_i32_34 = arith.constant 16 : i32
    %101 = tpu.dynamic_rotate %39 by %c16_i32_34 dim 1 : vector<1x256xf32>, i32 -> vector<1x256xf32>
    %102 = vector.extract_strided_slice %40 {offsets = [0, 28], sizes = [2, 1], strides = [1, 1]} : vector<2x36xf32> to vector<2x1xf32>
    %103 = vector.broadcast %102 : vector<2x1xf32> to vector<2x256xf32>
    %104 = vector.broadcast %101 : vector<1x256xf32> to vector<2x256xf32>
    %105 = arith.mulf %103, %104 : vector<2x256xf32>
    %106 = arith.addf %100, %105 : vector<2x256xf32>
    %c16_i32_35 = arith.constant 16 : i32
    %107 = tpu.dynamic_rotate %45 by %c16_i32_35 dim 1 : vector<1x256xf32>, i32 -> vector<1x256xf32>
    %108 = vector.extract_strided_slice %40 {offsets = [0, 2], sizes = [2, 1], strides = [1, 1]} : vector<2x36xf32> to vector<2x1xf32>
    %109 = vector.broadcast %108 : vector<2x1xf32> to vector<2x256xf32>
    %110 = vector.broadcast %107 : vector<1x256xf32> to vector<2x256xf32>
    %111 = arith.mulf %109, %110 : vector<2x256xf32>
    %112 = arith.addf %106, %111 : vector<2x256xf32>
    %c16_i32_36 = arith.constant 16 : i32
    %113 = tpu.dynamic_rotate %49 by %c16_i32_36 dim 1 : vector<1x256xf32>, i32 -> vector<1x256xf32>
    %114 = vector.extract_strided_slice %40 {offsets = [0, 11], sizes = [2, 1], strides = [1, 1]} : vector<2x36xf32> to vector<2x1xf32>
    %115 = vector.broadcast %114 : vector<2x1xf32> to vector<2x256xf32>
    %116 = vector.broadcast %113 : vector<1x256xf32> to vector<2x256xf32>
    %117 = arith.mulf %115, %116 : vector<2x256xf32>
    %118 = arith.addf %112, %117 : vector<2x256xf32>
    %c16_i32_37 = arith.constant 16 : i32
    %119 = tpu.dynamic_rotate %53 by %c16_i32_37 dim 1 : vector<1x256xf32>, i32 -> vector<1x256xf32>
    %120 = vector.extract_strided_slice %40 {offsets = [0, 20], sizes = [2, 1], strides = [1, 1]} : vector<2x36xf32> to vector<2x1xf32>
    %121 = vector.broadcast %120 : vector<2x1xf32> to vector<2x256xf32>
    %122 = vector.broadcast %119 : vector<1x256xf32> to vector<2x256xf32>
    %123 = arith.mulf %121, %122 : vector<2x256xf32>
    %124 = arith.addf %118, %123 : vector<2x256xf32>
    %c16_i32_38 = arith.constant 16 : i32
    %125 = tpu.dynamic_rotate %57 by %c16_i32_38 dim 1 : vector<1x256xf32>, i32 -> vector<1x256xf32>
    %126 = vector.extract_strided_slice %40 {offsets = [0, 29], sizes = [2, 1], strides = [1, 1]} : vector<2x36xf32> to vector<2x1xf32>
    %127 = vector.broadcast %126 : vector<2x1xf32> to vector<2x256xf32>
    %128 = vector.broadcast %125 : vector<1x256xf32> to vector<2x256xf32>
    %129 = arith.mulf %127, %128 : vector<2x256xf32>
    %130 = arith.addf %124, %129 : vector<2x256xf32>
    %131 = vector.broadcast %22 : vector<1x256xf32> to vector<2x256xf32>
    %132 = arith.mulf %130, %131 : vector<2x256xf32>
    %133 = arith.addf %59, %132 : vector<2x256xf32>
    %134 = vector.extract_strided_slice %40 {offsets = [0, 3], sizes = [2, 1], strides = [1, 1]} : vector<2x36xf32> to vector<2x1xf32>
    %135 = vector.broadcast %134 : vector<2x1xf32> to vector<2x256xf32>
    %136 = vector.broadcast %43 : vector<1x256xf32> to vector<2x256xf32>
    %137 = arith.mulf %135, %136 : vector<2x256xf32>
    %138 = vector.extract_strided_slice %40 {offsets = [0, 12], sizes = [2, 1], strides = [1, 1]} : vector<2x36xf32> to vector<2x1xf32>
    %139 = vector.broadcast %138 : vector<2x1xf32> to vector<2x256xf32>
    %140 = vector.broadcast %47 : vector<1x256xf32> to vector<2x256xf32>
    %141 = arith.mulf %139, %140 : vector<2x256xf32>
    %142 = arith.addf %137, %141 : vector<2x256xf32>
    %143 = vector.extract_strided_slice %40 {offsets = [0, 21], sizes = [2, 1], strides = [1, 1]} : vector<2x36xf32> to vector<2x1xf32>
    %144 = vector.broadcast %143 : vector<2x1xf32> to vector<2x256xf32>
    %145 = vector.broadcast %51 : vector<1x256xf32> to vector<2x256xf32>
    %146 = arith.mulf %144, %145 : vector<2x256xf32>
    %147 = arith.addf %142, %146 : vector<2x256xf32>
    %148 = vector.extract_strided_slice %40 {offsets = [0, 30], sizes = [2, 1], strides = [1, 1]} : vector<2x36xf32> to vector<2x1xf32>
    %149 = vector.broadcast %148 : vector<2x1xf32> to vector<2x256xf32>
    %150 = vector.broadcast %55 : vector<1x256xf32> to vector<2x256xf32>
    %151 = arith.mulf %149, %150 : vector<2x256xf32>
    %152 = arith.addf %147, %151 : vector<2x256xf32>
    %153 = vector.extract_strided_slice %40 {offsets = [0, 4], sizes = [2, 1], strides = [1, 1]} : vector<2x36xf32> to vector<2x1xf32>
    %154 = vector.broadcast %153 : vector<2x1xf32> to vector<2x256xf32>
    %155 = vector.broadcast %31 : vector<1x256xf32> to vector<2x256xf32>
    %156 = arith.mulf %154, %155 : vector<2x256xf32>
    %157 = arith.addf %152, %156 : vector<2x256xf32>
    %158 = vector.extract_strided_slice %40 {offsets = [0, 13], sizes = [2, 1], strides = [1, 1]} : vector<2x36xf32> to vector<2x1xf32>
    %159 = vector.broadcast %158 : vector<2x1xf32> to vector<2x256xf32>
    %160 = vector.broadcast %33 : vector<1x256xf32> to vector<2x256xf32>
    %161 = arith.mulf %159, %160 : vector<2x256xf32>
    %162 = arith.addf %157, %161 : vector<2x256xf32>
    %163 = vector.extract_strided_slice %40 {offsets = [0, 22], sizes = [2, 1], strides = [1, 1]} : vector<2x36xf32> to vector<2x1xf32>
    %164 = vector.broadcast %163 : vector<2x1xf32> to vector<2x256xf32>
    %165 = vector.broadcast %37 : vector<1x256xf32> to vector<2x256xf32>
    %166 = arith.mulf %164, %165 : vector<2x256xf32>
    %167 = arith.addf %162, %166 : vector<2x256xf32>
    %168 = vector.extract_strided_slice %40 {offsets = [0, 31], sizes = [2, 1], strides = [1, 1]} : vector<2x36xf32> to vector<2x1xf32>
    %169 = vector.broadcast %168 : vector<2x1xf32> to vector<2x256xf32>
    %170 = vector.broadcast %39 : vector<1x256xf32> to vector<2x256xf32>
    %171 = arith.mulf %169, %170 : vector<2x256xf32>
    %172 = arith.addf %167, %171 : vector<2x256xf32>
    %173 = vector.extract_strided_slice %40 {offsets = [0, 5], sizes = [2, 1], strides = [1, 1]} : vector<2x36xf32> to vector<2x1xf32>
    %174 = vector.broadcast %173 : vector<2x1xf32> to vector<2x256xf32>
    %175 = vector.broadcast %45 : vector<1x256xf32> to vector<2x256xf32>
    %176 = arith.mulf %174, %175 : vector<2x256xf32>
    %177 = arith.addf %172, %176 : vector<2x256xf32>
    %178 = vector.extract_strided_slice %40 {offsets = [0, 14], sizes = [2, 1], strides = [1, 1]} : vector<2x36xf32> to vector<2x1xf32>
    %179 = vector.broadcast %178 : vector<2x1xf32> to vector<2x256xf32>
    %180 = vector.broadcast %49 : vector<1x256xf32> to vector<2x256xf32>
    %181 = arith.mulf %179, %180 : vector<2x256xf32>
    %182 = arith.addf %177, %181 : vector<2x256xf32>
    %183 = vector.extract_strided_slice %40 {offsets = [0, 23], sizes = [2, 1], strides = [1, 1]} : vector<2x36xf32> to vector<2x1xf32>
    %184 = vector.broadcast %183 : vector<2x1xf32> to vector<2x256xf32>
    %185 = vector.broadcast %53 : vector<1x256xf32> to vector<2x256xf32>
    %186 = arith.mulf %184, %185 : vector<2x256xf32>
    %187 = arith.addf %182, %186 : vector<2x256xf32>
    %188 = vector.extract_strided_slice %40 {offsets = [0, 32], sizes = [2, 1], strides = [1, 1]} : vector<2x36xf32> to vector<2x1xf32>
    %189 = vector.broadcast %188 : vector<2x1xf32> to vector<2x256xf32>
    %190 = vector.broadcast %57 : vector<1x256xf32> to vector<2x256xf32>
    %191 = arith.mulf %189, %190 : vector<2x256xf32>
    %192 = arith.addf %187, %191 : vector<2x256xf32>
    %193 = arith.addf %133, %192 : vector<2x256xf32>
    %c240_i32_39 = arith.constant 240 : i32
    %194 = tpu.dynamic_rotate %43 by %c240_i32_39 dim 1 : vector<1x256xf32>, i32 -> vector<1x256xf32>
    %195 = vector.extract_strided_slice %40 {offsets = [0, 6], sizes = [2, 1], strides = [1, 1]} : vector<2x36xf32> to vector<2x1xf32>
    %196 = vector.broadcast %195 : vector<2x1xf32> to vector<2x256xf32>
    %197 = vector.broadcast %194 : vector<1x256xf32> to vector<2x256xf32>
    %198 = arith.mulf %196, %197 : vector<2x256xf32>
    %c240_i32_40 = arith.constant 240 : i32
    %199 = tpu.dynamic_rotate %47 by %c240_i32_40 dim 1 : vector<1x256xf32>, i32 -> vector<1x256xf32>
    %200 = vector.extract_strided_slice %40 {offsets = [0, 15], sizes = [2, 1], strides = [1, 1]} : vector<2x36xf32> to vector<2x1xf32>
    %201 = vector.broadcast %200 : vector<2x1xf32> to vector<2x256xf32>
    %202 = vector.broadcast %199 : vector<1x256xf32> to vector<2x256xf32>
    %203 = arith.mulf %201, %202 : vector<2x256xf32>
    %204 = arith.addf %198, %203 : vector<2x256xf32>
    %c240_i32_41 = arith.constant 240 : i32
    %205 = tpu.dynamic_rotate %51 by %c240_i32_41 dim 1 : vector<1x256xf32>, i32 -> vector<1x256xf32>
    %206 = vector.extract_strided_slice %40 {offsets = [0, 24], sizes = [2, 1], strides = [1, 1]} : vector<2x36xf32> to vector<2x1xf32>
    %207 = vector.broadcast %206 : vector<2x1xf32> to vector<2x256xf32>
    %208 = vector.broadcast %205 : vector<1x256xf32> to vector<2x256xf32>
    %209 = arith.mulf %207, %208 : vector<2x256xf32>
    %210 = arith.addf %204, %209 : vector<2x256xf32>
    %c240_i32_42 = arith.constant 240 : i32
    %211 = tpu.dynamic_rotate %55 by %c240_i32_42 dim 1 : vector<1x256xf32>, i32 -> vector<1x256xf32>
    %212 = vector.extract_strided_slice %40 {offsets = [0, 33], sizes = [2, 1], strides = [1, 1]} : vector<2x36xf32> to vector<2x1xf32>
    %213 = vector.broadcast %212 : vector<2x1xf32> to vector<2x256xf32>
    %214 = vector.broadcast %211 : vector<1x256xf32> to vector<2x256xf32>
    %215 = arith.mulf %213, %214 : vector<2x256xf32>
    %216 = arith.addf %210, %215 : vector<2x256xf32>
    %c240_i32_43 = arith.constant 240 : i32
    %217 = tpu.dynamic_rotate %31 by %c240_i32_43 dim 1 : vector<1x256xf32>, i32 -> vector<1x256xf32>
    %218 = vector.extract_strided_slice %40 {offsets = [0, 7], sizes = [2, 1], strides = [1, 1]} : vector<2x36xf32> to vector<2x1xf32>
    %219 = vector.broadcast %218 : vector<2x1xf32> to vector<2x256xf32>
    %220 = vector.broadcast %217 : vector<1x256xf32> to vector<2x256xf32>
    %221 = arith.mulf %219, %220 : vector<2x256xf32>
    %222 = arith.addf %216, %221 : vector<2x256xf32>
    %c240_i32_44 = arith.constant 240 : i32
    %223 = tpu.dynamic_rotate %33 by %c240_i32_44 dim 1 : vector<1x256xf32>, i32 -> vector<1x256xf32>
    %224 = vector.extract_strided_slice %40 {offsets = [0, 16], sizes = [2, 1], strides = [1, 1]} : vector<2x36xf32> to vector<2x1xf32>
    %225 = vector.broadcast %224 : vector<2x1xf32> to vector<2x256xf32>
    %226 = vector.broadcast %223 : vector<1x256xf32> to vector<2x256xf32>
    %227 = arith.mulf %225, %226 : vector<2x256xf32>
    %228 = arith.addf %222, %227 : vector<2x256xf32>
    %c240_i32_45 = arith.constant 240 : i32
    %229 = tpu.dynamic_rotate %37 by %c240_i32_45 dim 1 : vector<1x256xf32>, i32 -> vector<1x256xf32>
    %230 = vector.extract_strided_slice %40 {offsets = [0, 25], sizes = [2, 1], strides = [1, 1]} : vector<2x36xf32> to vector<2x1xf32>
    %231 = vector.broadcast %230 : vector<2x1xf32> to vector<2x256xf32>
    %232 = vector.broadcast %229 : vector<1x256xf32> to vector<2x256xf32>
    %233 = arith.mulf %231, %232 : vector<2x256xf32>
    %234 = arith.addf %228, %233 : vector<2x256xf32>
    %c240_i32_46 = arith.constant 240 : i32
    %235 = tpu.dynamic_rotate %39 by %c240_i32_46 dim 1 : vector<1x256xf32>, i32 -> vector<1x256xf32>
    %236 = vector.extract_strided_slice %40 {offsets = [0, 34], sizes = [2, 1], strides = [1, 1]} : vector<2x36xf32> to vector<2x1xf32>
    %237 = vector.broadcast %236 : vector<2x1xf32> to vector<2x256xf32>
    %238 = vector.broadcast %235 : vector<1x256xf32> to vector<2x256xf32>
    %239 = arith.mulf %237, %238 : vector<2x256xf32>
    %240 = arith.addf %234, %239 : vector<2x256xf32>
    %c240_i32_47 = arith.constant 240 : i32
    %241 = tpu.dynamic_rotate %45 by %c240_i32_47 dim 1 : vector<1x256xf32>, i32 -> vector<1x256xf32>
    %242 = vector.extract_strided_slice %40 {offsets = [0, 8], sizes = [2, 1], strides = [1, 1]} : vector<2x36xf32> to vector<2x1xf32>
    %243 = vector.broadcast %242 : vector<2x1xf32> to vector<2x256xf32>
    %244 = vector.broadcast %241 : vector<1x256xf32> to vector<2x256xf32>
    %245 = arith.mulf %243, %244 : vector<2x256xf32>
    %246 = arith.addf %240, %245 : vector<2x256xf32>
    %c240_i32_48 = arith.constant 240 : i32
    %247 = tpu.dynamic_rotate %49 by %c240_i32_48 dim 1 : vector<1x256xf32>, i32 -> vector<1x256xf32>
    %248 = vector.extract_strided_slice %40 {offsets = [0, 17], sizes = [2, 1], strides = [1, 1]} : vector<2x36xf32> to vector<2x1xf32>
    %249 = vector.broadcast %248 : vector<2x1xf32> to vector<2x256xf32>
    %250 = vector.broadcast %247 : vector<1x256xf32> to vector<2x256xf32>
    %251 = arith.mulf %249, %250 : vector<2x256xf32>
    %252 = arith.addf %246, %251 : vector<2x256xf32>
    %c240_i32_49 = arith.constant 240 : i32
    %253 = tpu.dynamic_rotate %53 by %c240_i32_49 dim 1 : vector<1x256xf32>, i32 -> vector<1x256xf32>
    %254 = vector.extract_strided_slice %40 {offsets = [0, 26], sizes = [2, 1], strides = [1, 1]} : vector<2x36xf32> to vector<2x1xf32>
    %255 = vector.broadcast %254 : vector<2x1xf32> to vector<2x256xf32>
    %256 = vector.broadcast %253 : vector<1x256xf32> to vector<2x256xf32>
    %257 = arith.mulf %255, %256 : vector<2x256xf32>
    %258 = arith.addf %252, %257 : vector<2x256xf32>
    %c240_i32_50 = arith.constant 240 : i32
    %259 = tpu.dynamic_rotate %57 by %c240_i32_50 dim 1 : vector<1x256xf32>, i32 -> vector<1x256xf32>
    %260 = vector.extract_strided_slice %40 {offsets = [0, 35], sizes = [2, 1], strides = [1, 1]} : vector<2x36xf32> to vector<2x1xf32>
    %261 = vector.broadcast %260 : vector<2x1xf32> to vector<2x256xf32>
    %262 = vector.broadcast %259 : vector<1x256xf32> to vector<2x256xf32>
    %263 = arith.mulf %261, %262 : vector<2x256xf32>
    %264 = arith.addf %258, %263 : vector<2x256xf32>
    %265 = vector.broadcast %27 : vector<1x256xf32> to vector<2x256xf32>
    %266 = arith.mulf %264, %265 : vector<2x256xf32>
    %267 = arith.addf %193, %266 : vector<2x256xf32>
    %cst_51 = arith.constant 0.000000e+00 : f32
    %268 = vector.broadcast %cst_51 : f32 to vector<2x256xf32>
    %269 = arith.maximumf %267, %268 : vector<2x256xf32>
    %270 = vector.extract_strided_slice %269 {offsets = [0, 0], sizes = [1, 256], strides = [1, 1]} : vector<2x256xf32> to vector<1x256xf32>
    %271 = vector.extract_strided_slice %269 {offsets = [1, 0], sizes = [1, 256], strides = [1, 1]} : vector<2x256xf32> to vector<1x256xf32>
    %272 = vector.extract_strided_slice %4 {offsets = [8, 0], sizes = [1, 18], strides = [1, 1]} : vector<24x37xf32> to vector<1x18xf32>
    %273 = vector.extract_strided_slice %4 {offsets = [8, 36], sizes = [1, 1], strides = [1, 1]} : vector<24x37xf32> to vector<1x1xf32>
    %c1_i32_52 = arith.constant 1 : i32
    %274 = tpu.dynamic_rotate %270 by %c1_i32_52 dim 1 : vector<1x256xf32>, i32 -> vector<1x256xf32>
    %275 = arith.mulf %274, %12 : vector<1x256xf32>
    %c255_i32_53 = arith.constant 255 : i32
    %276 = tpu.dynamic_rotate %270 by %c255_i32_53 dim 1 : vector<1x256xf32>, i32 -> vector<1x256xf32>
    %277 = arith.mulf %276, %17 : vector<1x256xf32>
    %c1_i32_54 = arith.constant 1 : i32
    %278 = tpu.dynamic_rotate %271 by %c1_i32_54 dim 1 : vector<1x256xf32>, i32 -> vector<1x256xf32>
    %279 = arith.mulf %278, %12 : vector<1x256xf32>
    %c255_i32_55 = arith.constant 255 : i32
    %280 = tpu.dynamic_rotate %271 by %c255_i32_55 dim 1 : vector<1x256xf32>, i32 -> vector<1x256xf32>
    %281 = arith.mulf %280, %17 : vector<1x256xf32>
    %282 = vector.shape_cast %273 : vector<1x1xf32> to vector<1x1xf32>
    %283 = vector.broadcast %282 : vector<1x1xf32> to vector<1x256xf32>
    %c16_i32_56 = arith.constant 16 : i32
    %284 = tpu.dynamic_rotate %275 by %c16_i32_56 dim 1 : vector<1x256xf32>, i32 -> vector<1x256xf32>
    %285 = vector.extract_strided_slice %272 {offsets = [0, 0], sizes = [1, 1], strides = [1, 1]} : vector<1x18xf32> to vector<1x1xf32>
    %286 = vector.broadcast %285 : vector<1x1xf32> to vector<1x256xf32>
    %287 = arith.mulf %286, %284 : vector<1x256xf32>
    %c16_i32_57 = arith.constant 16 : i32
    %288 = tpu.dynamic_rotate %279 by %c16_i32_57 dim 1 : vector<1x256xf32>, i32 -> vector<1x256xf32>
    %289 = vector.extract_strided_slice %272 {offsets = [0, 9], sizes = [1, 1], strides = [1, 1]} : vector<1x18xf32> to vector<1x1xf32>
    %290 = vector.broadcast %289 : vector<1x1xf32> to vector<1x256xf32>
    %291 = arith.mulf %290, %288 : vector<1x256xf32>
    %292 = arith.addf %287, %291 : vector<1x256xf32>
    %c16_i32_58 = arith.constant 16 : i32
    %293 = tpu.dynamic_rotate %270 by %c16_i32_58 dim 1 : vector<1x256xf32>, i32 -> vector<1x256xf32>
    %294 = vector.extract_strided_slice %272 {offsets = [0, 1], sizes = [1, 1], strides = [1, 1]} : vector<1x18xf32> to vector<1x1xf32>
    %295 = vector.broadcast %294 : vector<1x1xf32> to vector<1x256xf32>
    %296 = arith.mulf %295, %293 : vector<1x256xf32>
    %297 = arith.addf %292, %296 : vector<1x256xf32>
    %c16_i32_59 = arith.constant 16 : i32
    %298 = tpu.dynamic_rotate %271 by %c16_i32_59 dim 1 : vector<1x256xf32>, i32 -> vector<1x256xf32>
    %299 = vector.extract_strided_slice %272 {offsets = [0, 10], sizes = [1, 1], strides = [1, 1]} : vector<1x18xf32> to vector<1x1xf32>
    %300 = vector.broadcast %299 : vector<1x1xf32> to vector<1x256xf32>
    %301 = arith.mulf %300, %298 : vector<1x256xf32>
    %302 = arith.addf %297, %301 : vector<1x256xf32>
    %c16_i32_60 = arith.constant 16 : i32
    %303 = tpu.dynamic_rotate %277 by %c16_i32_60 dim 1 : vector<1x256xf32>, i32 -> vector<1x256xf32>
    %304 = vector.extract_strided_slice %272 {offsets = [0, 2], sizes = [1, 1], strides = [1, 1]} : vector<1x18xf32> to vector<1x1xf32>
    %305 = vector.broadcast %304 : vector<1x1xf32> to vector<1x256xf32>
    %306 = arith.mulf %305, %303 : vector<1x256xf32>
    %307 = arith.addf %302, %306 : vector<1x256xf32>
    %c16_i32_61 = arith.constant 16 : i32
    %308 = tpu.dynamic_rotate %281 by %c16_i32_61 dim 1 : vector<1x256xf32>, i32 -> vector<1x256xf32>
    %309 = vector.extract_strided_slice %272 {offsets = [0, 11], sizes = [1, 1], strides = [1, 1]} : vector<1x18xf32> to vector<1x1xf32>
    %310 = vector.broadcast %309 : vector<1x1xf32> to vector<1x256xf32>
    %311 = arith.mulf %310, %308 : vector<1x256xf32>
    %312 = arith.addf %307, %311 : vector<1x256xf32>
    %313 = arith.mulf %312, %22 : vector<1x256xf32>
    %314 = arith.addf %283, %313 : vector<1x256xf32>
    %315 = vector.extract_strided_slice %272 {offsets = [0, 3], sizes = [1, 1], strides = [1, 1]} : vector<1x18xf32> to vector<1x1xf32>
    %316 = vector.broadcast %315 : vector<1x1xf32> to vector<1x256xf32>
    %317 = arith.mulf %316, %275 : vector<1x256xf32>
    %318 = vector.extract_strided_slice %272 {offsets = [0, 12], sizes = [1, 1], strides = [1, 1]} : vector<1x18xf32> to vector<1x1xf32>
    %319 = vector.broadcast %318 : vector<1x1xf32> to vector<1x256xf32>
    %320 = arith.mulf %319, %279 : vector<1x256xf32>
    %321 = arith.addf %317, %320 : vector<1x256xf32>
    %322 = vector.extract_strided_slice %272 {offsets = [0, 4], sizes = [1, 1], strides = [1, 1]} : vector<1x18xf32> to vector<1x1xf32>
    %323 = vector.broadcast %322 : vector<1x1xf32> to vector<1x256xf32>
    %324 = arith.mulf %323, %270 : vector<1x256xf32>
    %325 = arith.addf %321, %324 : vector<1x256xf32>
    %326 = vector.extract_strided_slice %272 {offsets = [0, 13], sizes = [1, 1], strides = [1, 1]} : vector<1x18xf32> to vector<1x1xf32>
    %327 = vector.broadcast %326 : vector<1x1xf32> to vector<1x256xf32>
    %328 = arith.mulf %327, %271 : vector<1x256xf32>
    %329 = arith.addf %325, %328 : vector<1x256xf32>
    %330 = vector.extract_strided_slice %272 {offsets = [0, 5], sizes = [1, 1], strides = [1, 1]} : vector<1x18xf32> to vector<1x1xf32>
    %331 = vector.broadcast %330 : vector<1x1xf32> to vector<1x256xf32>
    %332 = arith.mulf %331, %277 : vector<1x256xf32>
    %333 = arith.addf %329, %332 : vector<1x256xf32>
    %334 = vector.extract_strided_slice %272 {offsets = [0, 14], sizes = [1, 1], strides = [1, 1]} : vector<1x18xf32> to vector<1x1xf32>
    %335 = vector.broadcast %334 : vector<1x1xf32> to vector<1x256xf32>
    %336 = arith.mulf %335, %281 : vector<1x256xf32>
    %337 = arith.addf %333, %336 : vector<1x256xf32>
    %338 = arith.addf %314, %337 : vector<1x256xf32>
    %c240_i32_62 = arith.constant 240 : i32
    %339 = tpu.dynamic_rotate %275 by %c240_i32_62 dim 1 : vector<1x256xf32>, i32 -> vector<1x256xf32>
    %340 = vector.extract_strided_slice %272 {offsets = [0, 6], sizes = [1, 1], strides = [1, 1]} : vector<1x18xf32> to vector<1x1xf32>
    %341 = vector.broadcast %340 : vector<1x1xf32> to vector<1x256xf32>
    %342 = arith.mulf %341, %339 : vector<1x256xf32>
    %c240_i32_63 = arith.constant 240 : i32
    %343 = tpu.dynamic_rotate %279 by %c240_i32_63 dim 1 : vector<1x256xf32>, i32 -> vector<1x256xf32>
    %344 = vector.extract_strided_slice %272 {offsets = [0, 15], sizes = [1, 1], strides = [1, 1]} : vector<1x18xf32> to vector<1x1xf32>
    %345 = vector.broadcast %344 : vector<1x1xf32> to vector<1x256xf32>
    %346 = arith.mulf %345, %343 : vector<1x256xf32>
    %347 = arith.addf %342, %346 : vector<1x256xf32>
    %c240_i32_64 = arith.constant 240 : i32
    %348 = tpu.dynamic_rotate %270 by %c240_i32_64 dim 1 : vector<1x256xf32>, i32 -> vector<1x256xf32>
    %349 = vector.extract_strided_slice %272 {offsets = [0, 7], sizes = [1, 1], strides = [1, 1]} : vector<1x18xf32> to vector<1x1xf32>
    %350 = vector.broadcast %349 : vector<1x1xf32> to vector<1x256xf32>
    %351 = arith.mulf %350, %348 : vector<1x256xf32>
    %352 = arith.addf %347, %351 : vector<1x256xf32>
    %c240_i32_65 = arith.constant 240 : i32
    %353 = tpu.dynamic_rotate %271 by %c240_i32_65 dim 1 : vector<1x256xf32>, i32 -> vector<1x256xf32>
    %354 = vector.extract_strided_slice %272 {offsets = [0, 16], sizes = [1, 1], strides = [1, 1]} : vector<1x18xf32> to vector<1x1xf32>
    %355 = vector.broadcast %354 : vector<1x1xf32> to vector<1x256xf32>
    %356 = arith.mulf %355, %353 : vector<1x256xf32>
    %357 = arith.addf %352, %356 : vector<1x256xf32>
    %c240_i32_66 = arith.constant 240 : i32
    %358 = tpu.dynamic_rotate %277 by %c240_i32_66 dim 1 : vector<1x256xf32>, i32 -> vector<1x256xf32>
    %359 = vector.extract_strided_slice %272 {offsets = [0, 8], sizes = [1, 1], strides = [1, 1]} : vector<1x18xf32> to vector<1x1xf32>
    %360 = vector.broadcast %359 : vector<1x1xf32> to vector<1x256xf32>
    %361 = arith.mulf %360, %358 : vector<1x256xf32>
    %362 = arith.addf %357, %361 : vector<1x256xf32>
    %c240_i32_67 = arith.constant 240 : i32
    %363 = tpu.dynamic_rotate %281 by %c240_i32_67 dim 1 : vector<1x256xf32>, i32 -> vector<1x256xf32>
    %364 = vector.extract_strided_slice %272 {offsets = [0, 17], sizes = [1, 1], strides = [1, 1]} : vector<1x18xf32> to vector<1x1xf32>
    %365 = vector.broadcast %364 : vector<1x1xf32> to vector<1x256xf32>
    %366 = arith.mulf %365, %363 : vector<1x256xf32>
    %367 = arith.addf %362, %366 : vector<1x256xf32>
    %368 = arith.mulf %367, %27 : vector<1x256xf32>
    %369 = arith.addf %338, %368 : vector<1x256xf32>
    %cst_68 = arith.constant 0.000000e+00 : f32
    %370 = vector.broadcast %cst_68 : f32 to vector<1x256xf32>
    %371 = arith.subf %370, %369 : vector<1x256xf32>
    %372 = math.exp %371 : vector<1x256xf32>
    %cst_69 = arith.constant 1.000000e+00 : f32
    %373 = vector.broadcast %cst_69 : f32 to vector<1x256xf32>
    %374 = arith.addf %373, %372 : vector<1x256xf32>
    %375 = tpu.reciprocal %374 {approx = true} : vector<1x256xf32> -> vector<1x256xf32>
    %376 = arith.subf %1, %3 : vector<4x256xf32>
    %377 = vector.broadcast %375 : vector<1x256xf32> to vector<4x256xf32>
    %378 = arith.mulf %377, %376 : vector<4x256xf32>
    %379 = arith.addf %3, %378 : vector<4x256xf32>
    %380 = vector.extract_strided_slice %379 {offsets = [0, 0], sizes = [1, 256], strides = [1, 1]} : vector<4x256xf32> to vector<1x256xf32>
    %381 = vector.extract_strided_slice %379 {offsets = [1, 0], sizes = [1, 256], strides = [1, 1]} : vector<4x256xf32> to vector<1x256xf32>
    %382 = vector.extract_strided_slice %379 {offsets = [2, 0], sizes = [1, 256], strides = [1, 1]} : vector<4x256xf32> to vector<1x256xf32>
    %383 = vector.extract_strided_slice %379 {offsets = [3, 0], sizes = [1, 256], strides = [1, 1]} : vector<4x256xf32> to vector<1x256xf32>
    %384 = vector.extract_strided_slice %4 {offsets = [16, 0], sizes = [8, 36], strides = [1, 1]} : vector<24x37xf32> to vector<8x36xf32>
    %385 = vector.extract_strided_slice %4 {offsets = [16, 36], sizes = [8, 1], strides = [1, 1]} : vector<24x37xf32> to vector<8x1xf32>
    %c1_i32_70 = arith.constant 1 : i32
    %386 = tpu.dynamic_rotate %380 by %c1_i32_70 dim 1 : vector<1x256xf32>, i32 -> vector<1x256xf32>
    %387 = arith.mulf %386, %12 : vector<1x256xf32>
    %c255_i32_71 = arith.constant 255 : i32
    %388 = tpu.dynamic_rotate %380 by %c255_i32_71 dim 1 : vector<1x256xf32>, i32 -> vector<1x256xf32>
    %389 = arith.mulf %388, %17 : vector<1x256xf32>
    %c1_i32_72 = arith.constant 1 : i32
    %390 = tpu.dynamic_rotate %381 by %c1_i32_72 dim 1 : vector<1x256xf32>, i32 -> vector<1x256xf32>
    %391 = arith.mulf %390, %12 : vector<1x256xf32>
    %c255_i32_73 = arith.constant 255 : i32
    %392 = tpu.dynamic_rotate %381 by %c255_i32_73 dim 1 : vector<1x256xf32>, i32 -> vector<1x256xf32>
    %393 = arith.mulf %392, %17 : vector<1x256xf32>
    %c1_i32_74 = arith.constant 1 : i32
    %394 = tpu.dynamic_rotate %382 by %c1_i32_74 dim 1 : vector<1x256xf32>, i32 -> vector<1x256xf32>
    %395 = arith.mulf %394, %12 : vector<1x256xf32>
    %c255_i32_75 = arith.constant 255 : i32
    %396 = tpu.dynamic_rotate %382 by %c255_i32_75 dim 1 : vector<1x256xf32>, i32 -> vector<1x256xf32>
    %397 = arith.mulf %396, %17 : vector<1x256xf32>
    %c1_i32_76 = arith.constant 1 : i32
    %398 = tpu.dynamic_rotate %383 by %c1_i32_76 dim 1 : vector<1x256xf32>, i32 -> vector<1x256xf32>
    %399 = arith.mulf %398, %12 : vector<1x256xf32>
    %c255_i32_77 = arith.constant 255 : i32
    %400 = tpu.dynamic_rotate %383 by %c255_i32_77 dim 1 : vector<1x256xf32>, i32 -> vector<1x256xf32>
    %401 = arith.mulf %400, %17 : vector<1x256xf32>
    %402 = vector.shape_cast %385 : vector<8x1xf32> to vector<8x1xf32>
    %403 = vector.broadcast %402 : vector<8x1xf32> to vector<8x256xf32>
    %c16_i32_78 = arith.constant 16 : i32
    %404 = tpu.dynamic_rotate %387 by %c16_i32_78 dim 1 : vector<1x256xf32>, i32 -> vector<1x256xf32>
    %405 = vector.extract_strided_slice %384 {offsets = [0, 0], sizes = [8, 1], strides = [1, 1]} : vector<8x36xf32> to vector<8x1xf32>
    %406 = vector.broadcast %405 : vector<8x1xf32> to vector<8x256xf32>
    %407 = vector.broadcast %404 : vector<1x256xf32> to vector<8x256xf32>
    %408 = arith.mulf %406, %407 : vector<8x256xf32>
    %c16_i32_79 = arith.constant 16 : i32
    %409 = tpu.dynamic_rotate %391 by %c16_i32_79 dim 1 : vector<1x256xf32>, i32 -> vector<1x256xf32>
    %410 = vector.extract_strided_slice %384 {offsets = [0, 9], sizes = [8, 1], strides = [1, 1]} : vector<8x36xf32> to vector<8x1xf32>
    %411 = vector.broadcast %410 : vector<8x1xf32> to vector<8x256xf32>
    %412 = vector.broadcast %409 : vector<1x256xf32> to vector<8x256xf32>
    %413 = arith.mulf %411, %412 : vector<8x256xf32>
    %414 = arith.addf %408, %413 : vector<8x256xf32>
    %c16_i32_80 = arith.constant 16 : i32
    %415 = tpu.dynamic_rotate %395 by %c16_i32_80 dim 1 : vector<1x256xf32>, i32 -> vector<1x256xf32>
    %416 = vector.extract_strided_slice %384 {offsets = [0, 18], sizes = [8, 1], strides = [1, 1]} : vector<8x36xf32> to vector<8x1xf32>
    %417 = vector.broadcast %416 : vector<8x1xf32> to vector<8x256xf32>
    %418 = vector.broadcast %415 : vector<1x256xf32> to vector<8x256xf32>
    %419 = arith.mulf %417, %418 : vector<8x256xf32>
    %420 = arith.addf %414, %419 : vector<8x256xf32>
    %c16_i32_81 = arith.constant 16 : i32
    %421 = tpu.dynamic_rotate %399 by %c16_i32_81 dim 1 : vector<1x256xf32>, i32 -> vector<1x256xf32>
    %422 = vector.extract_strided_slice %384 {offsets = [0, 27], sizes = [8, 1], strides = [1, 1]} : vector<8x36xf32> to vector<8x1xf32>
    %423 = vector.broadcast %422 : vector<8x1xf32> to vector<8x256xf32>
    %424 = vector.broadcast %421 : vector<1x256xf32> to vector<8x256xf32>
    %425 = arith.mulf %423, %424 : vector<8x256xf32>
    %426 = arith.addf %420, %425 : vector<8x256xf32>
    %c16_i32_82 = arith.constant 16 : i32
    %427 = tpu.dynamic_rotate %380 by %c16_i32_82 dim 1 : vector<1x256xf32>, i32 -> vector<1x256xf32>
    %428 = vector.extract_strided_slice %384 {offsets = [0, 1], sizes = [8, 1], strides = [1, 1]} : vector<8x36xf32> to vector<8x1xf32>
    %429 = vector.broadcast %428 : vector<8x1xf32> to vector<8x256xf32>
    %430 = vector.broadcast %427 : vector<1x256xf32> to vector<8x256xf32>
    %431 = arith.mulf %429, %430 : vector<8x256xf32>
    %432 = arith.addf %426, %431 : vector<8x256xf32>
    %c16_i32_83 = arith.constant 16 : i32
    %433 = tpu.dynamic_rotate %381 by %c16_i32_83 dim 1 : vector<1x256xf32>, i32 -> vector<1x256xf32>
    %434 = vector.extract_strided_slice %384 {offsets = [0, 10], sizes = [8, 1], strides = [1, 1]} : vector<8x36xf32> to vector<8x1xf32>
    %435 = vector.broadcast %434 : vector<8x1xf32> to vector<8x256xf32>
    %436 = vector.broadcast %433 : vector<1x256xf32> to vector<8x256xf32>
    %437 = arith.mulf %435, %436 : vector<8x256xf32>
    %438 = arith.addf %432, %437 : vector<8x256xf32>
    %c16_i32_84 = arith.constant 16 : i32
    %439 = tpu.dynamic_rotate %382 by %c16_i32_84 dim 1 : vector<1x256xf32>, i32 -> vector<1x256xf32>
    %440 = vector.extract_strided_slice %384 {offsets = [0, 19], sizes = [8, 1], strides = [1, 1]} : vector<8x36xf32> to vector<8x1xf32>
    %441 = vector.broadcast %440 : vector<8x1xf32> to vector<8x256xf32>
    %442 = vector.broadcast %439 : vector<1x256xf32> to vector<8x256xf32>
    %443 = arith.mulf %441, %442 : vector<8x256xf32>
    %444 = arith.addf %438, %443 : vector<8x256xf32>
    %c16_i32_85 = arith.constant 16 : i32
    %445 = tpu.dynamic_rotate %383 by %c16_i32_85 dim 1 : vector<1x256xf32>, i32 -> vector<1x256xf32>
    %446 = vector.extract_strided_slice %384 {offsets = [0, 28], sizes = [8, 1], strides = [1, 1]} : vector<8x36xf32> to vector<8x1xf32>
    %447 = vector.broadcast %446 : vector<8x1xf32> to vector<8x256xf32>
    %448 = vector.broadcast %445 : vector<1x256xf32> to vector<8x256xf32>
    %449 = arith.mulf %447, %448 : vector<8x256xf32>
    %450 = arith.addf %444, %449 : vector<8x256xf32>
    %c16_i32_86 = arith.constant 16 : i32
    %451 = tpu.dynamic_rotate %389 by %c16_i32_86 dim 1 : vector<1x256xf32>, i32 -> vector<1x256xf32>
    %452 = vector.extract_strided_slice %384 {offsets = [0, 2], sizes = [8, 1], strides = [1, 1]} : vector<8x36xf32> to vector<8x1xf32>
    %453 = vector.broadcast %452 : vector<8x1xf32> to vector<8x256xf32>
    %454 = vector.broadcast %451 : vector<1x256xf32> to vector<8x256xf32>
    %455 = arith.mulf %453, %454 : vector<8x256xf32>
    %456 = arith.addf %450, %455 : vector<8x256xf32>
    %c16_i32_87 = arith.constant 16 : i32
    %457 = tpu.dynamic_rotate %393 by %c16_i32_87 dim 1 : vector<1x256xf32>, i32 -> vector<1x256xf32>
    %458 = vector.extract_strided_slice %384 {offsets = [0, 11], sizes = [8, 1], strides = [1, 1]} : vector<8x36xf32> to vector<8x1xf32>
    %459 = vector.broadcast %458 : vector<8x1xf32> to vector<8x256xf32>
    %460 = vector.broadcast %457 : vector<1x256xf32> to vector<8x256xf32>
    %461 = arith.mulf %459, %460 : vector<8x256xf32>
    %462 = arith.addf %456, %461 : vector<8x256xf32>
    %c16_i32_88 = arith.constant 16 : i32
    %463 = tpu.dynamic_rotate %397 by %c16_i32_88 dim 1 : vector<1x256xf32>, i32 -> vector<1x256xf32>
    %464 = vector.extract_strided_slice %384 {offsets = [0, 20], sizes = [8, 1], strides = [1, 1]} : vector<8x36xf32> to vector<8x1xf32>
    %465 = vector.broadcast %464 : vector<8x1xf32> to vector<8x256xf32>
    %466 = vector.broadcast %463 : vector<1x256xf32> to vector<8x256xf32>
    %467 = arith.mulf %465, %466 : vector<8x256xf32>
    %468 = arith.addf %462, %467 : vector<8x256xf32>
    %c16_i32_89 = arith.constant 16 : i32
    %469 = tpu.dynamic_rotate %401 by %c16_i32_89 dim 1 : vector<1x256xf32>, i32 -> vector<1x256xf32>
    %470 = vector.extract_strided_slice %384 {offsets = [0, 29], sizes = [8, 1], strides = [1, 1]} : vector<8x36xf32> to vector<8x1xf32>
    %471 = vector.broadcast %470 : vector<8x1xf32> to vector<8x256xf32>
    %472 = vector.broadcast %469 : vector<1x256xf32> to vector<8x256xf32>
    %473 = arith.mulf %471, %472 : vector<8x256xf32>
    %474 = arith.addf %468, %473 : vector<8x256xf32>
    %475 = vector.broadcast %22 : vector<1x256xf32> to vector<8x256xf32>
    %476 = arith.mulf %474, %475 : vector<8x256xf32>
    %477 = arith.addf %403, %476 : vector<8x256xf32>
    %478 = vector.extract_strided_slice %384 {offsets = [0, 3], sizes = [8, 1], strides = [1, 1]} : vector<8x36xf32> to vector<8x1xf32>
    %479 = vector.broadcast %478 : vector<8x1xf32> to vector<8x256xf32>
    %480 = vector.broadcast %387 : vector<1x256xf32> to vector<8x256xf32>
    %481 = arith.mulf %479, %480 : vector<8x256xf32>
    %482 = vector.extract_strided_slice %384 {offsets = [0, 12], sizes = [8, 1], strides = [1, 1]} : vector<8x36xf32> to vector<8x1xf32>
    %483 = vector.broadcast %482 : vector<8x1xf32> to vector<8x256xf32>
    %484 = vector.broadcast %391 : vector<1x256xf32> to vector<8x256xf32>
    %485 = arith.mulf %483, %484 : vector<8x256xf32>
    %486 = arith.addf %481, %485 : vector<8x256xf32>
    %487 = vector.extract_strided_slice %384 {offsets = [0, 21], sizes = [8, 1], strides = [1, 1]} : vector<8x36xf32> to vector<8x1xf32>
    %488 = vector.broadcast %487 : vector<8x1xf32> to vector<8x256xf32>
    %489 = vector.broadcast %395 : vector<1x256xf32> to vector<8x256xf32>
    %490 = arith.mulf %488, %489 : vector<8x256xf32>
    %491 = arith.addf %486, %490 : vector<8x256xf32>
    %492 = vector.extract_strided_slice %384 {offsets = [0, 30], sizes = [8, 1], strides = [1, 1]} : vector<8x36xf32> to vector<8x1xf32>
    %493 = vector.broadcast %492 : vector<8x1xf32> to vector<8x256xf32>
    %494 = vector.broadcast %399 : vector<1x256xf32> to vector<8x256xf32>
    %495 = arith.mulf %493, %494 : vector<8x256xf32>
    %496 = arith.addf %491, %495 : vector<8x256xf32>
    %497 = vector.extract_strided_slice %384 {offsets = [0, 4], sizes = [8, 1], strides = [1, 1]} : vector<8x36xf32> to vector<8x1xf32>
    %498 = vector.broadcast %497 : vector<8x1xf32> to vector<8x256xf32>
    %499 = vector.broadcast %380 : vector<1x256xf32> to vector<8x256xf32>
    %500 = arith.mulf %498, %499 : vector<8x256xf32>
    %501 = arith.addf %496, %500 : vector<8x256xf32>
    %502 = vector.extract_strided_slice %384 {offsets = [0, 13], sizes = [8, 1], strides = [1, 1]} : vector<8x36xf32> to vector<8x1xf32>
    %503 = vector.broadcast %502 : vector<8x1xf32> to vector<8x256xf32>
    %504 = vector.broadcast %381 : vector<1x256xf32> to vector<8x256xf32>
    %505 = arith.mulf %503, %504 : vector<8x256xf32>
    %506 = arith.addf %501, %505 : vector<8x256xf32>
    %507 = vector.extract_strided_slice %384 {offsets = [0, 22], sizes = [8, 1], strides = [1, 1]} : vector<8x36xf32> to vector<8x1xf32>
    %508 = vector.broadcast %507 : vector<8x1xf32> to vector<8x256xf32>
    %509 = vector.broadcast %382 : vector<1x256xf32> to vector<8x256xf32>
    %510 = arith.mulf %508, %509 : vector<8x256xf32>
    %511 = arith.addf %506, %510 : vector<8x256xf32>
    %512 = vector.extract_strided_slice %384 {offsets = [0, 31], sizes = [8, 1], strides = [1, 1]} : vector<8x36xf32> to vector<8x1xf32>
    %513 = vector.broadcast %512 : vector<8x1xf32> to vector<8x256xf32>
    %514 = vector.broadcast %383 : vector<1x256xf32> to vector<8x256xf32>
    %515 = arith.mulf %513, %514 : vector<8x256xf32>
    %516 = arith.addf %511, %515 : vector<8x256xf32>
    %517 = vector.extract_strided_slice %384 {offsets = [0, 5], sizes = [8, 1], strides = [1, 1]} : vector<8x36xf32> to vector<8x1xf32>
    %518 = vector.broadcast %517 : vector<8x1xf32> to vector<8x256xf32>
    %519 = vector.broadcast %389 : vector<1x256xf32> to vector<8x256xf32>
    %520 = arith.mulf %518, %519 : vector<8x256xf32>
    %521 = arith.addf %516, %520 : vector<8x256xf32>
    %522 = vector.extract_strided_slice %384 {offsets = [0, 14], sizes = [8, 1], strides = [1, 1]} : vector<8x36xf32> to vector<8x1xf32>
    %523 = vector.broadcast %522 : vector<8x1xf32> to vector<8x256xf32>
    %524 = vector.broadcast %393 : vector<1x256xf32> to vector<8x256xf32>
    %525 = arith.mulf %523, %524 : vector<8x256xf32>
    %526 = arith.addf %521, %525 : vector<8x256xf32>
    %527 = vector.extract_strided_slice %384 {offsets = [0, 23], sizes = [8, 1], strides = [1, 1]} : vector<8x36xf32> to vector<8x1xf32>
    %528 = vector.broadcast %527 : vector<8x1xf32> to vector<8x256xf32>
    %529 = vector.broadcast %397 : vector<1x256xf32> to vector<8x256xf32>
    %530 = arith.mulf %528, %529 : vector<8x256xf32>
    %531 = arith.addf %526, %530 : vector<8x256xf32>
    %532 = vector.extract_strided_slice %384 {offsets = [0, 32], sizes = [8, 1], strides = [1, 1]} : vector<8x36xf32> to vector<8x1xf32>
    %533 = vector.broadcast %532 : vector<8x1xf32> to vector<8x256xf32>
    %534 = vector.broadcast %401 : vector<1x256xf32> to vector<8x256xf32>
    %535 = arith.mulf %533, %534 : vector<8x256xf32>
    %536 = arith.addf %531, %535 : vector<8x256xf32>
    %537 = arith.addf %477, %536 : vector<8x256xf32>
    %c240_i32_90 = arith.constant 240 : i32
    %538 = tpu.dynamic_rotate %387 by %c240_i32_90 dim 1 : vector<1x256xf32>, i32 -> vector<1x256xf32>
    %539 = vector.extract_strided_slice %384 {offsets = [0, 6], sizes = [8, 1], strides = [1, 1]} : vector<8x36xf32> to vector<8x1xf32>
    %540 = vector.broadcast %539 : vector<8x1xf32> to vector<8x256xf32>
    %541 = vector.broadcast %538 : vector<1x256xf32> to vector<8x256xf32>
    %542 = arith.mulf %540, %541 : vector<8x256xf32>
    %c240_i32_91 = arith.constant 240 : i32
    %543 = tpu.dynamic_rotate %391 by %c240_i32_91 dim 1 : vector<1x256xf32>, i32 -> vector<1x256xf32>
    %544 = vector.extract_strided_slice %384 {offsets = [0, 15], sizes = [8, 1], strides = [1, 1]} : vector<8x36xf32> to vector<8x1xf32>
    %545 = vector.broadcast %544 : vector<8x1xf32> to vector<8x256xf32>
    %546 = vector.broadcast %543 : vector<1x256xf32> to vector<8x256xf32>
    %547 = arith.mulf %545, %546 : vector<8x256xf32>
    %548 = arith.addf %542, %547 : vector<8x256xf32>
    %c240_i32_92 = arith.constant 240 : i32
    %549 = tpu.dynamic_rotate %395 by %c240_i32_92 dim 1 : vector<1x256xf32>, i32 -> vector<1x256xf32>
    %550 = vector.extract_strided_slice %384 {offsets = [0, 24], sizes = [8, 1], strides = [1, 1]} : vector<8x36xf32> to vector<8x1xf32>
    %551 = vector.broadcast %550 : vector<8x1xf32> to vector<8x256xf32>
    %552 = vector.broadcast %549 : vector<1x256xf32> to vector<8x256xf32>
    %553 = arith.mulf %551, %552 : vector<8x256xf32>
    %554 = arith.addf %548, %553 : vector<8x256xf32>
    %c240_i32_93 = arith.constant 240 : i32
    %555 = tpu.dynamic_rotate %399 by %c240_i32_93 dim 1 : vector<1x256xf32>, i32 -> vector<1x256xf32>
    %556 = vector.extract_strided_slice %384 {offsets = [0, 33], sizes = [8, 1], strides = [1, 1]} : vector<8x36xf32> to vector<8x1xf32>
    %557 = vector.broadcast %556 : vector<8x1xf32> to vector<8x256xf32>
    %558 = vector.broadcast %555 : vector<1x256xf32> to vector<8x256xf32>
    %559 = arith.mulf %557, %558 : vector<8x256xf32>
    %560 = arith.addf %554, %559 : vector<8x256xf32>
    %c240_i32_94 = arith.constant 240 : i32
    %561 = tpu.dynamic_rotate %380 by %c240_i32_94 dim 1 : vector<1x256xf32>, i32 -> vector<1x256xf32>
    %562 = vector.extract_strided_slice %384 {offsets = [0, 7], sizes = [8, 1], strides = [1, 1]} : vector<8x36xf32> to vector<8x1xf32>
    %563 = vector.broadcast %562 : vector<8x1xf32> to vector<8x256xf32>
    %564 = vector.broadcast %561 : vector<1x256xf32> to vector<8x256xf32>
    %565 = arith.mulf %563, %564 : vector<8x256xf32>
    %566 = arith.addf %560, %565 : vector<8x256xf32>
    %c240_i32_95 = arith.constant 240 : i32
    %567 = tpu.dynamic_rotate %381 by %c240_i32_95 dim 1 : vector<1x256xf32>, i32 -> vector<1x256xf32>
    %568 = vector.extract_strided_slice %384 {offsets = [0, 16], sizes = [8, 1], strides = [1, 1]} : vector<8x36xf32> to vector<8x1xf32>
    %569 = vector.broadcast %568 : vector<8x1xf32> to vector<8x256xf32>
    %570 = vector.broadcast %567 : vector<1x256xf32> to vector<8x256xf32>
    %571 = arith.mulf %569, %570 : vector<8x256xf32>
    %572 = arith.addf %566, %571 : vector<8x256xf32>
    %c240_i32_96 = arith.constant 240 : i32
    %573 = tpu.dynamic_rotate %382 by %c240_i32_96 dim 1 : vector<1x256xf32>, i32 -> vector<1x256xf32>
    %574 = vector.extract_strided_slice %384 {offsets = [0, 25], sizes = [8, 1], strides = [1, 1]} : vector<8x36xf32> to vector<8x1xf32>
    %575 = vector.broadcast %574 : vector<8x1xf32> to vector<8x256xf32>
    %576 = vector.broadcast %573 : vector<1x256xf32> to vector<8x256xf32>
    %577 = arith.mulf %575, %576 : vector<8x256xf32>
    %578 = arith.addf %572, %577 : vector<8x256xf32>
    %c240_i32_97 = arith.constant 240 : i32
    %579 = tpu.dynamic_rotate %383 by %c240_i32_97 dim 1 : vector<1x256xf32>, i32 -> vector<1x256xf32>
    %580 = vector.extract_strided_slice %384 {offsets = [0, 34], sizes = [8, 1], strides = [1, 1]} : vector<8x36xf32> to vector<8x1xf32>
    %581 = vector.broadcast %580 : vector<8x1xf32> to vector<8x256xf32>
    %582 = vector.broadcast %579 : vector<1x256xf32> to vector<8x256xf32>
    %583 = arith.mulf %581, %582 : vector<8x256xf32>
    %584 = arith.addf %578, %583 : vector<8x256xf32>
    %c240_i32_98 = arith.constant 240 : i32
    %585 = tpu.dynamic_rotate %389 by %c240_i32_98 dim 1 : vector<1x256xf32>, i32 -> vector<1x256xf32>
    %586 = vector.extract_strided_slice %384 {offsets = [0, 8], sizes = [8, 1], strides = [1, 1]} : vector<8x36xf32> to vector<8x1xf32>
    %587 = vector.broadcast %586 : vector<8x1xf32> to vector<8x256xf32>
    %588 = vector.broadcast %585 : vector<1x256xf32> to vector<8x256xf32>
    %589 = arith.mulf %587, %588 : vector<8x256xf32>
    %590 = arith.addf %584, %589 : vector<8x256xf32>
    %c240_i32_99 = arith.constant 240 : i32
    %591 = tpu.dynamic_rotate %393 by %c240_i32_99 dim 1 : vector<1x256xf32>, i32 -> vector<1x256xf32>
    %592 = vector.extract_strided_slice %384 {offsets = [0, 17], sizes = [8, 1], strides = [1, 1]} : vector<8x36xf32> to vector<8x1xf32>
    %593 = vector.broadcast %592 : vector<8x1xf32> to vector<8x256xf32>
    %594 = vector.broadcast %591 : vector<1x256xf32> to vector<8x256xf32>
    %595 = arith.mulf %593, %594 : vector<8x256xf32>
    %596 = arith.addf %590, %595 : vector<8x256xf32>
    %c240_i32_100 = arith.constant 240 : i32
    %597 = tpu.dynamic_rotate %397 by %c240_i32_100 dim 1 : vector<1x256xf32>, i32 -> vector<1x256xf32>
    %598 = vector.extract_strided_slice %384 {offsets = [0, 26], sizes = [8, 1], strides = [1, 1]} : vector<8x36xf32> to vector<8x1xf32>
    %599 = vector.broadcast %598 : vector<8x1xf32> to vector<8x256xf32>
    %600 = vector.broadcast %597 : vector<1x256xf32> to vector<8x256xf32>
    %601 = arith.mulf %599, %600 : vector<8x256xf32>
    %602 = arith.addf %596, %601 : vector<8x256xf32>
    %c240_i32_101 = arith.constant 240 : i32
    %603 = tpu.dynamic_rotate %401 by %c240_i32_101 dim 1 : vector<1x256xf32>, i32 -> vector<1x256xf32>
    %604 = vector.extract_strided_slice %384 {offsets = [0, 35], sizes = [8, 1], strides = [1, 1]} : vector<8x36xf32> to vector<8x1xf32>
    %605 = vector.broadcast %604 : vector<8x1xf32> to vector<8x256xf32>
    %606 = vector.broadcast %603 : vector<1x256xf32> to vector<8x256xf32>
    %607 = arith.mulf %605, %606 : vector<8x256xf32>
    %608 = arith.addf %602, %607 : vector<8x256xf32>
    %609 = vector.broadcast %27 : vector<1x256xf32> to vector<8x256xf32>
    %610 = arith.mulf %608, %609 : vector<8x256xf32>
    %611 = arith.addf %537, %610 : vector<8x256xf32>
    %cst_102 = arith.constant 0.000000e+00 : f32
    %612 = vector.broadcast %cst_102 : f32 to vector<8x256xf32>
    %613 = arith.maximumf %611, %612 : vector<8x256xf32>
    %614 = vector.shape_cast %613 : vector<8x256xf32> to vector<1x8x256xf32>
    %c0_103 = arith.constant 0 : index
    %c0_104 = arith.constant 0 : index
    %c0_105 = arith.constant 0 : index
    %615 = vector.load %arg4[%c0_103, %c0_104, %c0_105] : memref<1x8x256xf32, #tpu.memory_space<vmem>>, vector<1x8x256xf32>
    tpu.vector_store %arg4[%c0_103, %c0_104, %c0_105], %614 {strides = array<i32>} : memref<1x8x256xf32, #tpu.memory_space<vmem>>, vector<1x8x256xf32>,
    return
  }
  func.func @transform_0(%arg0: i32) -> (i32, i32, i32) {
    %c0_i32 = arith.constant 0 : i32
    %c0_i32_0 = arith.constant 0 : i32
    %c0_i32_1 = arith.constant 0 : i32
    return %arg0, %c0_i32, %c0_i32_0 : i32, i32, i32
  }
  func.func @transform_1(%arg0: i32) -> (i32, i32, i32) {
    %c0_i32 = arith.constant 0 : i32
    %c0_i32_0 = arith.constant 0 : i32
    %c0_i32_1 = arith.constant 0 : i32
    return %arg0, %c0_i32, %c0_i32_0 : i32, i32, i32
  }
  func.func @transform_2(%arg0: i32) -> (i32, i32) {
    %c0_i32 = arith.constant 0 : i32
    %c0_i32_0 = arith.constant 0 : i32
    %c0_i32_1 = arith.constant 0 : i32
    return %c0_i32, %c0_i32_0 : i32, i32
  }
  func.func @transform_3(%arg0: i32) -> (i32, i32, i32) {
    %c0_i32 = arith.constant 0 : i32
    %c0_i32_0 = arith.constant 0 : i32
    %c0_i32_1 = arith.constant 0 : i32
    return %arg0, %c0_i32, %c0_i32_0 : i32, i32, i32
  }
}

</mosaic_0001>

<bundles_post_ra>
// kernel: uafm_forward.1
= control target key start
LH: loop header
LB: loop body
LE: loop exit
PB: predicated region body
PF: predicated region fallthrough
CT: control target
= control target key end

     0   :  { %s2482_s12 = smov 0   ;;  %s4357_s0 = inlined_call_operand.vmem [shape: f32[2,4,256], index: 0, kind: input, shape index: {}]   ;;  %s4358_s1 = inlined_call_operand.vmem [shape: f32[2,4,256], index: 1, kind: input, shape index: {}]   ;;  %s4359_s2 = inlined_call_operand.vmem [shape: f32[24,37], index: 2, kind: input, shape index: {}]   ;;  %s4360_s3 = inlined_call_operand.vmem [shape: f32[2,8,256], index: 3, kind: output, shape index: {}]  }
   0x1 LB: > { %s2248_s13 = sadd.s32 4294967295, %s2418_s12   ;;  %p2252_p0 = scmp.ge.s32.totalorder %s2418_s12, 1  ;;  %s2418_s12 = sphi %s2482_s12, %s13_s12  }
   0x2   : > { %p147_p1 = scmp.lt.s32.totalorder %s2418_s12, 3 }
   0x4   : > { %p148_p2 = pnand %p2252_p0, %p147_p1 }
   0x6   : > { %151 = sbr.rel (%p148_p2) target bundleno = 1191 (0x4a7), region = 32 }
   0xd   : > { %p176_p3 = scmp.lt.s32.totalorder %s2248_s13, 1  ;;  %v4388_v0 = vmov 36   ;;  %v4387_v1 = vmov 3   ;;  %vm220_vm0 = vcmask 1043456   ;;  %s2422_s21 = smov 1  }
   0xe   : > { %2314 = vset.pattern.permute.xlu0 %v4388_v0  ;;  %2325 = vset.pattern.permute.xlu1 %v4387_v1  ;;  %s2423_s22 = smov 127   ;;  %s2424_s25 = smov 16  }
   0xf   : > { %s4622_s13 = smov (!%p176_p3, %s2248_s13), 1  ;;  %s2461_s28 = smov 112  }
  0x10   : > { %s2261_s14 = sshll.u32 %s4622_s13, 3  ;;  %s2263_s4 = sshll.u32 %s4622_s13, 4 }
  0x11   : > { %s2498_s17 = scalar_lea.vmem %s4357_s0, %s2261_s14  ;;  %s2503_s20 = scalar_lea.vmem %s4358_s1, %s2261_s14 }
  0x12   : > { %v191_v2 = vld [vmem:[%s2498_s17] sm:$0xff]  ;;  %s190_s7 = scalar_lea.vmem %s4360_s3, %s2263_s4 }
  0x13   : > { %v192_v3 = vld [vmem:[%s2503_s20] sm:$0xff]  ;;  %v237_v4 = vsel %vm220_vm0, %v191_v2, -inf  ;;  %v221_v5 = vsel %vm220_vm0, %v191_v2, 0.0  ;;  %v218_v6 = vcombine.high %v191_v2, %v191_v2 }
  0x14   : > { %v270_v7 = vsel %vm220_vm0, %v192_v3, -inf  ;;  %v238_v8 = vrot.slane %v237_v4, 4  ;;  %v222_v9 = vrot.slane %v221_v5, 4  ;;  %v252_v12 = vcombine.high %v192_v3, %v192_v3 }
  0x15   : > { %v271_v10 = vrot.slane %v270_v7, 4  ;;  %v244_v11 = vsel %vm220_vm0, %v218_v6, -inf  ;;  %v254_v13 = vsel %vm220_vm0, %v192_v3, 0.0  ;;  %v228_v14 = vsel %vm220_vm0, %v218_v6, 0.0 }
  0x16   : > { %v239_v15 = vmax.f32 %v237_v4, %v238_v8  ;;  %v223_v16 = vadd.f32 %v222_v9, %v221_v5  ;;  %v245_v17 = vrot.slane %v244_v11, 4  ;;  %v277_v19 = vsel %vm220_vm0, %v252_v12, -inf  ;;  %v2564_v4 = vld [vmem:[%s4359_s2] sm:$0xff] }
  0x17   : > { %v272_v18 = vmax.f32 %v270_v7, %v271_v10  ;;  %v255_v20 = vrot.slane %v254_v13, 4  ;;  %v229_v21 = vrot.slane %v228_v14, 4  ;;  %v278_v26 = vrot.slane %v277_v19, 4 }
  0x18   : > { %v240_v22 = vrot.slane %v239_v15, 2  ;;  %v224_v23 = vrot.slane %v223_v16, 2  ;;  %v246_v24 = vmax.f32 %v244_v11, %v245_v17  ;;  %v261_v29 = vsel %vm220_vm0, %v252_v12, 0.0 }
  0x19   : > { %v273_v25 = vrot.slane %v272_v18, 2  ;;  %v256_v27 = vadd.f32 %v255_v20, %v254_v13  ;;  %v230_v28 = vadd.f32 %v229_v21, %v228_v14  ;;  %v279_v34 = vmax.f32 %v277_v19, %v278_v26 }
  0x1a   : > { %v241_v30 = vmax.f32 %v239_v15, %v240_v22  ;;  %v225_v31 = vadd.f32 %v224_v23, %v223_v16  ;;  %v247_v32 = vrot.slane %v246_v24, 2  ;;  %v262_v35 = vrot.slane %v261_v29, 4 }
  0x1b   : > { %v274_v33 = vmax.f32 %v272_v18, %v273_v25  ;;  %v257_v39 = vrot.slane %v256_v27, 2  ;;  %v280_v40 = vrot.slane %v279_v34, 2  ;;  %v231_v41 = vrot.slane %v230_v28, 2 }
  0x1c   : > { %v242_v36 = vrot.slane %v241_v30, 1  ;;  %v226_v37 = vrot.slane %v225_v31, 1  ;;  %v248_v38 = vmax.f32 %v246_v24, %v247_v32  ;;  %v263_v45 = vadd.f32 %v262_v35, %v261_v29 }
  0x1d   : > { %v275_v47 = vrot.slane %v274_v33, 1  ;;  %v258_v48 = vadd.f32 %v257_v39, %v256_v27  ;;  %v281_v50 = vmax.f32 %v279_v34, %v280_v40  ;;  %v232_v51 = vadd.f32 %v231_v41, %v230_v28 }
  0x1e   : > { %v2515_v42 = vmax.f32 %v241_v30, %v242_v36  ;;  %v227_v43 = vadd.f32 %v226_v37, %v225_v31  ;;  %v249_v44 = vrot.slane %v248_v38, 1  ;;  %v264_v52 = vrot.slane %v263_v45, 2 }
  0x1f   : > { %v2527_v53 = vmax.f32 %v274_v33, %v275_v47  ;;  %v259_v54 = vrot.slane %v258_v48, 1  ;;  %v282_v55 = vrot.slane %v281_v50, 1  ;;  %v233_v56 = vrot.slane %v232_v51, 1 }
  0x20   : > { %302 = vrot.lane.b32.xlu0 %v2515_v42, %s2422_s21  ;;  %v2519_v46 = vmul.f32 0.25, %v227_v43  ;;  %v2523_v49 = vmax.f32 %v248_v38, %v249_v44  ;;  %v265_v57 = vadd.f32 %v264_v52, %v263_v45  ;;  %v4386_v5 = vmov 0  }
  0x21   : > { %4471 = vst [vmem:[#allocation2_spill] sm:$0xff] %v2527_v53  ;;  %v260_v58 = vadd.f32 %v259_v54, %v258_v48  ;;  %v2535_v59 = vmax.f32 %v281_v50, %v282_v55  ;;  %v234_v60 = vadd.f32 %v233_v56, %v232_v51  ;;  %v4385_v6 = vmov 9  }
  0x22   : > { %293 = vrot.lane.b32.xlu1 %v2519_v46, %s2423_s22  ;;  %v266_v61 = vrot.slane %v265_v57, 1  ;;  %v4383_v7 = vmov 18   ;;  %v4381_v8 = vmov 27   ;;  %v4379_v9 = vmov 1  }
  0x23   : > { %4472 = vst [vmem:[#allocation3_spill] sm:$0xff] %v2535_v59  ;;  %v2539_v62 = vmul.f32 0.25, %v260_v58  ;;  %v2543_v63 = vmul.f32 0.25, %v234_v60  ;;  %v4376_v10 = vmov 10   ;;  %v4374_v11 = vmov 19  }
  0x24   : > { %310 = vrot.lane.b32.xlu0 %v2515_v42, %s2423_s22  ;;  %v267_v2 = vadd.f32 %v266_v61, %v265_v57  ;;  %v4408_v12 = vmov 12   ;;  %v4373_v13 = vmov 28   ;;  %v4384_v14 = vmov 30  }
  0x25   : > { %4473 = vst [vmem:[#allocation4_spill] sm:$0xff] %v2539_v62  ;;  %v4370_v15 = vmov 20   ;;  %v4382_v16 = vmov 4   ;;  %v4369_v17 = vmov 29   ;;  %v4380_v18 = vmov 22  }
  0x26   : > { %304 = vrot.lane.b32.xlu1 %v2523_v49, %s2422_s21  ;;  %v2549_v3 = vmul.f32 0.25, %v267_v2  ;;  %v4368_v19 = vmov 21   ;;  %v4406_v20 = vmov 13   ;;  %v4389_v21 = vmov 5  }
  0x27   : > { %v4365_v22 = vmov 32   ;;  %v4405_v23 = vlaneseq  ;;  %v4401_v24 = vmov 6   ;;  %v4399_v26 = vmov 15  }
  0x28   : > { %334 = vrot.lane.b32.xlu0 %v2527_v53, %s2422_s21  ;;  %4474 = vst [vmem:[#allocation5_spill] sm:$0xff] %v2549_v3  ;;  %v4363_v31 = vmov 24   ;;  %v4403_v34 = vmov 0.0   ;;  %v4364_v38 = vmov 33   ;;  %v4397_v47 = vmov 7  }
  0x29   : > { %v2624_v25 = vand.u32 127, %v4405_v23  ;;  %v4395_v56 = vmov 16  }
  0x2a   : > { %312 = vrot.lane.b32.xlu1 %v2523_v49, %s2423_s22 }
  0x2b   : > { %v199_v27 = vand.u32 15, %v2624_v25  ;;  %v2630_v28 = vadd.s32 128, %v2624_v25  ;;  %vm288_vm2 = vcmp.lt.s32.totalorder %v2624_v25, 1  ;;  %vm297_vm4 = vcmp.lt.s32.totalorder %v2624_v25, 127 }
  0x2c   : > { %284 = vrot.lane.b32.xlu0 %v2519_v46, %s2422_s21  ;;  %vm359_vm7 = vcmp.lt.s32.totalorder %v2624_v25, 16  ;;  %vm209_vm8 = vcmp.ge.s32.totalorder %v2624_v25, 16  ;;  %vm786_vm9 = vcmp.lt.s32.totalorder %v2624_v25, 112 }
  0x2d   : > { %4475 = vst [vmem:[#allocation6_spill] sm:$0xff] %v2630_v28  ;;  %vm201_vm1 = vcmp.ge.s32.totalorder %v199_v27, 1  ;;  %v200_v32 = vand.u32 15, %v2630_v28  ;;  %vm205_vm5 = vcmp.le.s32.totalorder %v199_v27, 14 }
  0x2e   : > { %336 = vrot.lane.b32.xlu1 %v2535_v59, %s2422_s21  ;;  %v2639_v35 = vsel %vm201_vm1, 1.0, %v4403_v34  ;;  %v2684_v2 = vsel %vm205_vm5, 1.0, %v4403_v34 }
  0x2f   : > { %4476 = vst [vmem:[#allocation7_spill] sm:$0xff] %v2639_v35  ;;  %vm202_vm3 = vcmp.ge.s32.totalorder %v200_v32, 1  ;;  %4478 = vst [vmem:[#allocation9_spill] sm:$0xff] %v2684_v2  ;;  %vm206_vm6 = vcmp.le.s32.totalorder %v200_v32, 14 }
  0x30   : > { %318 = vrot.lane.b32.xlu0 %v2539_v62, %s2422_s21  ;;  %v2651_v43 = vsel %vm202_vm3, 1.0, %v4403_v34 }
  0x31   : > { %4477 = vst [vmem:[#allocation8_spill] sm:$0xff] %v2651_v43 }
  0x32   : > { %295 = vrot.lane.b32.xlu1 %v2543_v63, %s2423_s22 }
  0x34   : > { %326 = vrot.lane.b32.xlu0 %v2539_v62, %s2423_s22 }
  0x36   : > { %320 = vrot.lane.b32.xlu1 %v2549_v3, %s2422_s21 }
  0x38   : > { %286 = vrot.lane.b32.xlu0 %v2543_v63, %s2422_s21 }
  0x3a   : > { %328 = vrot.lane.b32.xlu1 %v2549_v3, %s2423_s22 }
  0x3c   : > { %342 = vrot.lane.b32.xlu0 %v2527_v53, %s2423_s22 }
  0x3e   : > { %344 = vrot.lane.b32.xlu1 %v2535_v59, %s2423_s22 }
  0x40   : > { %352 = vperm.xlu0 %2314, %v2564_v4  }
  0x42   : > { %442 = vrot.lane.b32.xlu1 %v2519_v46, %s2424_s25 }
  0x44   : > { %2315 = vset.pattern.permute.xlu0 %v4386_v5 }
  0x45   : > { %363 = vperm.xlu0 %2315, %v2564_v4  }
  0x46   : > { %444 = vrot.lane.b32.xlu1 %v2543_v63, %s2424_s25 }
  0x49   : > { %2316 = vset.pattern.permute.xlu0 %v4385_v6 }
  0x4a   : > { %464 = vrot.lane.b32.xlu1 %v2515_v42, %s2424_s25  ;;  %383 = vperm.xlu0 %2316, %v2564_v4  }
  0x4e   : > { %466 = vrot.lane.b32.xlu1 %v2523_v49, %s2424_s25  ;;  %2317 = vset.pattern.permute.xlu0 %v4383_v7 }
  0x4f   : > { %405 = vperm.xlu0 %2317, %v2564_v4  }
  0x52   : > { %486 = vrot.lane.b32.xlu1 %v2539_v62, %s2424_s25 }
  0x53   : > { %2318 = vset.pattern.permute.xlu0 %v4381_v8 }
  0x54   : > { %427 = vperm.xlu0 %2318, %v2564_v4  }
  0x56   : > { %488 = vrot.lane.b32.xlu1 %v2549_v3, %s2424_s25 }
  0x58   : > { %2319 = vset.pattern.permute.xlu0 %v4379_v9 }
  0x59   : > { %449 = vperm.xlu0 %2319, %v2564_v4  }
  0x5a   : > { %508 = vrot.lane.b32.xlu1 %v2527_v53, %s2424_s25 }
  0x5d   : > { %2320 = vset.pattern.permute.xlu0 %v4376_v10 }
  0x5e   : > { %510 = vrot.lane.b32.xlu1 %v2535_v59, %s2424_s25  ;;  %471 = vperm.xlu0 %2320, %v2564_v4  }
  0x62   : > { %623 = vperm.xlu1 %2325, %v2564_v4   ;;  %2321 = vset.pattern.permute.xlu0 %v4374_v11 }
  0x63   : > { %493 = vperm.xlu0 %2321, %v2564_v4  }
  0x66   : > { %2326 = vset.pattern.permute.xlu1 %v4408_v12 }
  0x67   : > { %637 = vperm.xlu1 %2326, %v2564_v4   ;;  %2322 = vset.pattern.permute.xlu0 %v4373_v13  ;;  %v4377_v13 = vmov 23  }
  0x68   : > { %515 = vperm.xlu0 %2322, %v2564_v4  }
  0x6b   : > { %2328 = vset.pattern.permute.xlu1 %v4384_v14 }
  0x6c   : > { %669 = vperm.xlu1 %2328, %v2564_v4   ;;  %2323 = vset.pattern.permute.xlu0 %v4370_v15  ;;  %v4371_v15 = vmov 11  }
  0x6d   : > { %581 = vperm.xlu0 %2323, %v2564_v4  }
  0x70   : > { %2329 = vset.pattern.permute.xlu1 %v4382_v16 }
  0x71   : > { %2324 = vset.pattern.permute.xlu0 %v4369_v17  ;;  %685 = vperm.xlu1 %2329, %v2564_v4  }
  0x72   : > { %603 = vperm.xlu0 %2324, %v2564_v4  }
  0x75   : > { %2331 = vset.pattern.permute.xlu1 %v4380_v18 }
  0x76   : > { %2327 = vset.pattern.permute.xlu0 %v4368_v19 }
  0x77   : > { %653 = vperm.xlu0 %2327, %v2564_v4  }
  0x7b   : > { %2330 = vset.pattern.permute.xlu0 %v4406_v20 }
  0x7c   : > { %693 = vperm.xlu0 %2330, %v2564_v4  }
  0x80   : > { %2333 = vset.pattern.permute.xlu0 %v4389_v21 }
  0x81   : > { %717 = vperm.xlu0 %2333, %v2564_v4  }
  0x85   : > { %2336 = vset.pattern.permute.xlu0 %v4365_v22 }
  0x86   : > { %765 = vperm.xlu0 %2336, %v2564_v4  }
  0x8a   : > { %2337 = vset.pattern.permute.xlu0 %v4401_v24 }
  0x8b   : > { %790 = vperm.xlu0 %2337, %v2564_v4  }
  0x8f   : > { %2338 = vset.pattern.permute.xlu0 %v4399_v26 }
  0x90   : > { %810 = vperm.xlu0 %2338, %v2564_v4  }
  0x92   : > { %v303_v29 = vpop.permute.xlu0 %302 }
  0x94   : > { %v2632_v30 = vpop.permute.xlu1 %293  ;;  %2339 = vset.pattern.permute.xlu0 %v4363_v31 }
  0x95   : > { %832 = vperm.xlu0 %2339, %v2564_v4  }
  0x96   : > { %v311_v33 = vpop.permute.xlu0 %310 }
  0x98   : > { %v305_v36 = vpop.permute.xlu1 %304 }
  0x99   : > { %v307_v37 = vsel %vm288_vm2, %v305_v36, %v303_v29  ;;  %2340 = vset.pattern.permute.xlu0 %v4364_v38  ;;  %v306_v41 = vsel %vm288_vm2, %v303_v29, %v305_v36  ;;  %v4361_v36 = vmov 25   ;;  %v4391_v38 = vmov 17  }
  0x9a   : > { %v335_v39 = vpop.permute.xlu0 %334  ;;  %854 = vperm.xlu0 %2340, %v2564_v4   ;;  %v2646_v40 = vmul.f32 %v307_v37, %v2639_v35  ;;  %v2657_v48 = vmul.f32 %v306_v41, %v2651_v43  ;;  %v2696_v41 = vsel %vm206_vm6, 1.0, %v4403_v34 }
  0x9b   : > { %4479 = vst [vmem:[#allocation10_spill] sm:$0xff] %v2696_v41 }
  0x9c   : > { %v313_v44 = vpop.permute.xlu1 %312  ;;  %376 = vrot.lane.b32.xlu1 %v2646_v40, %s2424_s25 }
  0x9d   : > { %v314_v61 = vsel %vm297_vm4, %v311_v33, %v313_v44 }
  0x9e   : > { %v285_v45 = vpop.permute.xlu0 %284  ;;  %2341 = vset.pattern.permute.xlu0 %v4397_v47  ;;  %v2691_v37 = vmul.f32 %v314_v61, %v2684_v2  ;;  %v4393_v61 = vmov 8  }
  0x9f   : > { %876 = vperm.xlu0 %2341, %v2564_v4  }
  0xa0   : > { %v337_v50 = vpop.permute.xlu1 %336  ;;  %378 = vrot.lane.b32.xlu1 %v2657_v48, %s2424_s25 }
  0xa1   : > { %v339_v51 = vsel %vm288_vm2, %v337_v50, %v335_v39  ;;  %v338_v55 = vsel %vm288_vm2, %v335_v39, %v337_v50  ;;  %v315_v39 = vsel %vm297_vm4, %v313_v44, %v311_v33 }
  0xa2   : > { %v319_v52 = vpop.permute.xlu0 %318  ;;  %v2665_v54 = vmul.f32 %v339_v51, %v2639_v35  ;;  %v2679_v60 = vmul.f32 %v338_v55, %v2651_v43  ;;  %v4362_v51 = vmov 34   ;;  %v2703_v32 = vmul.f32 %v315_v39, %v2696_v41 }
  0xa3   : > { %2342 = vset.pattern.permute.xlu0 %v4395_v56 }
  0xa4   : > { %420 = vrot.lane.b32.xlu1 %v2665_v54, %s2424_s25  ;;  %v2673_v57 = vpop.permute.xlu1 %295  ;;  %898 = vperm.xlu0 %2342, %v2564_v4  }
  0xa6   : > { %v2676_v58 = vpop.permute.xlu0 %326 }
  0xa8   : > { %422 = vrot.lane.b32.xlu1 %v2679_v60, %s2424_s25  ;;  %v321_v29 = vpop.permute.xlu1 %320  ;;  %2343 = vset.pattern.permute.xlu0 %v4361_v36 }
  0xa9   : > { %920 = vperm.xlu0 %2343, %v2564_v4   ;;  %v323_v22 = vsel %vm288_vm2, %v321_v29, %v319_v52 }
  0xaa   : > { %v287_v27 = vpop.permute.xlu0 %286 }
  0xab   : > { %v290_v31 = vsel %vm288_vm2, %v287_v27, %v285_v45 }
  0xac   : > { %552 = vrot.lane.b32.xlu1 %v2691_v37, %s2424_s25  ;;  %v329_v50 = vpop.permute.xlu1 %328 }
  0xad   : > { %2344 = vset.pattern.permute.xlu0 %v4362_v51  ;;  %v330_v17 = vsel %vm297_vm4, %v2676_v58, %v329_v50 }
  0xae   : > { %942 = vperm.xlu0 %2344, %v2564_v4   ;;  %v343_v55 = vpop.permute.xlu0 %342 }
  0xb0   : > { %554 = vrot.lane.b32.xlu1 %v2703_v32, %s2424_s25  ;;  %v345_v33 = vpop.permute.xlu1 %344 }
  0xb1   : > { %v346_v44 = vsel %vm297_vm4, %v343_v55, %v345_v33  ;;  %v347_v51 = vsel %vm297_vm4, %v345_v33, %v343_v55  ;;  %v2728_v55 = vmul.f32 %v290_v31, %v2639_v35  ;;  %v289_v33 = vsel %vm288_vm2, %v285_v45, %v287_v27 }
  0xb2   : > { %2345 = vset.pattern.permute.xlu0 %v4393_v61  ;;  %v2711_v36 = vmul.f32 %v346_v44, %v2684_v2  ;;  %v2719_v39 = vmul.f32 %v347_v51, %v2696_v41  ;;  %v4366_v44 = vmov 26   ;;  %v2737_v51 = vmul.f32 %v289_v33, %v2651_v43 }
  0xb3   : > { %964 = vperm.xlu0 %2345, %v2564_v4   ;;  %v4367_v31 = vmov 35   ;;  %v2746_v45 = vmul.f32 %v323_v22, %v2639_v35  ;;  %v322_v27 = vsel %vm288_vm2, %v319_v52, %v321_v29  ;;  %v4372_v33 = vmov 2   ;;  %v2766_v22 = vld [vmem:[%s4359_s2 + $0x8] sm:$0xff] }
  0xb4   : > { %596 = vrot.lane.b32.xlu1 %v2711_v36, %s2424_s25  ;;  %4480 = vst [vmem:[#allocation11_spill] sm:$0xff] %v2719_v39  ;;  %4481 = vst [vmem:[#allocation12_spill] sm:$0xff] %v2766_v22  ;;  %v2768_v52 = vpop.permute.xlu1 %442 }
  0xb7   : > { %2346 = vset.pattern.permute.xlu0 %v4391_v38 }
  0xb8   : > { %986 = vperm.xlu0 %2346, %v2564_v4   ;;  %598 = vrot.lane.b32.xlu1 %v2719_v39, %s2424_s25 }
  0xbc   : > { %2347 = vset.pattern.permute.xlu0 %v4366_v44  ;;  %355 = vrot.lane.b32.xlu1 %v2728_v55, %s2424_s25  ;;  %v2754_v44 = vmul.f32 %v322_v27, %v2651_v43  ;;  %v299_v27 = vsel %vm297_vm4, %v2673_v57, %v2632_v30 }
  0xbd   : > { %1008 = vperm.xlu0 %2347, %v2564_v4   ;;  %v2781_v19 = vmul.f32 %v299_v27, %v2696_v41 }
  0xc0   : > { %357 = vrot.lane.b32.xlu1 %v2737_v51, %s2424_s25 }
  0xc1   : > { %2348 = vset.pattern.permute.xlu0 %v4367_v31  ;;  %v298_v31 = vsel %vm297_vm4, %v2632_v30, %v2673_v57  ;;  %v2793_v30 = vmul.f32 %v330_v17, %v2684_v2  ;;  %v331_v57 = vsel %vm297_vm4, %v329_v50, %v2676_v58  ;;  %v4375_v58 = vmov 14  }
  0xc2   : > { %1030 = vperm.xlu0 %2348, %v2564_v4   ;;  %v2771_v29 = vmul.f32 %v298_v31, %v2684_v2  ;;  %v2787_v31 = vpop.permute.xlu1 %444  ;;  %v4378_v50 = vmov 31  }
  0xc4   : > { %398 = vrot.lane.b32.xlu1 %v2746_v45, %s2424_s25 }
  0xc6   : > { %2349 = vset.pattern.permute.xlu0 %v4372_v33  ;;  %v2801_v27 = vpop.permute.xlu1 %464 }
  0xc7   : > { %537 = vperm.xlu0 %2349, %v2564_v4  }
  0xc8   : > { %400 = vrot.lane.b32.xlu1 %v2754_v44, %s2424_s25 }
  0xca   : > { %v2810_v17 = vpop.permute.xlu1 %466 }
  0xcb   : > { %1155 = vperm.xlu0 %2349, %v2766_v22  }
  0xcc   : > { %530 = vrot.lane.b32.xlu1 %v2771_v29, %s2424_s25 }
  0xcf   : > { %2350 = vset.pattern.permute.xlu0 %v4371_v15  ;;  %v2804_v15 = vmul.f32 %v331_v57, %v2696_v41  ;;  %v2816_v57 = vpop.permute.xlu1 %486 }
  0xd0   : > { %559 = vperm.xlu0 %2350, %v2564_v4   ;;  %532 = vrot.lane.b32.xlu1 %v2781_v19, %s2424_s25 }
  0xd3   : > { %v2820_v33 = vpop.permute.xlu1 %488 }
  0xd4   : > { %574 = vrot.lane.b32.xlu1 %v2793_v30, %s2424_s25  ;;  %1169 = vperm.xlu0 %2350, %v2766_v22  }
  0xd7   : > { %v2824_v11 = vpop.permute.xlu1 %508 }
  0xd8   : > { %576 = vrot.lane.b32.xlu1 %v2804_v15, %s2424_s25  ;;  %2353 = vset.pattern.permute.xlu0 %v4382_v16 }
  0xd9   : > { %1195 = vperm.xlu0 %2353, %v2766_v22  }
  0xdc   : > { %701 = vperm.xlu1 %2331, %v2564_v4  }
  0xdd   : > { %2356 = vset.pattern.permute.xlu0 %v4375_v58 }
  0xe0   : > { %2332 = vset.pattern.permute.xlu1 %v4378_v50 }
  0xe1   : > { %709 = vperm.xlu1 %2332, %v2564_v4  }
  0xe5   : > { %2334 = vset.pattern.permute.xlu1 %v4375_v58  ;;  %v2831_v58 = vpop.permute.xlu1 %510 }
  0xe6   : > { %733 = vperm.xlu1 %2334, %v2564_v4  }
  0xe9   : > { %v2835_v10 = vpop.permute.xlu1 %623 }
  0xea   : > { %2335 = vset.pattern.permute.xlu1 %v4377_v13 }
  0xeb   : > { %749 = vperm.xlu1 %2335, %v2564_v4   ;;  %v2839_v4 = vpop.permute.xlu0 %352 }
  0xec   : > { %4482 = vst [vmem:[#allocation13_spill] sm:$0xff] %v2839_v4 }
  0xed   : > { %v2843_v13 = vpop.permute.xlu1 %637 }
  0xef   : > { %782 = vrot.lane.b32.xlu1 %v2728_v55, %s2461_s28  ;;  %v2847_v50 = vpop.permute.xlu0 %363 }
  0xf0   : > { %2351 = vset.pattern.permute.xlu1 %v4387_v1 }
  0xf1   : > { %v2849_v9 = vpop.permute.xlu1 %669 }
  0xf3   : > { %784 = vrot.lane.b32.xlu1 %v2737_v51, %s2461_s28  ;;  %v2855_v8 = vpop.permute.xlu0 %383 }
  0xf5   : > { %v2853_v18 = vpop.permute.xlu1 %685 }
  0xf7   : > { %803 = vrot.lane.b32.xlu1 %v2646_v40, %s2461_s28  ;;  %v2863_v7 = vpop.permute.xlu0 %405 }
  0xfb   : > { %805 = vrot.lane.b32.xlu1 %v2657_v48, %s2461_s28  ;;  %v2871_v5 = vpop.permute.xlu0 %427 }
  0xff   : > { %825 = vrot.lane.b32.xlu1 %v2746_v45, %s2461_s28  ;;  %v2879_v0 = vpop.permute.xlu0 %449 }
 0x103   : > { %827 = vrot.lane.b32.xlu1 %v2754_v44, %s2461_s28  ;;  %v2887_v61 = vpop.permute.xlu0 %471 }
 0x107   : > { %847 = vrot.lane.b32.xlu1 %v2665_v54, %s2461_s28  ;;  %v2895_v47 = vpop.permute.xlu0 %493 }
 0x10b   : > { %849 = vrot.lane.b32.xlu1 %v2679_v60, %s2461_s28  ;;  %v2901_v34 = vpop.permute.xlu0 %515 }
 0x10c   : > { %4487 = vst [vmem:[#allocation18_spill] sm:$0xff] %v2901_v34 }
 0x10e   : > { %v2859_v16 = vpop.permute.xlu1 %376 }
 0x10f   : > { %869 = vrot.lane.b32.xlu1 %v2519_v46, %s2461_s28  ;;  %v2907_v20 = vpop.permute.xlu0 %581 }
 0x110   : > { %4488 = vst [vmem:[#allocation19_spill] sm:$0xff] %v2907_v20  ;;  %v4493_v20 = vmov 12  }
 0x112   : > { %v2865_v14 = vpop.permute.xlu1 %378 }
 0x113   : > { %871 = vrot.lane.b32.xlu1 %v2543_v63, %s2461_s28  ;;  %v2911_v41 = vpop.permute.xlu0 %603 }
 0x114   : > { %4489 = vst [vmem:[#allocation20_spill] sm:$0xff] %v2911_v41 }
 0x116   : > { %v2869_v6 = vpop.permute.xlu1 %420 }
 0x117   : > { %891 = vrot.lane.b32.xlu1 %v2515_v42, %s2461_s28  ;;  %v2917_v43 = vpop.permute.xlu0 %653 }
 0x11a   : > { %v2875_v1 = vpop.permute.xlu1 %422 }
 0x11b   : > { %893 = vrot.lane.b32.xlu1 %v2523_v49, %s2461_s28  ;;  %v2921_v35 = vpop.permute.xlu0 %693 }
 0x11e   : > { %v2881_v21 = vpop.permute.xlu1 %552 }
 0x11f   : > { %4483 = vst [vmem:[#allocation14_spill] sm:$0xff] %v2881_v21  ;;  %913 = vrot.lane.b32.xlu1 %v2539_v62, %s2461_s28  ;;  %v2927_v28 = vpop.permute.xlu0 %717 }
 0x120   : > { %4490 = vst [vmem:[#allocation21_spill] sm:$0xff] %v2927_v28  ;;  %v4496_v28 = vmov 13  }
 0x122   : > { %v2885_v38 = vpop.permute.xlu1 %554 }
 0x123   : > { %4484 = vst [vmem:[#allocation15_spill] sm:$0xff] %v2885_v38  ;;  %915 = vrot.lane.b32.xlu1 %v2549_v3, %s2461_s28 }
 0x126   : > { %v2891_v56 = vpop.permute.xlu1 %596 }
 0x127   : > { %4485 = vst [vmem:[#allocation16_spill] sm:$0xff] %v2891_v56  ;;  %935 = vrot.lane.b32.xlu1 %v2527_v53, %s2461_s28  ;;  %v2934_v53 = vpop.permute.xlu0 %765 }
 0x128   : > { %4491 = vst [vmem:[#allocation22_spill] sm:$0xff] %v2934_v53 }
 0x12a   : > { %v2897_v26 = vpop.permute.xlu1 %598 }
 0x12b   : > { %4486 = vst [vmem:[#allocation17_spill] sm:$0xff] %v2897_v26  ;;  %937 = vrot.lane.b32.xlu1 %v2535_v59, %s2461_s28  ;;  %v2940_v62 = vpop.permute.xlu0 %790 }
 0x12c   : > { %4494 = vst [vmem:[#allocation24_spill] sm:$0xff] %v2940_v62 }
 0x12e   : > { %v356_v24 = vpop.permute.xlu1 %355 }
 0x12f   : > { %957 = vrot.lane.b32.xlu1 %v2771_v29, %s2461_s28  ;;  %v2945_v26 = vpop.permute.xlu0 %810 }
 0x130   : > { %4497 = vst [vmem:[#allocation26_spill] sm:$0xff] %v2945_v26 }
 0x132   : > { %v358_v23 = vpop.permute.xlu1 %357 }
 0x133   : > { %959 = vrot.lane.b32.xlu1 %v2781_v19, %s2461_s28  ;;  %v2951_v38 = vpop.permute.xlu0 %832 }
 0x134   : > { %4500 = vst [vmem:[#allocation29_spill] sm:$0xff] %v2951_v38 }
 0x136   : > { %v399_v12 = vpop.permute.xlu1 %398 }
 0x137   : > { %979 = vrot.lane.b32.xlu1 %v2691_v37, %s2461_s28 }
 0x13a   : > { %v401_v2 = vpop.permute.xlu1 %400 }
 0x13b   : > { %981 = vrot.lane.b32.xlu1 %v2703_v32, %s2461_s28 }
 0x13e   : > { %v2923_v4 = vpop.permute.xlu1 %530 }
 0x13f   : > { %1001 = vrot.lane.b32.xlu1 %v2793_v30, %s2461_s28 }
 0x142   : > { %v2929_v59 = vpop.permute.xlu1 %532 }
 0x143   : > { %1003 = vrot.lane.b32.xlu1 %v2804_v15, %s2461_s28 }
 0x146   : > { %v2936_v3 = vpop.permute.xlu1 %574 }
 0x147   : > { %1023 = vrot.lane.b32.xlu1 %v2711_v36, %s2461_s28  ;;  %4492 = vst [vmem:[#allocation23_spill] sm:$0xff] %v2936_v3  ;;  %v2955_v3 = vpop.permute.xlu0 %854 }
 0x148   : > { %4502 = vst [vmem:[#allocation31_spill] sm:$0xff] %v2955_v3 }
 0x14a   : > { %v2942_v41 = vpop.permute.xlu1 %576 }
 0x14b   : > { %1025 = vrot.lane.b32.xlu1 %v2719_v39, %s2461_s28  ;;  %4495 = vst [vmem:[#allocation25_spill] sm:$0xff] %v2942_v41 }
 0x14f   : > { %1181 = vperm.xlu1 %2351, %v2766_v22  }
 0x153   : > { %2352 = vset.pattern.permute.xlu1 %v4493_v20 }
 0x154   : > { %1187 = vperm.xlu1 %2352, %v2766_v22   ;;  %v2959_v22 = vpop.permute.xlu0 %876 }
 0x155   : > { %4504 = vst [vmem:[#allocation33_spill] sm:$0xff] %v2959_v22  ;;  %v4515_v22 = vlaneseq }
 0x158   : > { %2354 = vset.pattern.permute.xlu1 %v4496_v28  ;;  %v2965_v28 = vpop.permute.xlu0 %898 }
 0x159   : > { %4507 = vst [vmem:[#allocation36_spill] sm:$0xff] %v2965_v28 }
 0x15b   : > { %v2947_v56 = vpop.permute.xlu1 %701 }
 0x15c   : > { %4498 = vst [vmem:[#allocation27_spill] sm:$0xff] %v2947_v56  ;;  %v2969_v56 = vpop.permute.xlu0 %920 }
 0x15d   : > { %4509 = vst [vmem:[#allocation38_spill] sm:$0xff] %v2969_v56  ;;  %v361_v56 = vsel %vm359_vm7, %v358_v23, %v356_v24 }
 0x160   : > { %v2949_v34 = vpop.permute.xlu1 %709 }
 0x161   : > { %4499 = vst [vmem:[#allocation28_spill] sm:$0xff] %v2949_v34 }
 0x165   : > { %v2953_v53 = vpop.permute.xlu1 %733 }
 0x166   : > { %4501 = vst [vmem:[#allocation30_spill] sm:$0xff] %v2953_v53  ;;  %v2975_v53 = vpop.permute.xlu0 %942 }
 0x167   : > { %4512 = vst [vmem:[#allocation41_spill] sm:$0xff] %v2975_v53  ;;  %v360_v53 = vsel %vm359_vm7, %v356_v24, %v358_v23  ;;  %v402_v23 = vsel %vm359_vm7, %v399_v12, %v401_v2 }
 0x16a   : > { %v2957_v20 = vpop.permute.xlu1 %749 }
 0x16b   : > { %4503 = vst [vmem:[#allocation32_spill] sm:$0xff] %v2957_v20  ;;  %v2979_v20 = vpop.permute.xlu0 %964 }
 0x16c   : > { %4514 = vst [vmem:[#allocation43_spill] sm:$0xff] %v2979_v20  ;;  %v403_v20 = vsel %vm359_vm7, %v401_v2, %v399_v12 }
 0x16e   : > { %v2961_v62 = vpop.permute.xlu1 %782 }
 0x16f   : > { %4505 = vst [vmem:[#allocation34_spill] sm:$0xff] %v2961_v62  ;;  %v2982_v62 = vshrl.u32 %v4515_v22, 7  ;;  %v381_v22 = vsel %vm359_vm7, %v2865_v14, %v2859_v16 }
 0x171   : > { %4516 = vst [vmem:[#allocation44_spill] sm:$0xff] %v2982_v62  ;;  %v2990_v28 = vsub.s32 0, %v2982_v62  ;;  %v380_v62 = vsel %vm359_vm7, %v2859_v16, %v2865_v14  ;;  %v425_v14 = vsel %vm359_vm7, %v2875_v1, %v2869_v6 }
 0x172   : > { %v2963_v41 = vpop.permute.xlu1 %784 }
 0x173   : > { %4506 = vst [vmem:[#allocation35_spill] sm:$0xff] %v2963_v41  ;;  %v373_v24 = vrot.slane %v360_v53, %v2990_v28  ;;  %v415_v21 = vrot.slane %v402_v23, %v2990_v28  ;;  %v643_v2 = vrot.slane %v2646_v40, %v2990_v28  ;;  %v659_v23 = vrot.slane %v2746_v45, %v2990_v28 }
 0x174   : > { %v663_v40 = vrot.slane %v2754_v44, %v2990_v28 }
 0x175   : > { %v375_v12 = vmul.f32 %v373_v24, %v2847_v50  ;;  %v648_v45 = vmul.f32 %v643_v2, %v2843_v13  ;;  %v675_v2 = vrot.slane %v2665_v54, %v2990_v28 }
 0x176   : > { %v2967_v26 = vpop.permute.xlu1 %803 }
 0x177   : > { %4508 = vst [vmem:[#allocation37_spill] sm:$0xff] %v2967_v26  ;;  %v411_v26 = vrot.slane %v403_v20, %v2990_v28 }
 0x179   : > { %v416_v20 = vmul.f32 %v411_v26, %v2863_v7  ;;  %v433_v26 = vrot.slane %v425_v14, %v2990_v28 }
 0x17a   : > { %v2971_v34 = vpop.permute.xlu1 %805 }
 0x17b   : > { %4510 = vst [vmem:[#allocation39_spill] sm:$0xff] %v2971_v34 }
 0x17e   : > { %v2973_v38 = vpop.permute.xlu1 %825 }
 0x17f   : > { %4511 = vst [vmem:[#allocation40_spill] sm:$0xff] %v2973_v38 }
 0x182   : > { %v2977_v3 = vpop.permute.xlu1 %827 }
 0x183   : > { %4513 = vst [vmem:[#allocation42_spill] sm:$0xff] %v2977_v3  ;;  %v369_v3 = vrot.slane %v361_v56, %v2990_v28 }
 0x185   : > { %v374_v39 = vmul.f32 %v369_v3, %v2847_v50  ;;  %v447_v3 = vsel %vm359_vm7, %v2787_v31, %v2768_v52 }
 0x186   : > { %v2984_v41 = vpop.permute.xlu1 %847 }
 0x187   : > { %4517 = vst [vmem:[#allocation45_spill] sm:$0xff] %v2984_v41  ;;  %v3002_v41 = vpop.permute.xlu0 %986 }
 0x188   : > { %4519 = vst [vmem:[#allocation47_spill] sm:$0xff] %v3002_v41  ;;  %v393_v41 = vrot.slane %v380_v62, %v2990_v28  ;;  %v424_v62 = vsel %vm359_vm7, %v2869_v6, %v2875_v1  ;;  %v446_v1 = vsel %vm359_vm7, %v2768_v52, %v2787_v31  ;;  %v647_v6 = vrot.slane %v2657_v48, %v2990_v28 }
 0x189   : > { %v633_v48 = vrot.slane %v2737_v51, %v2990_v28  ;;  %v469_v51 = vsel %vm359_vm7, %v2810_v17, %v2801_v27 }
 0x18a   : > { %v2994_v38 = vpop.permute.xlu1 %849  ;;  %v395_v50 = vmul.f32 %v393_v41, %v2855_v8  ;;  %v629_v41 = vrot.slane %v2728_v55, %v2990_v28  ;;  %v649_v44 = vmul.f32 %v647_v6, %v2843_v13  ;;  %v468_v55 = vsel %vm359_vm7, %v2801_v27, %v2810_v17 }
 0x18b   : > { %4518 = vst [vmem:[#allocation46_spill] sm:$0xff] %v2994_v38  ;;  %v389_v38 = vrot.slane %v381_v22, %v2990_v28  ;;  %v3024_v53 = vpop.permute.xlu0 %1008  ;;  %v664_v13 = vmul.f32 %v659_v23, %v2917_v43  ;;  %v491_v27 = vsel %vm359_vm7, %v2820_v33, %v2816_v57  ;;  %v477_v6 = vrot.slane %v469_v51, %v2990_v28 }
 0x18c   : > { %v689_v51 = vmul.f32 %v2853_v18, %v2543_v63 }
 0x18d   : > { %v394_v16 = vmul.f32 %v389_v38, %v2855_v8  ;;  %v417_v38 = vmul.f32 %v415_v21, %v2863_v7  ;;  %v437_v8 = vrot.slane %v424_v62, %v2990_v28  ;;  %v397_v7 = vadd.f32 %v395_v50, %v375_v12 }
 0x18e   : > { %v3014_v34 = vpop.permute.xlu1 %869  ;;  %v455_v21 = vrot.slane %v447_v3, %v2990_v28  ;;  %v634_v12 = vmul.f32 %v629_v41, %v2835_v10  ;;  %v635_v62 = vmul.f32 %v633_v48, %v2835_v10  ;;  %v739_v48 = vrot.slane %v2691_v37, %v2990_v28 }
 0x18f   : > { %v396_v22 = vadd.f32 %v394_v16, %v374_v39  ;;  %v459_v39 = vrot.slane %v446_v1, %v2990_v28  ;;  %v419_v24 = vadd.f32 %v417_v38, %v397_v7  ;;  %v3064_v14 = vpop.permute.xlu0 %1030  ;;  %v438_v16 = vmul.f32 %v433_v26, %v2871_v5 }
 0x190   : > { %v439_v3 = vmul.f32 %v437_v8, %v2871_v5  ;;  %v650_v17 = vadd.f32 %v648_v45, %v634_v12  ;;  %v651_v1 = vadd.f32 %v649_v44, %v635_v62  ;;  %v490_v5 = vsel %vm359_vm7, %v2816_v57, %v2820_v33 }
 0x191   : > { %v418_v52 = vadd.f32 %v416_v20, %v396_v22  ;;  %v665_v20 = vmul.f32 %v663_v40, %v2917_v43  ;;  %v481_v43 = vrot.slane %v468_v55, %v2990_v28  ;;  %v460_v54 = vmul.f32 %v455_v21, %v2879_v0 }
 0x192   : > { %v3032_v56 = vpop.permute.xlu1 %871  ;;  %v441_v10 = vadd.f32 %v439_v3, %v419_v24  ;;  %v461_v26 = vmul.f32 %v459_v39, %v2879_v0  ;;  %v679_v22 = vrot.slane %v2679_v60, %v2990_v28  ;;  %v666_v23 = vadd.f32 %v664_v13, %v650_v17 }
 0x193   : > { %v440_v50 = vadd.f32 %v438_v16, %v418_v52  ;;  %v667_v40 = vadd.f32 %v665_v20, %v651_v1  ;;  %v3098_v8 = vpop.permute.xlu0 %537  ;;  %v499_v7 = vrot.slane %v491_v27, %v2990_v28  ;;  %v503_v33 = vrot.slane %v490_v5, %v2990_v28 }
 0x194   : > { %v680_v57 = vmul.f32 %v675_v2, %v2849_v9  ;;  %v681_v0 = vmul.f32 %v679_v22, %v2849_v9  ;;  %v463_v21 = vadd.f32 %v461_v26, %v441_v10  ;;  %v512_v60 = vsel %vm359_vm7, %v2824_v11, %v2831_v58 }
 0x195   : > { %v462_v41 = vadd.f32 %v460_v54, %v440_v50  ;;  %v513_v39 = vsel %vm359_vm7, %v2831_v58, %v2824_v11  ;;  %v482_v45 = vmul.f32 %v477_v6, %v2887_v61  ;;  %v483_v44 = vmul.f32 %v481_v43, %v2887_v61  ;;  %v4521_v6 = vld [vmem:[#allocation14_spill] sm:$0xff]  ;;  %v4522_v43 = vld [vmem:[#allocation15_spill] sm:$0xff] }
 0x196   : > { %v3059_v31 = vpop.permute.xlu1 %891  ;;  %v682_v24 = vadd.f32 %v680_v57, %v666_v23  ;;  %v683_v55 = vadd.f32 %v681_v0, %v667_v40  ;;  %v688_v9 = vmul.f32 %v2853_v18, %v2519_v46  ;;  %v723_v12 = vrot.slane %v2771_v29, %v2990_v28  ;;  %v4525_v23 = vld [vmem:[#allocation16_spill] sm:$0xff]  ;;  %v4526_v40 = vld [vmem:[#allocation17_spill] sm:$0xff] }
 0x197   : > { %v727_v16 = vrot.slane %v2781_v19, %v2990_v28  ;;  %v484_v62 = vadd.f32 %v482_v45, %v462_v41  ;;  %v743_v11 = vrot.slane %v2703_v32, %v2990_v28  ;;  %v521_v61 = vrot.slane %v513_v39, %v2990_v28  ;;  %v3131_v20 = vpop.permute.xlu0 %1155  ;;  %v4556_v32 = vld [vmem:[#allocation41_spill] sm:$0xff] }
 0x198   : > { %v485_v13 = vadd.f32 %v483_v44, %v463_v21  ;;  %v755_v46 = vrot.slane %v2793_v30, %v2990_v28  ;;  %v525_v63 = vrot.slane %v512_v60, %v2990_v28  ;;  %v504_v18 = vmul.f32 %v499_v7, %v2895_v47  ;;  %v4527_v44 = vld [vmem:[#allocation25_spill] sm:$0xff] }
 0x199   : > { %v505_v19 = vmul.f32 %v503_v33, %v2895_v47  ;;  %v696_v29 = vmul.f32 %v2921_v35, %v2515_v42  ;;  %v690_v3 = vadd.f32 %v688_v9, %v682_v24  ;;  %v691_v2 = vadd.f32 %v689_v51, %v683_v55  ;;  %v4528_v24 = vld [vmem:[#allocation23_spill] sm:$0xff] }
 0x19a   : > { %v3082_v38 = vpop.permute.xlu1 %893  ;;  %v697_v50 = vmul.f32 %v2921_v35, %v2523_v49  ;;  %v535_v27 = vsel %vm359_vm7, %v2929_v59, %v2923_v4  ;;  %v771_v17 = vrot.slane %v2711_v36, %v2990_v28  ;;  %v534_v47 = vsel %vm359_vm7, %v2923_v4, %v2929_v59  ;;  %v4520_v49 = vld [vmem:[#allocation11_spill] sm:$0xff]  ;;  %v4524_v59 = vld [vmem:[#allocation18_spill] sm:$0xff] }
 0x19b   : > { %v506_v1 = vadd.f32 %v504_v18, %v484_v62  ;;  %v557_v5 = vsel %vm359_vm7, %v4522_v43, %v4521_v6  ;;  %v507_v36 = vadd.f32 %v505_v19, %v485_v13  ;;  %v4523_v54 = vmov 0.0   ;;  %v560_v60 = vpop.permute.xlu0 %559  ;;  %v4529_v62 = vld [vmem:[#allocation21_spill] sm:$0xff] }
 0x19c   : > { %v3167_v26 = vsel %vm209_vm8, 1.0, %v4523_v54  ;;  %v526_v4 = vmul.f32 %v521_v61, %v4524_v59  ;;  %v527_v22 = vmul.f32 %v525_v63, %v4524_v59  ;;  %v601_v7 = vsel %vm359_vm7, %v4526_v40, %v4525_v23 }
 0x19d   : > { %v543_v41 = vrot.slane %v535_v27, %v2990_v28  ;;  %v698_v33 = vadd.f32 %v696_v29, %v690_v3  ;;  %v699_v57 = vadd.f32 %v697_v50, %v691_v2  ;;  %v556_v0 = vsel %vm359_vm7, %v4521_v6, %v4522_v43  ;;  %v4530_v29 = vld [vmem:[#allocation22_spill] sm:$0xff] }
 0x19e   : > { %v3103_v52 = vpop.permute.xlu1 %913  ;;  %v547_v21 = vrot.slane %v534_v47, %v2990_v28  ;;  %v565_v39 = vrot.slane %v557_v5, %v2990_v28  ;;  %v528_v45 = vadd.f32 %v526_v4, %v506_v1  ;;  %v578_v55 = vsel %vm359_vm7, %v4528_v24, %v4527_v44  ;;  %v4532_v5 = vld [vmem:[#allocation37_spill] sm:$0xff]  ;;  %v4547_v6 = vld [vmem:[#allocation26_spill] sm:$0xff] }
 0x19f   : > { %v579_v9 = vsel %vm359_vm7, %v4527_v44, %v4528_v24  ;;  %v3193_v61 = vmul.f32 %v723_v12, %v4529_v62  ;;  %v3199_v13 = vsel %vm359_vm7, %v4525_v23, %v4526_v40  ;;  %v609_v63 = vrot.slane %v601_v7, %v2990_v28  ;;  %v4534_v23 = vld [vmem:[#allocation35_spill] sm:$0xff]  ;;  %v4535_v40 = vld [vmem:[#allocation34_spill] sm:$0xff]  ;;  %v4539_v24 = vld [vmem:[#allocation40_spill] sm:$0xff] }
 0x1a0   : > { %v529_v18 = vadd.f32 %v527_v22, %v507_v36  ;;  %v3203_v19 = vmul.f32 %v727_v16, %v4529_v62  ;;  %v3206_v3 = vmul.f32 %v771_v17, %v4530_v29  ;;  %v548_v2 = vmul.f32 %v543_v41, %v3098_v8  ;;  %v4531_v16 = vld [vmem:[#allocation39_spill] sm:$0xff]  ;;  %v4538_v44 = vld [vmem:[#allocation42_spill] sm:$0xff] }
 0x1a1   : > { %v570_v50 = vmul.f32 %v565_v39, %v560_v60  ;;  %v569_v12 = vrot.slane %v556_v0, %v2990_v28  ;;  %v549_v27 = vmul.f32 %v547_v21, %v3098_v8  ;;  %v587_v47 = vrot.slane %v579_v9, %v2990_v28  ;;  %v4533_v8 = vld [vmem:[#allocation20_spill] sm:$0xff]  ;;  %v4537_v39 = vld [vmem:[#allocation27_spill] sm:$0xff] }
 0x1a2   : > { %v3128_v58 = vpop.permute.xlu1 %915  ;;  %v591_v1 = vrot.slane %v578_v55, %v2990_v28  ;;  %v550_v43 = vadd.f32 %v548_v2, %v528_v45  ;;  %v807_v17 = vsel %vm786_vm9, %v4532_v5, %v4531_v16  ;;  %v808_v36 = vsel %vm786_vm9, %v4531_v16, %v4532_v5  ;;  %v4536_v21 = vld [vmem:[#allocation4_spill] sm:$0xff]  ;;  %v4540_v62 = vld [vmem:[#allocation19_spill] sm:$0xff]  ;;  %v4542_v16 = vld [vmem:[#allocation2_spill] sm:$0xff] }
 0x1a3   : > { %v614_v4 = vmul.f32 %v609_v63, %v4533_v8  ;;  %v551_v22 = vadd.f32 %v549_v27, %v529_v18  ;;  %v787_v7 = vsel %vm786_vm9, %v4535_v40, %v4534_v23  ;;  %v788_v41 = vsel %vm786_vm9, %v4534_v23, %v4535_v40  ;;  %v4541_v27 = vld [vmem:[#allocation5_spill] sm:$0xff]  ;;  %v4543_v5 = vld [vmem:[#allocation28_spill] sm:$0xff] }
 0x1a4   : > { %v572_v0 = vadd.f32 %v570_v50, %v550_v43  ;;  %v704_v45 = vmul.f32 %v4537_v39, %v4536_v21  ;;  %v829_v55 = vsel %vm786_vm9, %v4539_v24, %v4538_v44  ;;  %v830_v9 = vsel %vm786_vm9, %v4538_v44, %v4539_v24  ;;  %v4544_v24 = vld [vmem:[#allocation46_spill] sm:$0xff] }
 0x1a5   : > { %v592_v63 = vmul.f32 %v587_v47, %v4540_v62  ;;  %v3246_v18 = vmul.f32 %v591_v1, %v4540_v62  ;;  %v816_v2 = vrot.slane %v807_v17, %v2990_v28  ;;  %v820_v50 = vrot.slane %v808_v36, %v2990_v28  ;;  %v4545_v62 = vld [vmem:[#allocation45_spill] sm:$0xff] }
 0x1a6   : > { %v3156_v10 = vpop.permute.xlu1 %935  ;;  %v705_v43 = vmul.f32 %v4537_v39, %v4541_v27  ;;  %v712_v23 = vmul.f32 %v4543_v5, %v4542_v16  ;;  %v796_v40 = vrot.slane %v787_v7, %v2990_v28  ;;  %v800_v21 = vrot.slane %v788_v41, %v2990_v28  ;;  %v4546_v16 = vld [vmem:[#allocation3_spill] sm:$0xff] }
 0x1a7   : > { %v838_v47 = vrot.slane %v829_v55, %v2990_v28  ;;  %v842_v1 = vrot.slane %v830_v9, %v2990_v28  ;;  %v851_v17 = vsel %vm786_vm9, %v4545_v62, %v4544_v24  ;;  %v852_v36 = vsel %vm786_vm9, %v4544_v24, %v4545_v62 }
 0x1a8   : > { %v571_v39 = vmul.f32 %v569_v12, %v560_v60  ;;  %v594_v27 = vadd.f32 %v592_v63, %v572_v0  ;;  %v706_v7 = vadd.f32 %v704_v45, %v698_v33  ;;  %v713_v41 = vmul.f32 %v4543_v5, %v4546_v16  ;;  %v4548_v63 = vld [vmem:[#allocation24_spill] sm:$0xff] }
 0x1a9   : > { %v821_v55 = vmul.f32 %v816_v2, %v4547_v6  ;;  %v822_v9 = vmul.f32 %v820_v50, %v4547_v6  ;;  %v873_v35 = vsel %vm786_vm9, %v3014_v34, %v3032_v56  ;;  %v874_v24 = vsel %vm786_vm9, %v3032_v56, %v3014_v34  ;;  %v4549_v50 = vld [vmem:[#allocation29_spill] sm:$0xff] }
 0x1aa   : > { %v3190_v51 = vpop.permute.xlu1 %937  ;;  %v707_v60 = vadd.f32 %v705_v43, %v699_v57  ;;  %v714_v12 = vadd.f32 %v712_v23, %v706_v7  ;;  %v860_v33 = vrot.slane %v851_v17, %v2990_v28  ;;  %v864_v0 = vrot.slane %v852_v36, %v2990_v28 }
 0x1ab   : > { %v801_v2 = vmul.f32 %v796_v40, %v4548_v63  ;;  %v802_v6 = vmul.f32 %v800_v21, %v4548_v63  ;;  %v843_v5 = vmul.f32 %v838_v47, %v4549_v50  ;;  %v844_v62 = vmul.f32 %v842_v1, %v4549_v50  ;;  %v4550_v21 = vld [vmem:[#allocation31_spill] sm:$0xff]  ;;  %v4553_v63 = vld [vmem:[#allocation36_spill] sm:$0xff] }
 0x1ac   : > { %v882_v16 = vrot.slane %v873_v35, %v2990_v28  ;;  %v886_v42 = vrot.slane %v874_v24, %v2990_v28  ;;  %v895_v34 = vsel %vm786_vm9, %v3059_v31, %v3082_v38  ;;  %v896_v56 = vsel %vm786_vm9, %v3082_v38, %v3059_v31 }
 0x1ad   : > { %v573_v57 = vadd.f32 %v571_v39, %v551_v22  ;;  %v715_v43 = vadd.f32 %v713_v41, %v707_v60  ;;  %v823_v23 = vadd.f32 %v821_v55, %v801_v2  ;;  %v824_v40 = vadd.f32 %v822_v9, %v802_v6  ;;  %v4551_v55 = vld [vmem:[#allocation33_spill] sm:$0xff] }
 0x1ae   : > { %v3223_v59 = vpop.permute.xlu1 %957  ;;  %v865_v47 = vmul.f32 %v860_v33, %v4550_v21  ;;  %v866_v35 = vmul.f32 %v864_v0, %v4550_v21  ;;  %v917_v1 = vsel %vm786_vm9, %v3103_v52, %v3128_v58  ;;  %v918_v17 = vsel %vm786_vm9, %v3128_v58, %v3103_v52 }
 0x1af   : > { %v616_v31 = vadd.f32 %v614_v4, %v594_v27  ;;  %v730_v38 = vadd.f32 %v3193_v61, %v714_v12  ;;  %v904_v22 = vrot.slane %v895_v34, %v2990_v28  ;;  %v908_v39 = vrot.slane %v896_v56, %v2990_v28  ;;  %v4552_v4 = vld [vmem:[#allocation30_spill] sm:$0xff] }
 0x1b0   : > { %v845_v7 = vadd.f32 %v843_v5, %v823_v23  ;;  %v846_v41 = vadd.f32 %v844_v62, %v824_v40  ;;  %v887_v9 = vmul.f32 %v882_v16, %v4551_v55  ;;  %v888_v24 = vmul.f32 %v886_v42, %v4551_v55  ;;  %v4554_v5 = vld [vmem:[#allocation38_spill] sm:$0xff]  ;;  %v4558_v55 = vld [vmem:[#allocation43_spill] sm:$0xff] }
 0x1b1   : > { %v926_v60 = vrot.slane %v917_v1, %v2990_v28  ;;  %v930_v33 = vrot.slane %v918_v17, %v2990_v28  ;;  %v939_v52 = vsel %vm786_vm9, %v3156_v10, %v3190_v51  ;;  %v940_v58 = vsel %vm786_vm9, %v3190_v51, %v3156_v10 }
 0x1b2   : > { %v960_v44 = vpop.permute.xlu1 %959  ;;  %v731_v61 = vadd.f32 %v3203_v19, %v715_v43  ;;  %v744_v42 = vmul.f32 %v739_v48, %v4552_v4  ;;  %v867_v27 = vadd.f32 %v865_v47, %v845_v7  ;;  %v868_v12 = vadd.f32 %v866_v35, %v846_v41 }
 0x1b3   : > { %v909_v2 = vmul.f32 %v904_v22, %v4553_v63  ;;  %v910_v6 = vmul.f32 %v908_v39, %v4553_v63  ;;  %v961_v50 = vsel %vm786_vm9, %v3223_v59, %v960_v44  ;;  %v962_v10 = vsel %vm786_vm9, %v960_v44, %v3223_v59  ;;  %v4555_v44 = vld [vmem:[#allocation32_spill] sm:$0xff] }
 0x1b4   : > { %v889_v51 = vadd.f32 %v887_v9, %v867_v27  ;;  %v890_v19 = vadd.f32 %v888_v24, %v868_v12  ;;  %v948_v37 = vrot.slane %v939_v52, %v2990_v28  ;;  %v952_v48 = vrot.slane %v940_v58, %v2990_v28 }
 0x1b5   : > { %v931_v62 = vmul.f32 %v926_v60, %v4554_v5  ;;  %v932_v16 = vmul.f32 %v930_v33, %v4554_v5  ;;  %v745_v59 = vmul.f32 %v743_v11, %v4552_v4  ;;  %v760_v43 = vmul.f32 %v755_v46, %v4555_v44 }
 0x1b6   : > { %v980_v45 = vpop.permute.xlu1 %979  ;;  %v970_v23 = vrot.slane %v961_v50, %v2990_v28  ;;  %v974_v40 = vrot.slane %v962_v10, %v2990_v28  ;;  %v911_v47 = vadd.f32 %v909_v2, %v889_v51  ;;  %v912_v35 = vadd.f32 %v910_v6, %v890_v19 }
 0x1b7   : > { %v953_v11 = vmul.f32 %v948_v37, %v4556_v32  ;;  %v954_v17 = vmul.f32 %v952_v48, %v4556_v32  ;;  %v4557_v22 = vrot.slane %v2804_v15, %v2990_v28  ;;  %v595_v4 = vadd.f32 %v3246_v18, %v573_v57 }
 0x1b8   : > { %v933_v7 = vadd.f32 %v931_v62, %v911_v47  ;;  %v934_v41 = vadd.f32 %v932_v16, %v912_v35  ;;  %v975_v9 = vmul.f32 %v970_v23, %v4558_v55  ;;  %v976_v24 = vmul.f32 %v974_v40, %v4558_v55 }
 0x1b9   : > { %v761_v39 = vmul.f32 %v4557_v22, %v4555_v44  ;;  %v747_v15 = vadd.f32 %v745_v59, %v731_v61  ;;  %v4561_v6 = vrot.slane %v3199_v13, %v2990_v28  ;;  %v618_v10 = vmul.f32 %v616_v31, %v3167_v26 }
 0x1ba   : > { %v982_v36 = vpop.permute.xlu1 %981  ;;  %v955_v27 = vadd.f32 %v953_v11, %v933_v7  ;;  %v956_v12 = vadd.f32 %v954_v17, %v934_v41  ;;  %v4566_v22 = vmov 15   ;;  %v4568_v7 = vmov 16  }
 0x1bb   : > { %v983_v34 = vsel %vm786_vm9, %v980_v45, %v982_v36  ;;  %v984_v56 = vsel %vm786_vm9, %v982_v36, %v980_v45  ;;  %v746_v36 = vadd.f32 %v744_v42, %v730_v38  ;;  %v4559_v38 = vrot.slane %v4520_v49, %v2990_v28  ;;  %v4562_v49 = vld [vmem:[#allocation6_spill] sm:$0xff] }
 0x1bc   : > { %v992_v30 = vrot.slane %v983_v34, %v2990_v28  ;;  %v996_v46 = vrot.slane %v984_v56, %v2990_v28  ;;  %v615_v50 = vmul.f32 %v4561_v6, %v4533_v8  ;;  %v763_v51 = vadd.f32 %v761_v39, %v747_v15  ;;  %v4563_v34 = vld [vmem:[#allocation13_spill] sm:$0xff] }
 0x1bd   : > { %v777_v58 = vmul.f32 %v4559_v38, %v4530_v29  ;;  %v762_v42 = vadd.f32 %v760_v43, %v746_v36  ;;  %vm214_vm10 = vcmp.lt.s32.totalorder %v4562_v49, 240  ;;  %v977_v29 = vadd.f32 %v975_v9, %v955_v27 }
 0x1be   : > { %v1002_v0 = vpop.permute.xlu1 %1001  ;;  %v978_v18 = vadd.f32 %v976_v24, %v956_v12  ;;  %v617_v37 = vadd.f32 %v615_v50, %v595_v4  ;;  %v620_v56 = vadd.f32 %v618_v10, %v4563_v34  ;;  %v3394_v23 = vsel %vm214_vm10, 1.0, %v4523_v54  ;;  %v4564_v54 = vld [vmem:[#allocation12_spill] sm:$0xff] }
 0x1bf   : > { %v778_v48 = vadd.f32 %v3206_v3, %v762_v42  ;;  %v779_v59 = vadd.f32 %v777_v58, %v763_v51  ;;  %v4567_v39 = vmov 7   ;;  %v4569_v41 = vmov 8  }
 0x1c0   : > { %v621_v40 = vadd.f32 %v617_v37, %v4563_v34  ;;  %v4570_v55 = vmov 17   ;;  %v4571_v9 = vmov 5   ;;  %v4572_v24 = vmov 36  }
 0x1c1   : > { %v4575_v38 = vmov 9   ;;  %v4576_v58 = vmov 12   ;;  %v4577_v4 = vmov 30   ;;  %v4578_v15 = vmov 18  }
 0x1c2   : > { %v1004_v21 = vpop.permute.xlu1 %1003  ;;  %v4579_v42 = vmov 4   ;;  %v4580_v27 = vmov 27   ;;  %v4581_v12 = vmov 22   ;;  %v4585_v6 = vmov 14  }
 0x1c3   : > { %v1005_v45 = vsel %vm786_vm9, %v1002_v0, %v1004_v21  ;;  %v1006_v1 = vsel %vm786_vm9, %v1004_v21, %v1002_v0  ;;  %v4560_v0 = vld [vmem:[#allocation47_spill] sm:$0xff]  ;;  %v780_v21 = vadd.f32 %v778_v48, %v620_v56  ;;  %v4586_v50 = vmov 23  }
 0x1c4   : > { %v1014_v60 = vrot.slane %v1005_v45, %v2990_v28  ;;  %v1018_v33 = vrot.slane %v1006_v1, %v2990_v28  ;;  %v997_v63 = vmul.f32 %v992_v30, %v4560_v0  ;;  %v998_v2 = vmul.f32 %v996_v46, %v4560_v0 }
 0x1c5   : > { %v781_v45 = vadd.f32 %v779_v59, %v621_v40  ;;  %v4565_v46 = vmov 6   ;;  %v4582_v0 = vmov 1   ;;  %v4587_v10 = vmov 19   ;;  %v4593_v59 = vld [vmem:[#allocation7_spill] sm:$0xff] }
 0x1c6   : > { %v1024_v52 = vpop.permute.xlu1 %1023  ;;  %v1019_v57 = vmul.f32 %v1014_v60, %v3024_v53  ;;  %v1020_v61 = vmul.f32 %v1018_v33, %v3024_v53  ;;  %v999_v8 = vadd.f32 %v997_v63, %v977_v29  ;;  %v1000_v31 = vadd.f32 %v998_v2, %v978_v18  ;;  %v3455_v60 = vld [vmem:[%s4359_s2 + $0x10] sm:$0xff] }
 0x1c7   : > { %v4573_v33 = vmov 3   ;;  %v4583_v63 = vmov 31   ;;  %v4584_v2 = vmov 10   ;;  %v4588_v49 = vmov 28  }
 0x1c8   : > { %v1021_v53 = vadd.f32 %v1019_v57, %v999_v8  ;;  %v1022_v44 = vadd.f32 %v1020_v61, %v1000_v31  ;;  %v4589_v18 = vmov 2   ;;  %v3501_v57 = vpop.permute.xlu0 %1169  ;;  %v4592_v31 = vmov 29  }
 0x1ca   : > { %v1026_v19 = vpop.permute.xlu1 %1025 }
 0x1cb   : > { %v1027_v5 = vsel %vm786_vm9, %v1024_v52, %v1026_v19  ;;  %v1028_v13 = vsel %vm786_vm9, %v1026_v19, %v1024_v52  ;;  %v4574_v52 = vmov 0   ;;  %v4590_v19 = vmov 11  }
 0x1cc   : > { %v1036_v62 = vrot.slane %v1027_v5, %v2990_v28  ;;  %v1040_v16 = vrot.slane %v1028_v13, %v2990_v28  ;;  %v1196_v37 = vpop.permute.xlu0 %1195  ;;  %v4591_v5 = vmov 20  }
 0x1ce   : > { %v1041_v43 = vmul.f32 %v1036_v62, %v3064_v14  ;;  %v1042_v3 = vmul.f32 %v1040_v16, %v3064_v14  ;;  %v1182_v51 = vpop.permute.xlu1 %1181 }
 0x1d0   : > { %v1043_v47 = vadd.f32 %v1041_v43, %v1021_v53  ;;  %v1044_v35 = vadd.f32 %v1042_v3, %v1022_v44  ;;  %v4594_v44 = vmov 21   ;;  %v4595_v43 = vld [vmem:[#allocation8_spill] sm:$0xff] }
 0x1d2   : > { %v1046_v1 = vmul.f32 %v1044_v35, %v3394_v23  ;;  %v1047_v32 = vadd.f32 %v1043_v47, %v780_v21 }
 0x1d3   : > { %v1188_v29 = vpop.permute.xlu1 %1187 }
 0x1d4   : > { %v1048_v11 = vadd.f32 %v1046_v1, %v781_v45  ;;  %v3398_v17 = vmax.f32 %v1047_v32, 0.0 }
 0x1d6   : > { %v3400_v30 = vmax.f32 %v1048_v11, 0.0  ;;  %1059 = vrot.lane.b32.xlu0 %v3398_v17, %s2423_s22  ;;  %v3407_v14 = vrot.slane %v3398_v17, 1  ;;  %v1198_v32 = vmul.f32 %v1196_v37, %v3398_v17 }
 0x1d8   : > { %1053 = vrot.lane.b32.xlu1 %v3400_v30, %s2422_s21  ;;  %v3422_v36 = vrot.slane %v3400_v30, 1 }
 0x1da   : > { %1073 = vrot.lane.b32.xlu0 %v3407_v14, %s2422_s21 }
 0x1dc   : > { %1061 = vrot.lane.b32.xlu1 %v3400_v30, %s2423_s22 }
 0x1de   : > { %1081 = vrot.lane.b32.xlu0 %v3407_v14, %s2423_s22 }
 0x1e0   : > { %1122 = vrot.lane.b32.xlu1 %v3400_v30, %s2424_s25 }
 0x1e2   : > { %1219 = vperm.xlu0 %2356, %v4564_v54  }
 0x1e4   : > { %1051 = vrot.lane.b32.xlu1 %v3398_v17, %s2422_s21 }
 0x1e6   : > { %2357 = vset.pattern.permute.xlu0 %v4565_v46 }
 0x1e7   : > { %1235 = vperm.xlu0 %2357, %v4564_v54  }
 0x1e8   : > { %1075 = vrot.lane.b32.xlu1 %v3422_v36, %s2422_s21 }
 0x1eb   : > { %2358 = vset.pattern.permute.xlu0 %v4566_v22 }
 0x1ec   : > { %1083 = vrot.lane.b32.xlu1 %v3422_v36, %s2423_s22  ;;  %1247 = vperm.xlu0 %2358, %v4564_v54  }
 0x1f0   : > { %1120 = vrot.lane.b32.xlu1 %v3398_v17, %s2424_s25  ;;  %2359 = vset.pattern.permute.xlu0 %v4567_v39 }
 0x1f1   : > { %1261 = vperm.xlu0 %2359, %v4564_v54  }
 0x1f4   : > { %1136 = vrot.lane.b32.xlu1 %v3422_v36, %s2424_s25 }
 0x1f5   : > { %2360 = vset.pattern.permute.xlu0 %v4568_v7 }
 0x1f6   : > { %1275 = vperm.xlu0 %2360, %v4564_v54  }
 0x1f8   : > { %1134 = vrot.lane.b32.xlu1 %v3407_v14, %s2424_s25 }
 0x1fa   : > { %2361 = vset.pattern.permute.xlu0 %v4569_v41 }
 0x1fb   : > { %1289 = vperm.xlu0 %2361, %v4564_v54  }
 0x1fc   : > { %1203 = vperm.xlu1 %2354, %v4564_v54  }
 0x1ff   : > { %2362 = vset.pattern.permute.xlu0 %v4570_v55 }
 0x200   : > { %2355 = vset.pattern.permute.xlu1 %v4571_v9  ;;  %1303 = vperm.xlu0 %2362, %v4564_v54  }
 0x201   : > { %1211 = vperm.xlu1 %2355, %v4564_v54  }
 0x204   : > { %2363 = vset.pattern.permute.xlu0 %v4572_v24 }
 0x205   : > { %1254 = vrot.lane.b32.xlu1 %v3398_v17, %s2461_s28  ;;  %1091 = vperm.xlu0 %2363, %v4564_v54  }
 0x206   : > { %2376 = vset.pattern.permute.xlu1 %v4573_v33 }
 0x209   : > { %1256 = vrot.lane.b32.xlu1 %v3400_v30, %s2461_s28  ;;  %1450 = vperm.xlu0 %2363, %v3455_v60  }
 0x20d   : > { %1268 = vrot.lane.b32.xlu1 %v3407_v14, %s2461_s28  ;;  %2364 = vset.pattern.permute.xlu0 %v4574_v52 }
 0x20e   : > { %1101 = vperm.xlu0 %2364, %v4564_v54  }
 0x211   : > { %1270 = vrot.lane.b32.xlu1 %v3422_v36, %s2461_s28 }
 0x212   : > { %1460 = vperm.xlu0 %2364, %v3455_v60  }
 0x215   : > { %1720 = vperm.xlu1 %2376, %v3455_v60  }
 0x216   : > { %2365 = vset.pattern.permute.xlu0 %v4575_v38 }
 0x217   : > { %1113 = vperm.xlu0 %2365, %v4564_v54  }
 0x219   : > { %2377 = vset.pattern.permute.xlu1 %v4576_v58  ;;  %v4596_v58 = vmov 13  }
 0x21a   : > { %1734 = vperm.xlu1 %2377, %v3455_v60  }
 0x21b   : > { %1480 = vperm.xlu0 %2365, %v3455_v60  }
 0x21e   : > { %2379 = vset.pattern.permute.xlu1 %v4577_v4  ;;  %v1199_v4 = vmul.f32 %v1196_v37, %v3400_v30  ;;  %v4600_v37 = vmov 33  }
 0x21f   : > { %2366 = vset.pattern.permute.xlu0 %v4578_v15  ;;  %1766 = vperm.xlu1 %2379, %v3455_v60   ;;  %v4597_v15 = vld [vmem:[#allocation9_spill] sm:$0xff] }
 0x220   : > { %1502 = vperm.xlu0 %2366, %v3455_v60  }
 0x223   : > { %2380 = vset.pattern.permute.xlu1 %v4579_v42 }
 0x224   : > { %2367 = vset.pattern.permute.xlu0 %v4580_v27  ;;  %1782 = vperm.xlu1 %2380, %v3455_v60  }
 0x225   : > { %1524 = vperm.xlu0 %2367, %v3455_v60  }
 0x228   : > { %2382 = vset.pattern.permute.xlu1 %v4581_v12 }
 0x229   : > { %2368 = vset.pattern.permute.xlu0 %v4582_v0  ;;  %1814 = vperm.xlu1 %2382, %v3455_v60   ;;  %v4598_v0 = vld [vmem:[#allocation10_spill] sm:$0xff] }
 0x22a   : > { %1127 = vperm.xlu0 %2368, %v4564_v54  }
 0x22d   : > { %2383 = vset.pattern.permute.xlu1 %v4583_v63 }
 0x22e   : > { %1546 = vperm.xlu0 %2368, %v3455_v60   ;;  %1830 = vperm.xlu1 %2383, %v3455_v60  }
 0x232   : > { %2369 = vset.pattern.permute.xlu0 %v4584_v2  ;;  %2385 = vset.pattern.permute.xlu1 %v4585_v6 }
 0x233   : > { %1141 = vperm.xlu0 %2369, %v4564_v54   ;;  %1862 = vperm.xlu1 %2385, %v3455_v60  }
 0x237   : > { %1568 = vperm.xlu0 %2369, %v3455_v60   ;;  %2386 = vset.pattern.permute.xlu1 %v4586_v50 }
 0x23b   : > { %2370 = vset.pattern.permute.xlu0 %v4587_v10 }
 0x23c   : > { %1590 = vperm.xlu0 %2370, %v3455_v60  }
 0x240   : > { %2371 = vset.pattern.permute.xlu0 %v4588_v49 }
 0x241   : > { %1612 = vperm.xlu0 %2371, %v3455_v60  }
 0x245   : > { %2372 = vset.pattern.permute.xlu0 %v4589_v18 }
 0x246   : > { %1634 = vperm.xlu0 %2372, %v3455_v60  }
 0x248   : > { %v1060_v13 = vpop.permute.xlu0 %1059 }
 0x24a   : > { %v1054_v61 = vpop.permute.xlu1 %1053  ;;  %2373 = vset.pattern.permute.xlu0 %v4590_v19 }
 0x24b   : > { %1656 = vperm.xlu0 %2373, %v3455_v60  }
 0x24c   : > { %v1074_v16 = vpop.permute.xlu0 %1073 }
 0x24e   : > { %v1062_v48 = vpop.permute.xlu1 %1061 }
 0x24f   : > { %2374 = vset.pattern.permute.xlu0 %v4591_v5  ;;  %v1063_v35 = vsel %vm297_vm4, %v1060_v13, %v1062_v48  ;;  %v1064_v50 = vsel %vm297_vm4, %v1062_v48, %v1060_v13 }
 0x250   : > { %1678 = vperm.xlu0 %2374, %v3455_v60   ;;  %v1082_v11 = vpop.permute.xlu0 %1081  ;;  %v1065_v42 = vmul.f32 %v1063_v35, %v4597_v15  ;;  %v1066_v18 = vmul.f32 %v1064_v50, %v4598_v0 }
 0x252   : > { %v3507_v8 = vpop.permute.xlu1 %1122 }
 0x254   : > { %2375 = vset.pattern.permute.xlu0 %v4592_v31 }
 0x255   : > { %1700 = vperm.xlu0 %2375, %v3455_v60  }
 0x256   : > { %v1052_v62 = vpop.permute.xlu1 %1051 }
 0x257   : > { %v1055_v34 = vsel %vm288_vm2, %v1052_v62, %v1054_v61  ;;  %v1056_v56 = vsel %vm288_vm2, %v1054_v61, %v1052_v62  ;;  %v4599_v61 = vmov 32  }
 0x258   : > { %v1057_v53 = vmul.f32 %v1056_v56, %v4593_v59  ;;  %v1058_v3 = vmul.f32 %v1055_v34, %v4595_v43 }
 0x259   : > { %2378 = vset.pattern.permute.xlu0 %v4594_v44 }
 0x25a   : > { %v1076_v40 = vpop.permute.xlu1 %1075  ;;  %1094 = vrot.lane.b32.xlu1 %v1057_v53, %s2424_s25  ;;  %1750 = vperm.xlu0 %2378, %v3455_v60   ;;  %v1184_v54 = vmul.f32 %v1182_v51, %v1057_v53  ;;  %v1185_v24 = vmul.f32 %v1182_v51, %v1058_v3 }
 0x25b   : > { %v1077_v21 = vsel %vm288_vm2, %v1074_v16, %v1076_v40  ;;  %v1078_v47 = vsel %vm288_vm2, %v1076_v40, %v1074_v16 }
 0x25c   : > { %v1079_v45 = vmul.f32 %v1078_v47, %v4593_v59  ;;  %v1080_v1 = vmul.f32 %v1077_v21, %v4595_v43 }
 0x25e   : > { %v1190_v33 = vmul.f32 %v1188_v29, %v1079_v45  ;;  %v1191_v52 = vmul.f32 %v1188_v29, %v1080_v1  ;;  %v1084_v38 = vpop.permute.xlu1 %1083  ;;  %1096 = vrot.lane.b32.xlu1 %v1058_v3, %s2424_s25  ;;  %2381 = vset.pattern.permute.xlu0 %v4596_v58 }
 0x25f   : > { %v1085_v27 = vsel %vm297_vm4, %v1082_v11, %v1084_v38  ;;  %v1086_v17 = vsel %vm297_vm4, %v1084_v38, %v1082_v11  ;;  %1798 = vperm.xlu0 %2381, %v3455_v60   ;;  %v4601_v11 = vmov 24  }
 0x260   : > { %v1087_v12 = vmul.f32 %v1085_v27, %v4597_v15  ;;  %v1088_v63 = vmul.f32 %v1086_v17, %v4598_v0  ;;  %v1192_v2 = vadd.f32 %v1190_v33, %v1184_v54  ;;  %v1193_v6 = vadd.f32 %v1191_v52, %v1185_v24 }
 0x261   : > { %v1220_v30 = vpop.permute.xlu0 %1219 }
 0x262   : > { %v1222_v10 = vmul.f32 %v1220_v30, %v1087_v12  ;;  %v1223_v51 = vmul.f32 %v1220_v30, %v1088_v63  ;;  %1148 = vrot.lane.b32.xlu1 %v1065_v42, %s2424_s25  ;;  %v1200_v49 = vadd.f32 %v1198_v32, %v1192_v2  ;;  %v1201_v29 = vadd.f32 %v1199_v4, %v1193_v6  ;;  %v3550_v19 = vpop.permute.xlu1 %1120 }
 0x263   : > { %2384 = vset.pattern.permute.xlu0 %v4571_v9 }
 0x264   : > { %1846 = vperm.xlu0 %2384, %v3455_v60  }
 0x266   : > { %1150 = vrot.lane.b32.xlu1 %v1066_v18, %s2424_s25  ;;  %v3555_v9 = vpop.permute.xlu1 %1136  ;;  %v3579_v21 = vpop.permute.xlu0 %1235 }
 0x268   : > { %2387 = vset.pattern.permute.xlu0 %v4599_v61 }
 0x269   : > { %1894 = vperm.xlu0 %2387, %v3455_v60  }
 0x26a   : > { %1228 = vrot.lane.b32.xlu1 %v1057_v53, %s2461_s28  ;;  %v3560_v48 = vpop.permute.xlu1 %1134 }
 0x26b   : > { %v3584_v35 = vpop.permute.xlu0 %1247 }
 0x26d   : > { %2389 = vset.pattern.permute.xlu0 %v4566_v22 }
 0x26e   : > { %1230 = vrot.lane.b32.xlu1 %v1058_v3, %s2461_s28  ;;  %1938 = vperm.xlu0 %2389, %v3455_v60  }
 0x272   : > { %1282 = vrot.lane.b32.xlu1 %v1065_v42, %s2461_s28  ;;  %2391 = vset.pattern.permute.xlu0 %v4600_v37 }
 0x276   : > { %1284 = vrot.lane.b32.xlu1 %v1066_v18, %s2461_s28 }
 0x27a   : > { %1106 = vrot.lane.b32.xlu1 %v1079_v45, %s2424_s25 }
 0x27b   : > { %v1204_v5 = vpop.permute.xlu1 %1203 }
 0x27c   : > { %v1206_v13 = vmul.f32 %v1204_v5, %v3407_v14  ;;  %v1207_v22 = vmul.f32 %v1204_v5, %v3422_v36 }
 0x27e   : > { %1108 = vrot.lane.b32.xlu1 %v1080_v1, %s2424_s25  ;;  %v1208_v62 = vadd.f32 %v1206_v13, %v1200_v49  ;;  %v1209_v16 = vadd.f32 %v1207_v22, %v1201_v29 }
 0x280   : > { %v1212_v31 = vpop.permute.xlu1 %1211 }
 0x281   : > { %v1214_v34 = vmul.f32 %v1212_v31, %v1065_v42  ;;  %v1215_v56 = vmul.f32 %v1212_v31, %v1066_v18 }
 0x282   : > { %1162 = vrot.lane.b32.xlu1 %v1087_v12, %s2424_s25 }
 0x283   : > { %v1216_v53 = vadd.f32 %v1214_v34, %v1208_v62  ;;  %v1217_v44 = vadd.f32 %v1215_v56, %v1209_v16 }
 0x284   : > { %v3573_v14 = vpop.permute.xlu1 %1254 }
 0x285   : > { %v3567_v3 = vadd.f32 %v1222_v10, %v1216_v53  ;;  %v3569_v40 = vadd.f32 %v1223_v51, %v1217_v44 }
 0x286   : > { %1164 = vrot.lane.b32.xlu1 %v1088_v63, %s2424_s25 }
 0x288   : > { %v3576_v36 = vpop.permute.xlu1 %1256 }
 0x28a   : > { %1240 = vrot.lane.b32.xlu1 %v1079_v45, %s2461_s28  ;;  %v3590_v45 = vpop.permute.xlu0 %1261 }
 0x28c   : > { %v3582_v47 = vpop.permute.xlu1 %1268 }
 0x28e   : > { %1242 = vrot.lane.b32.xlu1 %v1080_v1, %s2461_s28  ;;  %v3597_v54 = vpop.permute.xlu0 %1275 }
 0x290   : > { %v3587_v32 = vpop.permute.xlu1 %1270 }
 0x292   : > { %1296 = vrot.lane.b32.xlu1 %v1087_v12, %s2461_s28  ;;  %v3601_v33 = vpop.permute.xlu0 %1289 }
 0x294   : > { %v3593_v1 = vpop.permute.xlu1 %1720 }
 0x296   : > { %1298 = vrot.lane.b32.xlu1 %v1088_v63, %s2461_s28  ;;  %v3605_v38 = vpop.permute.xlu0 %1303 }
 0x299   : > { %v3599_v24 = vpop.permute.xlu1 %1734 }
 0x29a   : > { %1878 = vperm.xlu1 %2386, %v3455_v60   ;;  %v3609_v58 = vpop.permute.xlu0 %1091 }
 0x29e   : > { %2388 = vset.pattern.permute.xlu1 %v4565_v46  ;;  %v3603_v52 = vpop.permute.xlu1 %1766  ;;  %v3613_v42 = vpop.permute.xlu0 %1450 }
 0x29f   : > { %1918 = vperm.xlu1 %2388, %v3455_v60   ;;  %4602 = vst [vmem:[#allocation11_spill] sm:$0xff] %v3613_v42 }
 0x2a2   : > { %v1102_v17 = vpop.permute.xlu0 %1101 }
 0x2a3   : > { %2390 = vset.pattern.permute.xlu1 %v4601_v11  ;;  %v3607_v46 = vpop.permute.xlu1 %1782 }
 0x2a4   : > { %1960 = vperm.xlu1 %2390, %v3455_v60  }
 0x2a6   : > { %v3619_v63 = vpop.permute.xlu0 %1460 }
 0x2a7   : > { %4604 = vst [vmem:[#allocation15_spill] sm:$0xff] %v3619_v63 }
 0x2a8   : > { %v3611_v4 = vpop.permute.xlu1 %1814 }
 0x2aa   : > { %v1114_v6 = vpop.permute.xlu0 %1113 }
 0x2ad   : > { %v3615_v27 = vpop.permute.xlu1 %1830 }
 0x2ae   : > { %v3621_v10 = vpop.permute.xlu0 %1480 }
 0x2af   : > { %4605 = vst [vmem:[#allocation18_spill] sm:$0xff] %v3621_v10 }
 0x2b2   : > { %v3617_v12 = vpop.permute.xlu1 %1862  ;;  %v3623_v49 = vpop.permute.xlu0 %1502 }
 0x2b3   : > { %4603 = vst [vmem:[#allocation14_spill] sm:$0xff] %v3617_v12  ;;  %4606 = vst [vmem:[#allocation16_spill] sm:$0xff] %v3623_v49 }
 0x2b6   : > { %v3625_v61 = vpop.permute.xlu0 %1524 }
 0x2b7   : > { %4607 = vst [vmem:[#allocation17_spill] sm:$0xff] %v3625_v61 }
 0x2ba   : > { %v1128_v5 = vpop.permute.xlu0 %1127 }
 0x2be   : > { %v3629_v31 = vpop.permute.xlu0 %1546 }
 0x2bf   : > { %4608 = vst [vmem:[#allocation25_spill] sm:$0xff] %v3629_v31  ;;  %v1125_v31 = vsel %vm359_vm7, %v3507_v8, %v3550_v19 }
 0x2c0   : > { %v1130_v10 = vmul.f32 %v1128_v5, %v1125_v31 }
 0x2c2   : > { %v1142_v61 = vpop.permute.xlu0 %1141 }
 0x2cc   : > { %v1095_v2 = vpop.permute.xlu1 %1094 }
 0x2d0   : > { %v1097_v50 = vpop.permute.xlu1 %1096 }
 0x2d1   : > { %v1099_v62 = vsel %vm359_vm7, %v1097_v50, %v1095_v2  ;;  %v1098_v16 = vsel %vm359_vm7, %v1095_v2, %v1097_v50  ;;  %v1139_v50 = vsel %vm359_vm7, %v3555_v9, %v3560_v48 }
 0x2d2   : > { %v1104_v44 = vmul.f32 %v1102_v17, %v1099_v62  ;;  %v1105_v49 = vmul.f32 %v1102_v17, %v1098_v16 }
 0x2d4   : > { %v1149_v30 = vpop.permute.xlu1 %1148 }
 0x2d8   : > { %v1151_v51 = vpop.permute.xlu1 %1150 }
 0x2d9   : > { %v1153_v17 = vsel %vm359_vm7, %v1151_v51, %v1149_v30 }
 0x2dc   : > { %v1229_v29 = vpop.permute.xlu1 %1228 }
 0x2e0   : > { %v1231_v18 = vpop.permute.xlu1 %1230 }
 0x2e4   : > { %v3627_v37 = vpop.permute.xlu1 %1282 }
 0x2e8   : > { %v1285_v13 = vpop.permute.xlu1 %1284 }
 0x2ec   : > { %v1107_v22 = vpop.permute.xlu1 %1106 }
 0x2f0   : > { %v1109_v34 = vpop.permute.xlu1 %1108 }
 0x2f1   : > { %v1110_v56 = vsel %vm359_vm7, %v1107_v22, %v1109_v34  ;;  %v1111_v53 = vsel %vm359_vm7, %v1109_v34, %v1107_v22  ;;  %v1144_v22 = vmul.f32 %v1142_v61, %v1139_v50  ;;  %v1232_v50 = vsel %vm786_vm9, %v1229_v29, %v1231_v18 }
 0x2f2   : > { %v1116_v11 = vmul.f32 %v1114_v6, %v1111_v53  ;;  %v1117_v42 = vmul.f32 %v1114_v6, %v1110_v56  ;;  %v1124_v6 = vsel %vm359_vm7, %v3550_v19, %v3507_v8  ;;  %v1152_v19 = vsel %vm359_vm7, %v1149_v30, %v1151_v51 }
 0x2f3   : > { %v1131_v34 = vmul.f32 %v1128_v5, %v1124_v6  ;;  %v1259_v30 = vsel %vm786_vm9, %v3576_v36, %v3573_v14 }
 0x2f4   : > { %v1118_v63 = vadd.f32 %v1116_v11, %v1104_v44  ;;  %v1163_v2 = vpop.permute.xlu1 %1162  ;;  %v1119_v12 = vadd.f32 %v1117_v42, %v1105_v49  ;;  %v1138_v42 = vsel %vm359_vm7, %v3560_v48, %v3555_v9  ;;  %v1158_v49 = vmul.f32 %v3131_v20, %v1153_v17 }
 0x2f5   : > { %v1145_v8 = vmul.f32 %v1142_v61, %v1138_v42  ;;  %v1159_v11 = vmul.f32 %v3131_v20, %v1152_v19  ;;  %v1233_v9 = vsel %vm786_vm9, %v1231_v18, %v1229_v29  ;;  %v1258_v48 = vsel %vm786_vm9, %v3573_v14, %v3576_v36 }
 0x2f6   : > { %v1132_v62 = vadd.f32 %v1130_v10, %v1118_v63  ;;  %v1133_v56 = vadd.f32 %v1131_v34, %v1119_v12  ;;  %v1238_v18 = vmul.f32 %v3579_v21, %v1232_v50  ;;  %v1264_v14 = vmul.f32 %v3590_v45, %v1258_v48 }
 0x2f7   : > { %v1265_v36 = vmul.f32 %v3590_v45, %v1259_v30  ;;  %v1273_v17 = vsel %vm786_vm9, %v3587_v32, %v3582_v47  ;;  %v1287_v45 = vsel %vm786_vm9, %v1285_v13, %v3627_v37 }
 0x2f8   : > { %v1165_v31 = vpop.permute.xlu1 %1164  ;;  %v1146_v16 = vadd.f32 %v1144_v22, %v1132_v62  ;;  %v1147_v44 = vadd.f32 %v1145_v8, %v1133_v56  ;;  %v1239_v22 = vmul.f32 %v3579_v21, %v1233_v9  ;;  %v1286_v21 = vsel %vm786_vm9, %v3627_v37, %v1285_v13 }
 0x2f9   : > { %v1167_v53 = vsel %vm359_vm7, %v1165_v31, %v1163_v2  ;;  %v1166_v12 = vsel %vm359_vm7, %v1163_v2, %v1165_v31  ;;  %v1293_v19 = vmul.f32 %v3601_v33, %v1287_v45 }
 0x2fa   : > { %v1160_v63 = vadd.f32 %v1158_v49, %v1146_v16  ;;  %v1172_v10 = vmul.f32 %v3501_v57, %v1167_v53  ;;  %v1161_v2 = vadd.f32 %v1159_v11, %v1147_v44  ;;  %v1173_v20 = vmul.f32 %v3501_v57, %v1166_v12  ;;  %v3710_v11 = vpop.permute.xlu0 %1568 }
 0x2fb   : > { %v1272_v57 = vsel %vm786_vm9, %v3582_v47, %v3587_v32  ;;  %v1279_v49 = vmul.f32 %v3597_v54, %v1273_v17  ;;  %v1292_v32 = vmul.f32 %v3601_v33, %v1286_v21  ;;  %v2410_v21 = vld [vmem:[%s2498_s17] sm:$0xff] }
 0x2fc   : > { %v1241_v5 = vpop.permute.xlu1 %1240  ;;  %v1174_v51 = vadd.f32 %v1172_v10, %v1160_v63  ;;  %v1175_v53 = vadd.f32 %v1173_v20, %v1161_v2  ;;  %v1278_v42 = vmul.f32 %v3597_v54, %v1272_v57 }
 0x2fe   : > { %v1179_v12 = vadd.f32 %v1175_v53, %v3609_v58 }
 0x300   : > { %v1243_v61 = vpop.permute.xlu1 %1242 }
 0x301   : > { %v1244_v6 = vsel %vm786_vm9, %v1241_v5, %v1243_v61  ;;  %v1245_v29 = vsel %vm786_vm9, %v1243_v61, %v1241_v5  ;;  %v3719_v61 = vpop.permute.xlu0 %1590 }
 0x302   : > { %v1250_v62 = vmul.f32 %v3584_v35, %v1244_v6  ;;  %v1251_v34 = vmul.f32 %v3584_v35, %v1245_v29  ;;  %v1176_v35 = vmul.f32 %v1174_v51, %v3167_v26 }
 0x304   : > { %v1252_v31 = vadd.f32 %v1250_v62, %v1238_v18  ;;  %v1253_v16 = vadd.f32 %v1251_v34, %v1239_v22  ;;  %v1297_v56 = vpop.permute.xlu1 %1296  ;;  %v1178_v63 = vadd.f32 %v1176_v35, %v3609_v58  ;;  %v1227_v58 = vadd.f32 %v3569_v40, %v1179_v12  ;;  %v2411_v35 = vld [vmem:[%s2503_s20] sm:$0xff] }
 0x305   : > { %v3723_v62 = vpop.permute.xlu0 %1612 }
 0x306   : > { %v1266_v8 = vadd.f32 %v1264_v14, %v1252_v31  ;;  %v1267_v47 = vadd.f32 %v1265_v36, %v1253_v16  ;;  %v1226_v48 = vadd.f32 %v3567_v3, %v1178_v63  ;;  %v1324_v31 = vsub.f32 %v2410_v21, %v2411_v35  ;;  %v4609_v63 = vld [vmem:[#allocation44_spill] sm:$0xff] }
 0x308   : > { %v1299_v10 = vpop.permute.xlu1 %1298  ;;  %v1280_v5 = vadd.f32 %v1278_v42, %v1266_v8  ;;  %v1281_v44 = vadd.f32 %v1279_v49, %v1267_v47  ;;  %v1334_v45 = vcombine.high %v1324_v31, %v1324_v31 }
 0x309   : > { %v1300_v37 = vsel %vm786_vm9, %v1297_v56, %v1299_v10  ;;  %v1301_v54 = vsel %vm786_vm9, %v1299_v10, %v1297_v56  ;;  %v3725_v3 = vpop.permute.xlu0 %1634  ;;  %v1372_v10 = vsub.s32 1, %v4609_v63 }
 0x30a   : > { %v1294_v13 = vadd.f32 %v1292_v32, %v1280_v5  ;;  %v1295_v50 = vadd.f32 %v1293_v19, %v1281_v44  ;;  %v1306_v9 = vmul.f32 %v3605_v38, %v1300_v37  ;;  %v1307_v33 = vmul.f32 %v3605_v38, %v1301_v54 }
 0x30b   : > { %v1376_v5 = vsub.s32 5, %v4609_v63 }
 0x30c   : > { %v1308_v30 = vadd.f32 %v1306_v9, %v1294_v13  ;;  %v1309_v51 = vadd.f32 %v1307_v33, %v1295_v50  ;;  %v1350_v13 = vsub.s32 4, %v4609_v63 }
 0x30d   : > { %v3727_v36 = vpop.permute.xlu0 %1656 }
 0x30e   : > { %v1311_v2 = vmul.f32 %v1309_v51, %v3394_v23  ;;  %v1312_v20 = vadd.f32 %v1308_v30, %v1226_v48 }
 0x310   : > { %v1313_v6 = vadd.f32 %v1311_v2, %v1227_v58  ;;  %v1314_v29 = vsub.f32 0.0, %v1312_v20  ;;  %v3759_v58 = vsub.s32 2, %v4609_v63  ;;  %v3771_v20 = vsub.s32 3, %v4609_v63 }
 0x311   : > { %v3729_v17 = vpop.permute.xlu0 %1678 }
 0x312   : > { %v1315_v18 = vsub.f32 0.0, %v1313_v6  ;;  %v1316_v22 = vmul.f32 1.442695, %v1314_v29  ;;  %v1402_v6 = vsub.s32 6, %v4609_v63 }
 0x314   : > { %2402 = vpow2.f32 %v1316_v22  ;;  %v1318_v38 = vmul.f32 1.442695, %v1315_v18  ;;  %v1428_v22 = vsub.s32 7, %v4609_v63 }
 0x315   : > { %v3733_v56 = vpop.permute.xlu0 %1700 }
 0x316   : > { %2404 = vpow2.f32 %v1318_v38 }
 0x319   : > { %v3737_v32 = vpop.permute.xlu0 %1750 }
 0x31d   : > { %v1799_v50 = vpop.permute.xlu0 %1798 }
 0x31e   : > { %v2403_v34 = vpop.eup %2402 }
 0x31f   : > { %v1320_v14 = vadd.f32 1.0, %v2403_v34  ;;  %v4610_v34 = vmov 25  }
 0x320   : > { %v2405_v40 = vpop.eup %2404 }
 0x321   : > { %v1321_v57 = vadd.f32 1.0, %v2405_v40  ;;  %2406 = vrcp.f32 %v1320_v14 }
 0x323   : > { %2408 = vrcp.f32 %v1321_v57 }
 0x32b   : > { %v2407_v16 = vpop.eup %2406 }
 0x32c   : > { %v1328_v53 = vrot.slane %v2407_v16, %v2990_v28 }
 0x32d   : > { %v2409_v42 = vpop.eup %2408 }
 0x32e   : > { %v1332_v49 = vrot.slane %v2409_v42, %v2990_v28  ;;  %v1336_v8 = vmul.f32 %v1328_v53, %v1324_v31 }
 0x330   : > { %v1337_v47 = vmul.f32 %v1334_v45, %v1332_v49 }
 0x332   : > { %v1340_v19 = vcombine.low %v1336_v8, %v1337_v47 }
 0x334   : > { %v1342_v44 = vadd.f32 %v2411_v35, %v1340_v19 }
 0x336   : > { %v3742_v12 = vrot.slane %v1342_v44, %v2990_v28  ;;  %v1373_v37 = vrot.slane %v1342_v44, %v1372_v10  ;;  %v1377_v54 = vrot.slane %v1342_v44, %v1376_v5  ;;  %v3753_v51 = vrot.slane %v1342_v44, %v1350_v13 }
 0x337   : > { %v3765_v2 = vrot.slane %v1342_v44, %v3759_v58  ;;  %v3778_v29 = vrot.slane %v1342_v44, %v3771_v20  ;;  %v3780_v18 = vrot.slane %v1342_v44, %v1402_v6  ;;  %v3790_v38 = vrot.slane %v1342_v44, %v1428_v22 }
 0x338   : > { %1362 = vrot.lane.b32.xlu0 %v3742_v12, %s2423_s22  ;;  %1354 = vrot.lane.b32.xlu1 %v3742_v12, %s2422_s21  ;;  %v1804_v9 = vrot.slane %v1373_v37, %v1372_v10  ;;  %v1808_v33 = vrot.slane %v1377_v54, %v1372_v10 }
 0x33a   : > { %v3749_v48 = vmul.f32 %v1804_v9, %v1799_v50  ;;  %v3751_v30 = vmul.f32 %v1808_v33, %v1799_v50 }
 0x33c   : > { %1380 = vrot.lane.b32.xlu0 %v1373_v37, %s2422_s21  ;;  %1356 = vrot.lane.b32.xlu1 %v3753_v51, %s2422_s21 }
 0x340   : > { %1388 = vrot.lane.b32.xlu0 %v1373_v37, %s2423_s22  ;;  %1364 = vrot.lane.b32.xlu1 %v3753_v51, %s2423_s22 }
 0x344   : > { %1406 = vrot.lane.b32.xlu0 %v3765_v2, %s2422_s21  ;;  %1382 = vrot.lane.b32.xlu1 %v1377_v54, %s2422_s21 }
 0x348   : > { %1414 = vrot.lane.b32.xlu0 %v3765_v2, %s2423_s22  ;;  %1390 = vrot.lane.b32.xlu1 %v1377_v54, %s2423_s22 }
 0x34c   : > { %1432 = vrot.lane.b32.xlu0 %v3778_v29, %s2422_s21  ;;  %1408 = vrot.lane.b32.xlu1 %v3780_v18, %s2422_s21 }
 0x350   : > { %1982 = vperm.xlu0 %2391, %v3455_v60   ;;  %1416 = vrot.lane.b32.xlu1 %v3780_v18, %s2423_s22 }
 0x354   : > { %1440 = vrot.lane.b32.xlu0 %v3778_v29, %s2423_s22  ;;  %1434 = vrot.lane.b32.xlu1 %v3790_v38, %s2422_s21 }
 0x355   : > { %2392 = vset.pattern.permute.xlu0 %v4567_v39  ;;  %v4611_v39 = vmov 34  }
 0x358   : > { %1442 = vrot.lane.b32.xlu1 %v3790_v38, %s2423_s22  ;;  %2004 = vperm.xlu0 %2392, %v3455_v60  }
 0x35c   : > { %1539 = vrot.lane.b32.xlu1 %v3742_v12, %s2424_s25  ;;  %2393 = vset.pattern.permute.xlu0 %v4568_v7  ;;  %v4612_v7 = vmov 26  }
 0x35d   : > { %2026 = vperm.xlu0 %2393, %v3455_v60  }
 0x360   : > { %1541 = vrot.lane.b32.xlu1 %v3753_v51, %s2424_s25 }
 0x361   : > { %2394 = vset.pattern.permute.xlu0 %v4610_v34 }
 0x362   : > { %2048 = vperm.xlu0 %2394, %v3455_v60  }
 0x364   : > { %1561 = vrot.lane.b32.xlu1 %v1373_v37, %s2424_s25 }
 0x366   : > { %2395 = vset.pattern.permute.xlu0 %v4611_v39 }
 0x367   : > { %2070 = vperm.xlu0 %2395, %v3455_v60  }
 0x368   : > { %1563 = vrot.lane.b32.xlu1 %v1377_v54, %s2424_s25 }
 0x36b   : > { %2396 = vset.pattern.permute.xlu0 %v4569_v41  ;;  %v3839_v41 = vpop.permute.xlu1 %1878 }
 0x36c   : > { %1583 = vrot.lane.b32.xlu1 %v3765_v2, %s2424_s25  ;;  %2092 = vperm.xlu0 %2396, %v3455_v60  }
 0x36f   : > { %v3843_v14 = vpop.permute.xlu1 %1918 }
 0x370   : > { %1585 = vrot.lane.b32.xlu1 %v3780_v18, %s2424_s25  ;;  %2397 = vset.pattern.permute.xlu0 %v4570_v55  ;;  %v3841_v55 = vpop.permute.xlu0 %1846 }
 0x371   : > { %2114 = vperm.xlu0 %2397, %v3455_v60  }
 0x373   : > { %v3847_v57 = vpop.permute.xlu1 %1960 }
 0x374   : > { %1605 = vrot.lane.b32.xlu1 %v3778_v29, %s2424_s25  ;;  %v3845_v40 = vpop.permute.xlu0 %1894 }
 0x375   : > { %2398 = vset.pattern.permute.xlu0 %v4612_v7 }
 0x378   : > { %1607 = vrot.lane.b32.xlu1 %v3790_v38, %s2424_s25  ;;  %v3849_v21 = vpop.permute.xlu0 %1938 }
 0x37c   : > { %1997 = vrot.lane.b32.xlu1 %v3742_v12, %s2461_s28 }
 0x380   : > { %1999 = vrot.lane.b32.xlu1 %v3753_v51, %s2461_s28 }
 0x384   : > { %2019 = vrot.lane.b32.xlu1 %v1373_v37, %s2461_s28 }
 0x388   : > { %2021 = vrot.lane.b32.xlu1 %v1377_v54, %s2461_s28 }
 0x38c   : > { %2041 = vrot.lane.b32.xlu1 %v3765_v2, %s2461_s28 }
 0x390   : > { %2043 = vrot.lane.b32.xlu1 %v3780_v18, %s2461_s28 }
 0x394   : > { %2063 = vrot.lane.b32.xlu1 %v3778_v29, %s2461_s28 }
 0x398   : > { %2065 = vrot.lane.b32.xlu1 %v3790_v38, %s2461_s28 }
 0x3aa   : > { %v1355_v35 = vpop.permute.xlu1 %1354  ;;  %v3851_v31 = vpop.permute.xlu0 %1362 }
 0x3ae   : > { %v1357_v16 = vpop.permute.xlu1 %1356  ;;  %v1381_v45 = vpop.permute.xlu0 %1380 }
 0x3af   : > { %v1359_v53 = vsel %vm288_vm2, %v1357_v16, %v1355_v35  ;;  %v1358_v49 = vsel %vm288_vm2, %v1355_v35, %v1357_v16 }
 0x3b0   : > { %v3856_v42 = vmul.f32 %v1359_v53, %v4593_v59  ;;  %v3865_v47 = vmul.f32 %v1358_v49, %v4595_v43 }
 0x3b2   : > { %1453 = vrot.lane.b32.xlu1 %v3856_v42, %s2424_s25  ;;  %v3862_v8 = vpop.permute.xlu1 %1364  ;;  %v3867_v19 = vpop.permute.xlu0 %1388  ;;  %v1726_v44 = vrot.slane %v3856_v42, %v2990_v28  ;;  %v1730_v34 = vrot.slane %v3865_v47, %v2990_v28 }
 0x3b4   : > { %v1731_v33 = vmul.f32 %v1726_v44, %v3593_v1 }
 0x3b6   : > { %1455 = vrot.lane.b32.xlu1 %v3865_v47, %s2424_s25  ;;  %v1383_v63 = vpop.permute.xlu1 %1382  ;;  %v1407_v50 = vpop.permute.xlu0 %1406 }
 0x3b7   : > { %v1384_v10 = vsel %vm288_vm2, %v1381_v45, %v1383_v63  ;;  %v1385_v5 = vsel %vm288_vm2, %v1383_v63, %v1381_v45 }
 0x3b8   : > { %v1386_v37 = vmul.f32 %v1385_v5, %v4593_v59  ;;  %v3879_v54 = vmul.f32 %v1384_v10, %v4595_v43  ;;  %v1732_v10 = vmul.f32 %v1730_v34, %v3593_v1 }
 0x3ba   : > { %v1740_v13 = vrot.slane %v1386_v37, %v2990_v28  ;;  %v3882_v9 = vpop.permute.xlu1 %1390  ;;  %1931 = vrot.lane.b32.xlu0 %v1386_v37, %s2461_s28  ;;  %1473 = vrot.lane.b32.xlu1 %v1386_v37, %s2424_s25  ;;  %v1744_v6 = vrot.slane %v3879_v54, %v2990_v28  ;;  %v3900_v53 = vpop.permute.xlu0 %1414 }
 0x3bc   : > { %v1745_v22 = vmul.f32 %v1740_v13, %v3599_v24  ;;  %v1746_v45 = vmul.f32 %v1744_v6, %v3599_v24  ;;  %v4613_v24 = vmov 35  }
 0x3be   : > { %v1747_v39 = vadd.f32 %v1745_v22, %v1731_v33  ;;  %v1409_v7 = vpop.permute.xlu1 %1408  ;;  %1475 = vrot.lane.b32.xlu1 %v3879_v54, %s2424_s25  ;;  %2136 = vperm.xlu0 %2398, %v3455_v60   ;;  %v1748_v13 = vadd.f32 %v1746_v45, %v1732_v10  ;;  %v1433_v22 = vpop.permute.xlu0 %1432  ;;  %v1788_v10 = vrot.slane %v3742_v12, %v2990_v28 }
 0x3bf   : > { %v1410_v35 = vsel %vm288_vm2, %v1407_v50, %v1409_v7  ;;  %v1411_v16 = vsel %vm288_vm2, %v1409_v7, %v1407_v50  ;;  %v1392_v12 = vsel %vm297_vm4, %v3867_v19, %v3882_v9 }
 0x3c0   : > { %v3903_v49 = vmul.f32 %v1411_v16, %v4593_v59  ;;  %v3906_v63 = vmul.f32 %v1410_v35, %v4595_v43 }
 0x3c2   : > { %v1756_v5 = vrot.slane %v3903_v49, %v2990_v28  ;;  %v1760_v44 = vrot.slane %v3906_v63, %v2990_v28  ;;  %v3913_v37 = vpop.permute.xlu1 %1416  ;;  %1495 = vrot.lane.b32.xlu1 %v3903_v49, %s2424_s25  ;;  %2399 = vset.pattern.permute.xlu0 %v4613_v24 }
 0x3c3   : > { %2158 = vperm.xlu0 %2399, %v3455_v60   ;;  %v1792_v60 = vrot.slane %v3753_v51, %v2990_v28 }
 0x3c4   : > { %v1761_v50 = vmul.f32 %v1756_v5, %v3737_v32  ;;  %v1762_v33 = vmul.f32 %v1760_v44, %v3737_v32  ;;  %v1820_v44 = vrot.slane %v3765_v2, %v3759_v58  ;;  %v1836_v2 = vrot.slane %v3778_v29, %v3771_v20 }
 0x3c5   : > { %v1794_v24 = vmul.f32 %v1792_v60, %v3607_v46  ;;  %v1367_v29 = vsel %vm297_vm4, %v3862_v8, %v3851_v31 }
 0x3c6   : > { %v1763_v1 = vadd.f32 %v1761_v50, %v1747_v39  ;;  %v1764_v6 = vadd.f32 %v1762_v33, %v1748_v13  ;;  %v1435_v34 = vpop.permute.xlu1 %1434  ;;  %1497 = vrot.lane.b32.xlu1 %v3906_v63, %s2424_s25  ;;  %v1824_v13 = vrot.slane %v3780_v18, %v3759_v58  ;;  %v1840_v18 = vrot.slane %v3790_v38, %v3771_v20 }
 0x3c7   : > { %v1436_v7 = vsel %vm288_vm2, %v1433_v22, %v1435_v34  ;;  %v1437_v35 = vsel %vm288_vm2, %v1435_v34, %v1433_v22 }
 0x3c8   : > { %v3928_v16 = vmul.f32 %v1437_v35, %v4593_v59  ;;  %v3931_v32 = vmul.f32 %v1436_v7, %v4595_v43  ;;  %v1366_v59 = vsel %vm297_vm4, %v3851_v31, %v3862_v8  ;;  %v1418_v7 = vsel %vm297_vm4, %v3900_v53, %v3913_v37 }
 0x3c9   : > { %v3961_v50 = vmul.f32 %v1366_v59, %v4597_v15  ;;  %v1825_v35 = vmul.f32 %v1820_v44, %v3611_v4  ;;  %v1826_v60 = vmul.f32 %v1824_v13, %v3611_v4  ;;  %v1841_v8 = vmul.f32 %v1836_v2, %v3615_v27 }
 0x3ca   : > { %v1772_v39 = vrot.slane %v3928_v16, %v2990_v28  ;;  %v1776_v45 = vrot.slane %v3931_v32, %v2990_v28  ;;  %v3941_v5 = vpop.permute.xlu1 %1442  ;;  %1517 = vrot.lane.b32.xlu1 %v3928_v16, %s2424_s25  ;;  %v1842_v59 = vmul.f32 %v1840_v18, %v3615_v27  ;;  %v1393_v18 = vsel %vm297_vm4, %v3882_v9, %v3867_v19 }
 0x3cb   : > { %v4039_v19 = vmul.f32 %v1393_v18, %v4598_v0 }
 0x3cc   : > { %v1777_v43 = vmul.f32 %v1772_v39, %v3603_v52  ;;  %v1778_v51 = vmul.f32 %v1776_v45, %v3603_v52  ;;  %v1793_v52 = vmul.f32 %v1788_v10, %v3607_v46  ;;  %v1852_v39 = vrot.slane %v3961_v50, %v2990_v28 }
 0x3cd   : > { %v3988_v45 = vmul.f32 %v1418_v7, %v4597_v15 }
 0x3ce   : > { %v1779_v33 = vadd.f32 %v1777_v43, %v1763_v1  ;;  %v1780_v22 = vadd.f32 %v1778_v51, %v1764_v6  ;;  %v1540_v34 = vpop.permute.xlu1 %1539  ;;  %1519 = vrot.lane.b32.xlu1 %v3931_v32, %s2424_s25  ;;  %v3977_v1 = vmul.f32 %v1392_v12, %v4597_v15 }
 0x3cf   : > { %v3972_v58 = vpop.permute.xlu0 %1982  ;;  %v1884_v13 = vrot.slane %v3988_v45, %v2990_v28 }
 0x3d0   : > { %v1795_v46 = vadd.f32 %v1793_v52, %v1779_v33  ;;  %v1796_v6 = vadd.f32 %v1794_v24, %v1780_v22  ;;  %v1857_v24 = vmul.f32 %v1852_v39, %v3841_v55 }
 0x3d2   : > { %v1811_v20 = vadd.f32 %v3749_v48, %v1795_v46  ;;  %v1812_v38 = vadd.f32 %v3751_v30, %v1796_v6  ;;  %v1542_v10 = vpop.permute.xlu1 %1541  ;;  %1627 = vrot.lane.b32.xlu1 %v3961_v50, %s2424_s25  ;;  %v4005_v48 = vmul.f32 %v1367_v29, %v4598_v0  ;;  %v1868_v30 = vrot.slane %v3977_v1, %v2990_v28 }
 0x3d3   : > { %v3996_v31 = vsel %vm359_vm7, %v1540_v34, %v1542_v10  ;;  %v4000_v4 = vsel %vm359_vm7, %v1542_v10, %v1540_v34  ;;  %v1441_v43 = vpop.permute.xlu0 %1440  ;;  %v4614_v34 = vld [vmem:[#allocation14_spill] sm:$0xff]  ;;  %v1889_v6 = vmul.f32 %v1884_v13, %v3839_v41  ;;  %v1419_v10 = vsel %vm297_vm4, %v3913_v37, %v3900_v53 }
 0x3d4   : > { %v1827_v51 = vadd.f32 %v1825_v35, %v1811_v20  ;;  %v1828_v44 = vadd.f32 %v1826_v60, %v1812_v38  ;;  %v1444_v12 = vsel %vm297_vm4, %v1441_v43, %v3941_v5  ;;  %v1873_v2 = vmul.f32 %v1868_v30, %v4614_v34 }
 0x3d5   : > { %v1446_v52 = vmul.f32 %v1444_v12, %v4597_v15  ;;  %v1445_v53 = vsel %vm297_vm4, %v3941_v5, %v1441_v43 }
 0x3d6   : > { %v1843_v33 = vadd.f32 %v1841_v8, %v1827_v51  ;;  %v4015_v27 = vadd.f32 %v1842_v59, %v1828_v44  ;;  %v1562_v22 = vpop.permute.xlu1 %1561  ;;  %1629 = vrot.lane.b32.xlu1 %v4005_v48, %s2424_s25  ;;  %v4061_v51 = vmul.f32 %v1419_v10, %v4598_v0  ;;  %v4078_v13 = vmul.f32 %v1445_v53, %v4598_v0 }
 0x3d7   : > { %v1900_v46 = vrot.slane %v1446_v52, %v2990_v28  ;;  %2151 = vrot.lane.b32.xlu0 %v1446_v52, %s2461_s28 }
 0x3d8   : > { %v1859_v7 = vadd.f32 %v1857_v24, %v1843_v33 }
 0x3d9   : > { %v1905_v39 = vmul.f32 %v1900_v46, %v3845_v40 }
 0x3da   : > { %v1875_v29 = vadd.f32 %v1873_v2, %v1859_v7  ;;  %v1564_v35 = vpop.permute.xlu1 %1563  ;;  %1649 = vrot.lane.b32.xlu1 %v3977_v1, %s2424_s25 }
 0x3db   : > { %v4032_v15 = vsel %vm359_vm7, %v1562_v22, %v1564_v35  ;;  %v4036_v60 = vsel %vm359_vm7, %v1564_v35, %v1562_v22 }
 0x3dc   : > { %v1891_v9 = vadd.f32 %v1889_v6, %v1875_v29 }
 0x3de   : > { %v4042_v20 = vadd.f32 %v1905_v39, %v1891_v9  ;;  %v1584_v38 = vpop.permute.xlu1 %1583  ;;  %1651 = vrot.lane.b32.xlu1 %v4039_v19, %s2424_s25 }
 0x3e2   : > { %v1586_v8 = vpop.permute.xlu1 %1585  ;;  %1671 = vrot.lane.b32.xlu1 %v3988_v45, %s2424_s25 }
 0x3e3   : > { %v4054_v59 = vsel %vm359_vm7, %v1584_v38, %v1586_v8  ;;  %v4058_v30 = vsel %vm359_vm7, %v1586_v8, %v1584_v38 }
 0x3e6   : > { %v1606_v44 = vpop.permute.xlu1 %1605  ;;  %1673 = vrot.lane.b32.xlu1 %v4061_v51, %s2424_s25 }
 0x3ea   : > { %v1608_v37 = vpop.permute.xlu1 %1607  ;;  %1693 = vrot.lane.b32.xlu1 %v1446_v52, %s2424_s25 }
 0x3eb   : > { %v4071_v12 = vsel %vm359_vm7, %v1606_v44, %v1608_v37  ;;  %v4075_v24 = vsel %vm359_vm7, %v1608_v37, %v1606_v44  ;;  %v4615_v44 = vld [vmem:[#allocation15_spill] sm:$0xff] }
 0x3ee   : > { %v1998_v33 = vpop.permute.xlu1 %1997  ;;  %1695 = vrot.lane.b32.xlu1 %v4078_v13, %s2424_s25 }
 0x3f2   : > { %v2000_v22 = vpop.permute.xlu1 %1999  ;;  %1911 = vrot.lane.b32.xlu1 %v3856_v42, %s2461_s28 }
 0x3f3   : > { %v4086_v5 = vsel %vm786_vm9, %v1998_v33, %v2000_v22  ;;  %v4090_v43 = vsel %vm786_vm9, %v2000_v22, %v1998_v33  ;;  %v4616_v33 = vld [vmem:[#allocation18_spill] sm:$0xff] }
 0x3f6   : > { %v2020_v52 = vpop.permute.xlu1 %2019  ;;  %1913 = vrot.lane.b32.xlu1 %v3865_v47, %s2461_s28 }
 0x3fa   : > { %v2022_v0 = vpop.permute.xlu1 %2021  ;;  %1933 = vrot.lane.b32.xlu1 %v3879_v54, %s2461_s28 }
 0x3fb   : > { %v4098_v2 = vsel %vm786_vm9, %v2020_v52, %v2022_v0  ;;  %v4102_v42 = vsel %vm786_vm9, %v2022_v0, %v2020_v52 }
 0x3fe   : > { %v2042_v7 = vpop.permute.xlu1 %2041  ;;  %1953 = vrot.lane.b32.xlu1 %v3903_v49, %s2461_s28 }
 0x402   : > { %v2044_v18 = vpop.permute.xlu1 %2043  ;;  %1955 = vrot.lane.b32.xlu1 %v3906_v63, %s2461_s28 }
 0x403   : > { %v4110_v47 = vsel %vm786_vm9, %v2042_v7, %v2044_v18  ;;  %v4114_v54 = vsel %vm786_vm9, %v2044_v18, %v2042_v7 }
 0x406   : > { %v2064_v46 = vpop.permute.xlu1 %2063  ;;  %1975 = vrot.lane.b32.xlu1 %v3928_v16, %s2461_s28 }
 0x40a   : > { %v2066_v6 = vpop.permute.xlu1 %2065  ;;  %1977 = vrot.lane.b32.xlu1 %v3931_v32, %s2461_s28 }
 0x40b   : > { %v4122_v49 = vsel %vm786_vm9, %v2064_v46, %v2066_v6  ;;  %v4126_v63 = vsel %vm786_vm9, %v2066_v6, %v2064_v46 }
 0x40e   : > { %2085 = vrot.lane.b32.xlu1 %v3961_v50, %s2461_s28 }
 0x412   : > { %2087 = vrot.lane.b32.xlu1 %v4005_v48, %s2461_s28 }
 0x416   : > { %2107 = vrot.lane.b32.xlu1 %v3977_v1, %s2461_s28 }
 0x41a   : > { %2109 = vrot.lane.b32.xlu1 %v4039_v19, %s2461_s28 }
 0x41e   : > { %2129 = vrot.lane.b32.xlu1 %v3988_v45, %s2461_s28 }
 0x422   : > { %2131 = vrot.lane.b32.xlu1 %v4061_v51, %s2461_s28 }
 0x424   : > { %v1454_v16 = vpop.permute.xlu1 %1453 }
 0x426   : > { %2153 = vrot.lane.b32.xlu1 %v4078_v13, %s2461_s28 }
 0x428   : > { %v1456_v32 = vpop.permute.xlu1 %1455 }
 0x429   : > { %v1457_v50 = vsel %vm359_vm7, %v1454_v16, %v1456_v32  ;;  %v1458_v1 = vsel %vm359_vm7, %v1456_v32, %v1454_v16 }
 0x42a   : > { %v1466_v35 = vrot.slane %v1458_v1, %v2990_v28  ;;  %v1470_v9 = vrot.slane %v1457_v50, %v2990_v28  ;;  %v4617_v1 = vld [vmem:[#allocation16_spill] sm:$0xff] }
 0x42c   : > { %v1474_v29 = vpop.permute.xlu1 %1473  ;;  %v1471_v53 = vmul.f32 %v1466_v35, %v4615_v44  ;;  %v1472_v37 = vmul.f32 %v1470_v9, %v4615_v44  ;;  %v1552_v44 = vrot.slane %v4000_v4, %v2990_v28  ;;  %v1596_v4 = vrot.slane %v4058_v30, %v2990_v28 }
 0x430   : > { %v1476_v45 = vpop.permute.xlu1 %1475 }
 0x431   : > { %v1477_v39 = vsel %vm359_vm7, %v1474_v29, %v1476_v45  ;;  %v1478_v38 = vsel %vm359_vm7, %v1476_v45, %v1474_v29 }
 0x432   : > { %v1486_v10 = vrot.slane %v1478_v38, %v2990_v28  ;;  %v1490_v8 = vrot.slane %v1477_v39, %v2990_v28 }
 0x434   : > { %v1491_v22 = vmul.f32 %v1486_v10, %v4616_v33  ;;  %v1492_v52 = vmul.f32 %v1490_v8, %v4616_v33  ;;  %v1496_v0 = vpop.permute.xlu1 %1495 }
 0x436   : > { %v1493_v7 = vadd.f32 %v1491_v22, %v1471_v53  ;;  %v1494_v18 = vadd.f32 %v1492_v52, %v1472_v37  ;;  %v1556_v53 = vrot.slane %v3996_v31, %v2990_v28  ;;  %v1574_v22 = vrot.slane %v4036_v60, %v2990_v28 }
 0x437   : > { %v1578_v52 = vrot.slane %v4032_v15, %v2990_v28  ;;  %v1600_v31 = vrot.slane %v4054_v59, %v2990_v28  ;;  %v1601_v59 = vmul.f32 %v1596_v4, %v3719_v61 }
 0x438   : > { %v1498_v46 = vpop.permute.xlu1 %1497 }
 0x439   : > { %v1499_v6 = vsel %vm359_vm7, %v1496_v0, %v1498_v46  ;;  %v1500_v16 = vsel %vm359_vm7, %v1498_v46, %v1496_v0  ;;  %v4618_v0 = vld [vmem:[#allocation17_spill] sm:$0xff]  ;;  %v1580_v15 = vmul.f32 %v1578_v52, %v3710_v11 }
 0x43a   : > { %v1508_v32 = vrot.slane %v1500_v16, %v2990_v28  ;;  %v1512_v50 = vrot.slane %v1499_v6, %v2990_v28  ;;  %v4619_v6 = vld [vmem:[#allocation25_spill] sm:$0xff] }
 0x43b   : > { %v1557_v16 = vmul.f32 %v1552_v44, %v4619_v6 }
 0x43c   : > { %v1513_v29 = vmul.f32 %v1508_v32, %v4617_v1  ;;  %v1514_v35 = vmul.f32 %v1512_v50, %v4617_v1  ;;  %v1518_v9 = vpop.permute.xlu1 %1517  ;;  %v1558_v32 = vmul.f32 %v1556_v53, %v4619_v6  ;;  %v1579_v1 = vmul.f32 %v1574_v22, %v3710_v11 }
 0x43e   : > { %v1515_v45 = vadd.f32 %v1513_v29, %v1493_v7  ;;  %v1516_v39 = vadd.f32 %v1514_v35, %v1494_v18  ;;  %v1618_v29 = vrot.slane %v4075_v24, %v2990_v28  ;;  %v1622_v35 = vrot.slane %v4071_v12, %v2990_v28 }
 0x440   : > { %v1520_v38 = vpop.permute.xlu1 %1519  ;;  %v1623_v12 = vmul.f32 %v1618_v29, %v3723_v62  ;;  %v1624_v53 = vmul.f32 %v1622_v35, %v3723_v62 }
 0x441   : > { %v1521_v10 = vsel %vm359_vm7, %v1518_v9, %v1520_v38  ;;  %v1522_v8 = vsel %vm359_vm7, %v1520_v38, %v1518_v9 }
 0x442   : > { %v1530_v37 = vrot.slane %v1522_v8, %v2990_v28  ;;  %v1534_v33 = vrot.slane %v1521_v10, %v2990_v28  ;;  %v1602_v10 = vmul.f32 %v1600_v31, %v3719_v61 }
 0x444   : > { %v1535_v7 = vmul.f32 %v1530_v37, %v4618_v0  ;;  %v1536_v18 = vmul.f32 %v1534_v33, %v4618_v0  ;;  %v1628_v46 = vpop.permute.xlu1 %1627 }
 0x446   : > { %v1537_v50 = vadd.f32 %v1535_v7, %v1515_v45  ;;  %v1538_v60 = vadd.f32 %v1536_v18, %v1516_v39 }
 0x448   : > { %v1559_v30 = vadd.f32 %v1557_v16, %v1537_v50  ;;  %v1560_v9 = vadd.f32 %v1558_v32, %v1538_v60  ;;  %v1630_v38 = vpop.permute.xlu1 %1629 }
 0x449   : > { %v1631_v45 = vsel %vm359_vm7, %v1628_v46, %v1630_v38  ;;  %v1632_v39 = vsel %vm359_vm7, %v1630_v38, %v1628_v46 }
 0x44a   : > { %v1581_v11 = vadd.f32 %v1579_v1, %v1559_v30  ;;  %v1582_v8 = vadd.f32 %v1580_v15, %v1560_v9  ;;  %v1640_v24 = vrot.slane %v1632_v39, %v2990_v28  ;;  %v1644_v44 = vrot.slane %v1631_v45, %v2990_v28  ;;  %v4216_v1 = vpop.permute.xlu0 %2004 }
 0x44c   : > { %v1603_v37 = vadd.f32 %v1601_v59, %v1581_v11  ;;  %v1604_v33 = vadd.f32 %v1602_v10, %v1582_v8  ;;  %v1650_v22 = vpop.permute.xlu1 %1649  ;;  %v1645_v0 = vmul.f32 %v1640_v24, %v3725_v3  ;;  %v1646_v7 = vmul.f32 %v1644_v44, %v3725_v3 }
 0x44d   : > { %v1856_v3 = vrot.slane %v4005_v48, %v2990_v28  ;;  %v1888_v24 = vrot.slane %v4061_v51, %v2990_v28 }
 0x44e   : > { %v1625_v61 = vadd.f32 %v1623_v12, %v1603_v37  ;;  %v1626_v52 = vadd.f32 %v1624_v53, %v1604_v33  ;;  %v4225_v59 = vpop.permute.xlu0 %2026 }
 0x44f   : > { %v1858_v38 = vmul.f32 %v1856_v3, %v3841_v55  ;;  %v1890_v33 = vmul.f32 %v1888_v24, %v3839_v41 }
 0x450   : > { %v1647_v18 = vadd.f32 %v1645_v0, %v1625_v61  ;;  %v1648_v46 = vadd.f32 %v1646_v7, %v1626_v52  ;;  %v1652_v4 = vpop.permute.xlu1 %1651 }
 0x451   : > { %v1653_v31 = vsel %vm359_vm7, %v1650_v22, %v1652_v4  ;;  %v1654_v6 = vsel %vm359_vm7, %v1652_v4, %v1650_v22  ;;  %v1860_v10 = vadd.f32 %v1858_v38, %v4015_v27 }
 0x452   : > { %v1662_v62 = vrot.slane %v1654_v6, %v2990_v28  ;;  %v1666_v16 = vrot.slane %v1653_v31, %v2990_v28  ;;  %v4234_v55 = vpop.permute.xlu0 %2048 }
 0x454   : > { %v1667_v32 = vmul.f32 %v1662_v62, %v3727_v36  ;;  %v1668_v50 = vmul.f32 %v1666_v16, %v3727_v36  ;;  %v1672_v60 = vpop.permute.xlu1 %1671  ;;  %v1872_v36 = vrot.slane %v4039_v19, %v2990_v28  ;;  %v4620_v62 = vld [vmem:[#allocation11_spill] sm:$0xff] }
 0x456   : > { %v1669_v15 = vadd.f32 %v1667_v32, %v1647_v18  ;;  %v1670_v29 = vadd.f32 %v1668_v50, %v1648_v46  ;;  %v1874_v8 = vmul.f32 %v1872_v36, %v4614_v34  ;;  %v1904_v34 = vrot.slane %v4078_v13, %v2990_v28  ;;  %v4244_v22 = vpop.permute.xlu0 %2070 }
 0x458   : > { %v1674_v35 = vpop.permute.xlu1 %1673  ;;  %v1876_v19 = vadd.f32 %v1874_v8, %v1860_v10  ;;  %v1906_v46 = vmul.f32 %v1904_v34, %v3845_v40  ;;  %v2010_v34 = vrot.slane %v4086_v5, %v2990_v28  ;;  %v2036_v5 = vrot.slane %v4102_v42, %v2990_v28 }
 0x459   : > { %v1675_v30 = vsel %vm359_vm7, %v1672_v60, %v1674_v35  ;;  %v1676_v9 = vsel %vm359_vm7, %v1674_v35, %v1672_v60 }
 0x45a   : > { %v1688_v48 = vrot.slane %v1675_v30, %v2990_v28  ;;  %v1684_v45 = vrot.slane %v1676_v9, %v2990_v28  ;;  %v1892_v52 = vadd.f32 %v1890_v33, %v1876_v19  ;;  %v4251_v4 = vpop.permute.xlu0 %2092 }
 0x45c   : > { %v1690_v39 = vmul.f32 %v1688_v48, %v3729_v17  ;;  %v1694_v11 = vpop.permute.xlu1 %1693  ;;  %v1689_v12 = vmul.f32 %v1684_v45, %v3729_v17  ;;  %v1908_v13 = vadd.f32 %v1906_v46, %v1892_v52 }
 0x45e   : > { %v1692_v44 = vadd.f32 %v1690_v39, %v1670_v29  ;;  %v1691_v17 = vadd.f32 %v1689_v12, %v1669_v15  ;;  %v4258_v3 = vpop.permute.xlu0 %2114 }
 0x460   : > { %v1696_v53 = vpop.permute.xlu1 %1695 }
 0x461   : > { %v1697_v27 = vsel %vm359_vm7, %v1694_v11, %v1696_v53  ;;  %v1698_v37 = vsel %vm359_vm7, %v1696_v53, %v1694_v11 }
 0x462   : > { %v1706_v51 = vrot.slane %v1698_v37, %v2990_v28  ;;  %v1710_v61 = vrot.slane %v1697_v27, %v2990_v28  ;;  %v1932_v29 = vpop.permute.xlu0 %1931 }
 0x464   : > { %v1711_v0 = vmul.f32 %v1706_v51, %v3733_v56  ;;  %v1712_v7 = vmul.f32 %v1710_v61, %v3733_v56  ;;  %v1912_v18 = vpop.permute.xlu1 %1911  ;;  %v2014_v51 = vrot.slane %v4090_v43, %v2990_v28 }
 0x466   : > { %v1713_v41 = vadd.f32 %v1711_v0, %v1691_v17  ;;  %v1714_v31 = vadd.f32 %v1712_v7, %v1692_v44 }
 0x468   : > { %v1715_v6 = vmul.f32 %v1713_v41, %v3167_v26  ;;  %v1718_v16 = vadd.f32 %v1714_v31, %v4620_v62  ;;  %v1914_v32 = vpop.permute.xlu1 %1913  ;;  %v2015_v31 = vmul.f32 %v2010_v34, %v4216_v1 }
 0x469   : > { %v1915_v9 = vsel %vm786_vm9, %v1912_v18, %v1914_v32  ;;  %v1916_v38 = vsel %vm786_vm9, %v1914_v32, %v1912_v18  ;;  %v2038_v32 = vmul.f32 %v2036_v5, %v4225_v59 }
 0x46a   : > { %v1717_v50 = vadd.f32 %v1715_v6, %v4620_v62  ;;  %v4256_v60 = vadd.f32 %v1908_v13, %v1718_v16  ;;  %v1924_v45 = vrot.slane %v1915_v9, %v2990_v28  ;;  %v1928_v39 = vrot.slane %v1916_v38, %v2990_v28 }
 0x46b   : > { %v2016_v13 = vmul.f32 %v2014_v51, %v4216_v1  ;;  %v2054_v6 = vrot.slane %v4110_v47, %v2990_v28 }
 0x46c   : > { %v1934_v56 = vpop.permute.xlu1 %1933  ;;  %v4261_v15 = vadd.f32 %v4042_v20, %v1717_v50  ;;  %v1929_v12 = vmul.f32 %v1924_v45, %v3843_v14  ;;  %v1930_v53 = vmul.f32 %v1928_v39, %v3843_v14  ;;  %v2080_v50 = vrot.slane %v4126_v63, %v2990_v28 }
 0x46d   : > { %v1935_v35 = vsel %vm786_vm9, %v1932_v29, %v1934_v56  ;;  %v1936_v26 = vsel %vm786_vm9, %v1934_v56, %v1932_v29  ;;  %v2059_v47 = vmul.f32 %v2054_v6, %v4234_v55 }
 0x46e   : > { %v1944_v48 = vrot.slane %v1935_v35, %v2990_v28  ;;  %v1948_v10 = vrot.slane %v1936_v26, %v2990_v28 }
 0x470   : > { %v1954_v40 = vpop.permute.xlu1 %1953  ;;  %v1949_v44 = vmul.f32 %v1944_v48, %v3849_v21  ;;  %v1950_v19 = vmul.f32 %v1948_v10, %v3849_v21 }
 0x472   : > { %v1951_v52 = vadd.f32 %v1949_v44, %v1929_v12  ;;  %v1952_v17 = vadd.f32 %v1950_v19, %v1930_v53 }
 0x474   : > { %v1956_v30 = vpop.permute.xlu1 %1955 }
 0x475   : > { %v1957_v36 = vsel %vm786_vm9, %v1954_v40, %v1956_v30  ;;  %v1958_v20 = vsel %vm786_vm9, %v1956_v30, %v1954_v40  ;;  %v2082_v30 = vmul.f32 %v2080_v50, %v4244_v22 }
 0x476   : > { %v1966_v11 = vrot.slane %v1957_v36, %v2990_v28  ;;  %v1970_v8 = vrot.slane %v1958_v20, %v2990_v28  ;;  %v2137_v20 = vpop.permute.xlu0 %2136 }
 0x478   : > { %v1976_v24 = vpop.permute.xlu1 %1975  ;;  %v1971_v27 = vmul.f32 %v1966_v11, %v3847_v57  ;;  %v1972_v37 = vmul.f32 %v1970_v8, %v3847_v57  ;;  %v2032_v57 = vrot.slane %v4098_v2, %v2990_v28  ;;  %v2058_v2 = vrot.slane %v4114_v54, %v2990_v28 }
 0x47a   : > { %v1973_v7 = vadd.f32 %v1971_v27, %v1951_v52  ;;  %v1974_v43 = vadd.f32 %v1972_v37, %v1952_v17  ;;  %v2037_v42 = vmul.f32 %v2032_v57, %v4225_v59  ;;  %v2060_v29 = vmul.f32 %v2058_v2, %v4234_v55  ;;  %v2159_v8 = vpop.permute.xlu0 %2158 }
 0x47c   : > { %v1978_v33 = vpop.permute.xlu1 %1977 }
 0x47d   : > { %v1979_v61 = vsel %vm786_vm9, %v1976_v24, %v1978_v33  ;;  %v1980_v21 = vsel %vm786_vm9, %v1978_v33, %v1976_v24 }
 0x47e   : > { %v1988_v14 = vrot.slane %v1979_v61, %v2990_v28  ;;  %v1992_v0 = vrot.slane %v1980_v21, %v2990_v28  ;;  %v2152_v21 = vpop.permute.xlu0 %2151 }
 0x480   : > { %v1993_v18 = vmul.f32 %v1988_v14, %v3972_v58  ;;  %v1994_v46 = vmul.f32 %v1992_v0, %v3972_v58  ;;  %v2086_v41 = vpop.permute.xlu1 %2085  ;;  %v2076_v58 = vrot.slane %v4122_v49, %v2990_v28 }
 0x482   : > { %v1995_v62 = vadd.f32 %v1993_v18, %v1973_v7  ;;  %v1996_v16 = vadd.f32 %v1994_v46, %v1974_v43  ;;  %v2081_v26 = vmul.f32 %v2076_v58, %v4244_v22 }
 0x484   : > { %v2017_v56 = vadd.f32 %v2015_v31, %v1995_v62  ;;  %v2018_v1 = vadd.f32 %v2016_v13, %v1996_v16  ;;  %v2088_v40 = vpop.permute.xlu1 %2087 }
 0x485   : > { %v2089_v48 = vsel %vm786_vm9, %v2086_v41, %v2088_v40  ;;  %v2090_v10 = vsel %vm786_vm9, %v2088_v40, %v2086_v41 }
 0x486   : > { %v2039_v54 = vadd.f32 %v2037_v42, %v2017_v56  ;;  %v2040_v35 = vadd.f32 %v2038_v32, %v2018_v1  ;;  %v2098_v39 = vrot.slane %v2089_v48, %v2990_v28  ;;  %v2102_v11 = vrot.slane %v2090_v10, %v2990_v28 }
 0x488   : > { %v2061_v59 = vadd.f32 %v2059_v47, %v2039_v54  ;;  %v2062_v9 = vadd.f32 %v2060_v29, %v2040_v35  ;;  %v2108_v38 = vpop.permute.xlu1 %2107  ;;  %v2103_v12 = vmul.f32 %v2098_v39, %v4251_v4  ;;  %v2104_v53 = vmul.f32 %v2102_v11, %v4251_v4 }
 0x48a   : > { %v2083_v49 = vadd.f32 %v2081_v26, %v2061_v59  ;;  %v2084_v36 = vadd.f32 %v2082_v30, %v2062_v9 }
 0x48c   : > { %v2110_v63 = vpop.permute.xlu1 %2109  ;;  %v2105_v52 = vadd.f32 %v2103_v12, %v2083_v49  ;;  %v2106_v17 = vadd.f32 %v2104_v53, %v2084_v36 }
 0x48d   : > { %v2111_v55 = vsel %vm786_vm9, %v2108_v38, %v2110_v63  ;;  %v2112_v45 = vsel %vm786_vm9, %v2110_v63, %v2108_v38 }
 0x48e   : > { %v2120_v24 = vrot.slane %v2111_v55, %v2990_v28  ;;  %v2124_v44 = vrot.slane %v2112_v45, %v2990_v28 }
 0x490   : > { %v2130_v22 = vpop.permute.xlu1 %2129  ;;  %v2125_v33 = vmul.f32 %v2120_v24, %v4258_v3  ;;  %v2126_v34 = vmul.f32 %v2124_v44, %v4258_v3 }
 0x492   : > { %v2127_v7 = vadd.f32 %v2125_v33, %v2105_v52  ;;  %v2128_v43 = vadd.f32 %v2126_v34, %v2106_v17 }
 0x494   : > { %v2132_v19 = vpop.permute.xlu1 %2131 }
 0x495   : > { %v2133_v27 = vsel %vm786_vm9, %v2130_v22, %v2132_v19  ;;  %v2134_v37 = vsel %vm786_vm9, %v2132_v19, %v2130_v22 }
 0x496   : > { %v2142_v51 = vrot.slane %v2133_v27, %v2990_v28  ;;  %v2146_v61 = vrot.slane %v2134_v37, %v2990_v28 }
 0x498   : > { %v2147_v14 = vmul.f32 %v2142_v51, %v2137_v20  ;;  %v2148_v4 = vmul.f32 %v2146_v61, %v2137_v20  ;;  %v2154_v0 = vpop.permute.xlu1 %2153 }
 0x499   : > { %v2155_v57 = vsel %vm786_vm9, %v2152_v21, %v2154_v0  ;;  %v2156_v5 = vsel %vm786_vm9, %v2154_v0, %v2152_v21 }
 0x49a   : > { %v2164_v3 = vrot.slane %v2155_v57, %v2990_v28  ;;  %v2168_v18 = vrot.slane %v2156_v5, %v2990_v28  ;;  %v2149_v46 = vadd.f32 %v2147_v14, %v2127_v7  ;;  %v2150_v41 = vadd.f32 %v2148_v4, %v2128_v43 }
 0x49c   : > { %v2169_v31 = vmul.f32 %v2164_v3, %v2159_v8  ;;  %v2170_v13 = vmul.f32 %v2168_v18, %v2159_v8 }
 0x49e   : > { %v2171_v6 = vadd.f32 %v2169_v31, %v2149_v46  ;;  %v2172_v2 = vadd.f32 %v2170_v13, %v2150_v41 }
 0x4a0   : > { %v2174_v62 = vmul.f32 %v2172_v2, %v3394_v23  ;;  %v2175_v16 = vadd.f32 %v2171_v6, %v4261_v15 }
 0x4a2   : > { %v2176_v25 = vadd.f32 %v2174_v62, %v4256_v60  ;;  %v2177_v42 = vmax.f32 %v2175_v16, 0.0 }
 0x4a4   : > { %v2178_v32 = vmax.f32 %v2176_v25, 0.0  ;;  %2179 = vst [vmem:[%s190_s7] sm:$0xff] %v2177_v42 }
 0x4a6   : > { %2180 = vst [vmem:[%s190_s7 + $0x8] sm:$0xff] %v2178_v32 }
 0x4a7 PF: > { %s13_s12 = sadd.s32 1, %s2418_s12  }
 0x4a8   : > { %p10_p4 = scmp.ge.s32.totalorder %s13_s12, 4  }
 0x4aa   :  { %12 = sbr.rel (!%p10_p4) target bundleno = 1 (0x1), region = 65 }

</bundles_post_ra>
